<compile_context>
chip_gen: v5e
topology: v5e:2x2
jax: 0.10.0
libtpu: 0.0.40
codegen_flags: <defaults>
</compile_context>

<pallas_src>
import functools

import jax
import jax.numpy as jnp
from jax import lax
from jax.experimental import pallas as pl
from jax.experimental.pallas import tpu as pltpu

H = 128          # hidden_size
L = 12           # num_layers
G4 = 4 * H       # i, f, g, o gates


def _sigmoid(x):
    # tanh-based logistic: stable, no divide, runs on the EUP.
    return 0.5 * jnp.tanh(0.5 * x) + 0.5


# ---------------------------------------------------------------------------
# Fused kernel: 12-layer LSTM recurrence + head epilogue (single invocation).
# ---------------------------------------------------------------------------
def fused_kernel(x_ref, wih0_ref, wihr_ref, whh_ref, b_ref, feats_ref,
                 w1_ref, bh_ref, w2_ref, b2_ref, out_ref, gpre_sc):
    T, Bp, _ = x_ref.shape
    n_layers = whh_ref.shape[0]

    # ---- layer-0 input projection: input size == 1 -> broadcast outer product
    x = x_ref[...]                                   # (T, Bp, 1)  f32
    w0 = wih0_ref[...][None]                         # (1, 1, 4H)  f32
    b0 = b_ref[0][None]                              # (1, 1, 4H)  f32
    gpre_sc[pl.ds(0, T), :, :] = x * w0 + b0         # (T, Bp, 4H) f32

    def run_layer(whh_l, gbase, proj):
        """One LSTM layer over T steps.

        gpre_sc[gbase + t] holds this layer's gate pre-activations
        (x_t @ W_ih + b).  If proj = (wih_next, b_next, nbase), the next
        layer's pre-activations are emitted as each h_t is produced, so those
        matmuls overlap with the serial recurrence instead of blocking at the
        head of the next layer.
        """
        # TODO(synk): on v5e/v6e, stage whh_l in the MXU across the time loop
        # (pltpu.matmul_push_rhs once + matmul_acc_lhs/matmul_pop per step) so
        # the constant RHS is not re-streamed for an 8-row LHS every step.
        def step(t, carry):
            hb, c = carry                                        # bf16 h, f32 c
            gates = (jnp.dot(hb, whh_l, preferred_element_type=jnp.float32)
                     + gpre_sc[gbase + t])                       # (Bp, 4H) f32
            i = _sigmoid(gates[:, 0:H])
            f = _sigmoid(gates[:, H:2 * H])
            g = jnp.tanh(gates[:, 2 * H:3 * H])
            o = _sigmoid(gates[:, 3 * H:4 * H])
            c_new = f * c + i * g
            hb_new = (o * jnp.tanh(c_new)).astype(jnp.bfloat16)  # one cast/step
            if proj is not None:
                wih_n, b_n, nbase = proj
                gpre_sc[nbase + t] = (
                    jnp.dot(hb_new, wih_n, preferred_element_type=jnp.float32)
                    + b_n)
            return hb_new, c_new

        hb0 = jnp.zeros((Bp, H), jnp.bfloat16)
        c0 = jnp.zeros((Bp, H), jnp.float32)
        # Full unroll is fine for small T; cap (unroll=4/8) for long sequences
        # to bound code size / vreg pressure.
        hb_fin, _ = lax.fori_loop(0, T, step, (hb0, c0), unroll=True)
        return hb_fin

    # ---- layers 0 .. L-2: recurrence + interleaved next-layer projection ----
    def layer_body(l, carry):
        parity = l % 2
        run_layer(whh_ref[l], parity * T,
                  (wihr_ref[l], b_ref[l + 1], (1 - parity) * T))
        return carry

    lax.fori_loop(0, n_layers - 1, layer_body, jnp.int32(0))

    # ---- last layer (nothing left to project) ----
    h_last = run_layer(whh_ref[n_layers - 1], ((n_layers - 1) % 2) * T, None)

    # ---- fused head: (Linear(128,32) folded into decoder L1) + ReLU + L2 ----
    lhs = jnp.concatenate([h_last, feats_ref[...]], axis=1)      # (Bp, 2H) bf16
    z = (jnp.dot(lhs, w1_ref[...], preferred_element_type=jnp.float32)
         + bh_ref[...])                                          # (Bp, 512) f32
    z = jnp.maximum(z, 0.0)
    out_ref[...] = (jnp.dot(z.astype(jnp.bfloat16), w2_ref[...],
                            preferred_element_type=jnp.float32)
                    + b2_ref[...])                               # (Bp,128) col 0


def fused_forward(x_tb, wih0, wih_rest, whh, b_lstm, feats, w1s, bh, w2p, b2p):
    T, Bp, _ = x_tb.shape
    return pl.pallas_call(
        fused_kernel,
        out_shape=jax.ShapeDtypeStruct((Bp, 128), jnp.float32),
        # No grid: whole arrays land in VMEM once (weights ~3.3 MB bf16).
        # gpre ping-pong scratch: current layer's and next layer's gate
        # pre-activations, 2*T*Bp*4H f32.
        scratch_shapes=[pltpu.VMEM((2 * T, Bp, G4), jnp.float32)],
    )(x_tb, wih0, wih_rest, whh, b_lstm, feats, w1s, bh, w2p, b2p)


# ---------------------------------------------------------------------------
# Full forward (parameters passed as a dict of jnp arrays).
# ---------------------------------------------------------------------------
def model_forward(params, prev_values, price, gtin, item_group,
                  day_of_the_week, date):
    B, T, _ = prev_values.shape
    Bp = ((B + 7) // 8) * 8          # pad batch to a sublane multiple

    # Embedding lookups (plain-JAX glue).
    gtin_e = params["gtin_emb"][gtin]            # (B, 32)
    grp_e = params["group_emb"][item_group]      # (B, 32)
    day_e = params["day_emb"][day_of_the_week]   # (B, 4)
    date_e = params["date_emb"][date]            # (B, 4)

    # Scalar input sequence, time-major and batch-padded: (T, Bp, 1).
    x_tb = (jnp.zeros((T, Bp, 1), jnp.float32)
            .at[:, :B, 0].set(prev_values[:, :, 0].T))

    # Feature slab for the head: [day(4), date(4), group(32), gtin(32),
    # price(1)] -> 73 cols, zero-padded to 128 lanes, bf16 (MXU input).
    feats = jnp.concatenate([day_e, date_e, grp_e, gtin_e, price], axis=1)
    feats_pad = (jnp.zeros((Bp, 128), jnp.float32)
                 .at[:B, :73].set(feats).astype(jnp.bfloat16))

    out_pad = fused_forward(
        x_tb, params["wih0_row"], params["wih"][1:], params["whh"],
        params["b_lstm"], feats_pad, params["w1_stack"], params["b_h"],
        params["w2_pad"], params["b2_pad"])                        # (Bp, 128)
    return out_pad[:B, 0:1]                                        # (B, 1)


# ---------------------------------------------------------------------------
# Pure-JAX reference (same parameterization, unfused f32 head) for a check.
# ---------------------------------------------------------------------------
def reference_forward(params, prev_values, price, gtin, item_group,
                      day_of_the_week, date):
    B, T, _ = prev_values.shape
    wih0 = params["wih0_row"]                           # (1, 4H) f32
    wih = params["wih"].astype(jnp.float32)             # (L, H, 4H)
    whh = params["whh"].astype(jnp.float32)             # (L, H, 4H)
    b = params["b_lstm"]                                # (L, 1, 4H)
    seq = prev_values[:, :, 0]                          # (B, T)

    layer_in = None
    h = None
    for l in range(L):
        h = jnp.zeros((B, H), jnp.float32)
        c = jnp.zeros((B, H), jnp.float32)
        outs = []
        for t in range(T):
            if l == 0:
                gin = seq[:, t:t + 1] * wih0
            else:
                gin = layer_in[:, t] @ wih[l]
            gates = gin + h @ whh[l] + b[l, 0]
            i = _sigmoid(gates[:, 0:H])
            f = _sigmoid(gates[:, H:2 * H])
            g = jnp.tanh(gates[:, 2 * H:3 * H])
            o = _sigmoid(gates[:, 3 * H:4 * H])
            c = f * c + i * g
            h = o * jnp.tanh(c)
            outs.append(h)
        layer_in = jnp.stack(outs, axis=1)

    lin = h @ params["wlin"] + params["blin"]
    gtin_e = params["gtin_emb"][gtin]
    grp_e = params["group_emb"][item_group]
    day_e = params["day_emb"][day_of_the_week]
    date_e = params["date_emb"][date]
    x = jnp.concatenate([lin, day_e, date_e, grp_e, gtin_e, price], axis=1)
    z = jnp.maximum(x @ params["w1_full"] + params["b1"], 0.0)
    return z @ params["w2"] + params["b2"]


# ---------------------------------------------------------------------------
# Deterministic parameter construction.
# ---------------------------------------------------------------------------
def make_params(key):
    ks = jax.random.split(key, 16)
    s = 0.08  # ~1/sqrt(H)

    # LSTM: gate weights stored pre-transposed (x @ W), gate order (i,f,g,o).
    # Layer 0 has input size 1 -> kept separately as a (1,4H) row; the
    # (L,H,4H) wih array's layer-0 slice is a placeholder and never shipped
    # to the kernel (wih[1:] is passed).
    wih0_row = (jax.random.normal(jax.random.fold_in(ks[0], 0),
                                  (1, G4), jnp.float32) * s)
    wih_layers = [jnp.zeros((H, G4), jnp.float32).at[0].set(wih0_row[0])]
    for l in range(1, L):
        wih_layers.append(jax.random.normal(jax.random.fold_in(ks[0], l),
                                            (H, G4), jnp.float32) * s)
    wih_f32 = jnp.stack(wih_layers)                                # (L, H, 4H)
    whh_f32 = jax.random.normal(ks[1], (L, H, G4), jnp.float32) * s
    b_lstm = (jax.random.normal(ks[2], (L, G4), jnp.float32) * s
              + jax.random.normal(ks[3], (L, G4), jnp.float32) * s)
    b_lstm = b_lstm.reshape(L, 1, G4)                              # b_ih + b_hh

    wlin = jax.random.normal(ks[4], (H, 32), jnp.float32) * s
    blin = jax.random.normal(ks[5], (1, 32), jnp.float32) * s

    gtin_emb = jax.random.normal(ks[6], (9269, 32), jnp.float32) * 0.1
    group_emb = jax.random.normal(ks[7], (130, 32), jnp.float32) * 0.1
    day_emb = jax.random.normal(ks[8], (7, 4), jnp.float32) * 0.1
    date_emb = jax.random.normal(ks[9], (365, 4), jnp.float32) * 0.1

    # Decoder Linear(105,512): the LSTM part (rows 0:32) is folded with the
    # Linear(128,32) (no nonlinearity between them); the feature part
    # (73 rows) is zero-padded to 128 rows.  Both are stacked into a single
    # (256,512) bf16 weight so the head is one matmul.  Linear(512,1) is
    # padded to 128 output lanes (lane-dense output slab).
    w1 = jax.random.normal(ks[10], (105, 512), jnp.float32) * 0.05
    b1 = jax.random.normal(ks[11], (1, 512), jnp.float32) * 0.05
    w2 = jax.random.normal(ks[12], (512, 1), jnp.float32) * 0.05
    b2 = jax.random.normal(ks[13], (1, 1), jnp.float32) * 0.05

    w1a = w1[:32]                                                  # (32, 512)
    w1_stack = jnp.zeros((2 * H, 512), jnp.float32)
    w1_stack = w1_stack.at[:H].set(wlin @ w1a)                     # lstm block
    w1_stack = w1_stack.at[H:H + 73].set(w1[32:])                  # feat block
    b_h = blin @ w1a + b1                                          # (1, 512)
    w2_pad = jnp.zeros((512, 128), jnp.float32).at[:, 0:1].set(w2)
    b2_pad = jnp.zeros((1, 128), jnp.float32).at[:, 0:1].set(b2)

    return dict(
        # kernel params
        wih0_row=wih0_row,
        wih=wih_f32.astype(jnp.bfloat16),
        whh=whh_f32.astype(jnp.bfloat16),
        b_lstm=b_lstm,
        w1_stack=w1_stack.astype(jnp.bfloat16),
        b_h=b_h,
        w2_pad=w2_pad.astype(jnp.bfloat16),
        b2_pad=b2_pad,
        gtin_emb=gtin_emb, group_emb=group_emb, day_emb=day_emb,
        date_emb=date_emb,
        # reference-only (unfused, f32) params
        wlin=wlin, blin=blin, w1_full=w1, b1=b1, w2=w2, b2=b2,
    )


if __name__ == "__main__":
    B, T = 2, 8
    key = jax.random.PRNGKey(0)
    k_in = jax.random.split(key, 8)

    params = make_params(jax.random.fold_in(key, 1))

    prev_values = jax.random.normal(k_in[0], (B, T, 1), jnp.float32)
    price = jax.random.normal(k_in[1], (B, 1), jnp.float32)
    gtin = jax.random.randint(k_in[2], (B,), 0, 9269)
    item_group = jax.random.randint(k_in[3], (B,), 0, 130)
    day_of_the_week = jax.random.randint(k_in[4], (B,), 0, 7)
    date = jax.random.randint(k_in[5], (B,), 0, 365)

    fwd = jax.jit(functools.partial(model_forward, params))
    out = fwd(prev_values, price, gtin, item_group, day_of_the_week, date)
    out = jax.block_until_ready(out)

    ref = reference_forward(params, prev_values, price, gtin, item_group,
                            day_of_the_week, date)
    ref = jax.block_until_ready(ref)

    assert out.shape == (B, 1), out.shape
    assert bool(jnp.all(jnp.isfinite(out)))
    max_err = float(jnp.max(jnp.abs(out - ref)))
    assert max_err < 0.1, f"mismatch vs reference: {max_err}"

    print("KERNEL_OK")
</pallas_src>

<mosaic_0001>
module attributes {stable_mosaic.version = 11 : i64} {
  func.func @fused_kernel(%arg0: memref<8x8x1xf32, #tpu.memory_space<vmem>>, %arg1: memref<1x512xf32, #tpu.memory_space<vmem>>, %arg2: memref<11x128x512xbf16, #tpu.memory_space<vmem>>, %arg3: memref<12x128x512xbf16, #tpu.memory_space<vmem>>, %arg4: memref<12x1x512xf32, #tpu.memory_space<vmem>>, %arg5: memref<8x128xbf16, #tpu.memory_space<vmem>>, %arg6: memref<256x512xbf16, #tpu.memory_space<vmem>>, %arg7: memref<1x512xf32, #tpu.memory_space<vmem>>, %arg8: memref<512x128xbf16, #tpu.memory_space<vmem>>, %arg9: memref<1x128xf32, #tpu.memory_space<vmem>>, %arg10: memref<8x128xf32, #tpu.memory_space<vmem>>, %arg11: memref<16x8x512xf32, #tpu.memory_space<vmem>>) attributes {dimension_semantics = [], scalar_prefetch = 0 : i64, scratch_operands = 1 : i64, tpu.core_type = #tpu.core_type<tc>} {
    %c0 = arith.constant 0 : index
    %c0_0 = arith.constant 0 : index
    %c0_1 = arith.constant 0 : index
    %0 = vector.load %arg0[%c0, %c0_0, %c0_1] : memref<8x8x1xf32, #tpu.memory_space<vmem>>, vector<8x8x1xf32>
    %c0_2 = arith.constant 0 : index
    %c0_3 = arith.constant 0 : index
    %1 = vector.load %arg1[%c0_2, %c0_3] : memref<1x512xf32, #tpu.memory_space<vmem>>, vector<1x512xf32>
    %2 = vector.shape_cast %1 : vector<1x512xf32> to vector<1x1x512xf32>
    %c0_4 = arith.constant 0 : index
    %c0_5 = arith.constant 0 : index
    %c0_6 = arith.constant 0 : index
    %3 = vector.load %arg4[%c0_4, %c0_5, %c0_6] : memref<12x1x512xf32, #tpu.memory_space<vmem>>, vector<1x1x512xf32>
    %4 = vector.shape_cast %3 : vector<1x1x512xf32> to vector<1x512xf32>
    %5 = vector.shape_cast %4 : vector<1x512xf32> to vector<1x1x512xf32>
    %6 = vector.broadcast %0 : vector<8x8x1xf32> to vector<8x8x512xf32>
    %7 = vector.broadcast %2 : vector<1x1x512xf32> to vector<8x8x512xf32>
    %8 = arith.mulf %6, %7 : vector<8x8x512xf32>
    %9 = vector.broadcast %5 : vector<1x1x512xf32> to vector<8x8x512xf32>
    %10 = arith.addf %8, %9 : vector<8x8x512xf32>
    %c0_7 = arith.constant 0 : index
    %c0_8 = arith.constant 0 : index
    %c0_9 = arith.constant 0 : index
    %11 = vector.load %arg11[%c0_7, %c0_8, %c0_9] : memref<16x8x512xf32, #tpu.memory_space<vmem>>, vector<8x8x512xf32>
    tpu.vector_store %arg11[%c0_7, %c0_8, %c0_9], %10 {strides = array<i32>} : memref<16x8x512xf32, #tpu.memory_space<vmem>>, vector<8x8x512xf32>,
    %c0_i32 = arith.constant 0 : i32
    %c11_i32 = arith.constant 11 : i32
    %12 = arith.addi %c0_i32, %c11_i32 : i32
    %c1_i32 = arith.constant 1 : i32
    scf.for %arg12 = %c0_i32 to %12 step %c1_i32  : i32 {
      %c2_i32_135 = arith.constant 2 : i32
      %c0_i32_136 = arith.constant 0 : i32
      %337 = arith.cmpi eq, %c2_i32_135, %c0_i32_136 : i32
      %c1_i32_137 = arith.constant 1 : i32
      %338 = arith.select %337, %c1_i32_137, %c2_i32_135 : i32
      %339 = arith.remsi %arg12, %338 : i32
      %c0_i32_138 = arith.constant 0 : i32
      %340 = arith.cmpi ne, %339, %c0_i32_138 : i32
      %c0_i32_139 = arith.constant 0 : i32
      %341 = arith.cmpi slt, %339, %c0_i32_139 : i32
      %c0_i32_140 = arith.constant 0 : i32
      %342 = arith.cmpi slt, %338, %c0_i32_140 : i32
      %343 = arith.xori %341, %342 : i1
      %344 = arith.andi %343, %340 : i1
      %345 = arith.addi %339, %338 : i32
      %346 = arith.select %344, %345, %339 : i32
      %347 = arith.index_cast %arg12 : i32 to index
      %c0_141 = arith.constant 0 : index
      %c0_142 = arith.constant 0 : index
      %348 = vector.load %arg3[%347, %c0_141, %c0_142] : memref<12x128x512xbf16, #tpu.memory_space<vmem>>, vector<1x128x512xbf16>
      %349 = vector.shape_cast %348 : vector<1x128x512xbf16> to vector<128x512xbf16>
      %c8_i32_143 = arith.constant 8 : i32
      %350 = arith.muli %346, %c8_i32_143 : i32
      %351 = arith.index_cast %arg12 : i32 to index
      %c0_144 = arith.constant 0 : index
      %c0_145 = arith.constant 0 : index
      %352 = vector.load %arg2[%351, %c0_144, %c0_145] : memref<11x128x512xbf16, #tpu.memory_space<vmem>>, vector<1x128x512xbf16>
      %353 = vector.shape_cast %352 : vector<1x128x512xbf16> to vector<128x512xbf16>
      %c1_i32_146 = arith.constant 1 : i32
      %354 = arith.addi %arg12, %c1_i32_146 : i32
      %355 = arith.index_cast %354 : i32 to index
      %c0_147 = arith.constant 0 : index
      %c0_148 = arith.constant 0 : index
      %356 = vector.load %arg4[%355, %c0_147, %c0_148] : memref<12x1x512xf32, #tpu.memory_space<vmem>>, vector<1x1x512xf32>
      %357 = vector.shape_cast %356 : vector<1x1x512xf32> to vector<1x512xf32>
      %c1_i32_149 = arith.constant 1 : i32
      %358 = arith.subi %c1_i32_149, %346 : i32
      %c8_i32_150 = arith.constant 8 : i32
      %359 = arith.muli %358, %c8_i32_150 : i32
      %cst_151 = arith.constant 0.000000e+00 : bf16
      %360 = vector.broadcast %cst_151 : bf16 to vector<8x128xbf16>
      %cst_152 = arith.constant 0.000000e+00 : f32
      %361 = vector.broadcast %cst_152 : f32 to vector<8x128xf32>
      %c0_i32_153 = arith.constant 0 : i32
      %cst_154 = arith.constant dense<0.000000e+00> : vector<8x512xf32>
      %362 = tpu.matmul %360, %349, %cst_154 {dimension_numbers = #tpu.dot_dimension_numbers<[1], [0], [0], [1], [0, 0, 1, 1], [], []>} : vector<8x128xbf16>, vector<128x512xbf16>, vector<8x512xf32> -> vector<8x512xf32>
      %363 = arith.addi %350, %c0_i32_153 : i32
      %364 = arith.index_cast %363 : i32 to index
      %c0_155 = arith.constant 0 : index
      %c0_156 = arith.constant 0 : index
      %365 = vector.load %arg11[%364, %c0_155, %c0_156] : memref<16x8x512xf32, #tpu.memory_space<vmem>>, vector<1x8x512xf32>
      %366 = vector.shape_cast %365 : vector<1x8x512xf32> to vector<8x512xf32>
      %367 = arith.addf %362, %366 : vector<8x512xf32>
      %368 = vector.extract_strided_slice %367 {offsets = [0, 0], sizes = [8, 128], strides = [1, 1]} : vector<8x512xf32> to vector<8x128xf32>
      %cst_157 = arith.constant 5.000000e-01 : f32
      %369 = vector.broadcast %cst_157 : f32 to vector<8x128xf32>
      %370 = arith.mulf %369, %368 : vector<8x128xf32>
      %371 = math.tanh %370 : vector<8x128xf32>
      %cst_158 = arith.constant 5.000000e-01 : f32
      %372 = vector.broadcast %cst_158 : f32 to vector<8x128xf32>
      %373 = arith.mulf %372, %371 : vector<8x128xf32>
      %cst_159 = arith.constant 5.000000e-01 : f32
      %374 = vector.broadcast %cst_159 : f32 to vector<8x128xf32>
      %375 = arith.addf %373, %374 : vector<8x128xf32>
      %376 = vector.extract_strided_slice %367 {offsets = [0, 128], sizes = [8, 128], strides = [1, 1]} : vector<8x512xf32> to vector<8x128xf32>
      %cst_160 = arith.constant 5.000000e-01 : f32
      %377 = vector.broadcast %cst_160 : f32 to vector<8x128xf32>
      %378 = arith.mulf %377, %376 : vector<8x128xf32>
      %379 = math.tanh %378 : vector<8x128xf32>
      %cst_161 = arith.constant 5.000000e-01 : f32
      %380 = vector.broadcast %cst_161 : f32 to vector<8x128xf32>
      %381 = arith.mulf %380, %379 : vector<8x128xf32>
      %cst_162 = arith.constant 5.000000e-01 : f32
      %382 = vector.broadcast %cst_162 : f32 to vector<8x128xf32>
      %383 = arith.addf %381, %382 : vector<8x128xf32>
      %384 = vector.extract_strided_slice %367 {offsets = [0, 256], sizes = [8, 128], strides = [1, 1]} : vector<8x512xf32> to vector<8x128xf32>
      %385 = math.tanh %384 : vector<8x128xf32>
      %386 = vector.extract_strided_slice %367 {offsets = [0, 384], sizes = [8, 128], strides = [1, 1]} : vector<8x512xf32> to vector<8x128xf32>
      %cst_163 = arith.constant 5.000000e-01 : f32
      %387 = vector.broadcast %cst_163 : f32 to vector<8x128xf32>
      %388 = arith.mulf %387, %386 : vector<8x128xf32>
      %389 = math.tanh %388 : vector<8x128xf32>
      %cst_164 = arith.constant 5.000000e-01 : f32
      %390 = vector.broadcast %cst_164 : f32 to vector<8x128xf32>
      %391 = arith.mulf %390, %389 : vector<8x128xf32>
      %cst_165 = arith.constant 5.000000e-01 : f32
      %392 = vector.broadcast %cst_165 : f32 to vector<8x128xf32>
      %393 = arith.addf %391, %392 : vector<8x128xf32>
      %394 = arith.mulf %383, %361 : vector<8x128xf32>
      %395 = arith.mulf %375, %385 : vector<8x128xf32>
      %396 = arith.addf %394, %395 : vector<8x128xf32>
      %397 = math.tanh %396 : vector<8x128xf32>
      %398 = arith.mulf %393, %397 : vector<8x128xf32>
      %399 = arith.truncf %398 : vector<8x128xf32> to vector<8x128xbf16>
      %cst_166 = arith.constant dense<0.000000e+00> : vector<8x512xf32>
      %400 = tpu.matmul %399, %353, %cst_166 {dimension_numbers = #tpu.dot_dimension_numbers<[1], [0], [0], [1], [0, 0, 1, 1], [], []>} : vector<8x128xbf16>, vector<128x512xbf16>, vector<8x512xf32> -> vector<8x512xf32>
      %401 = vector.broadcast %357 : vector<1x512xf32> to vector<8x512xf32>
      %402 = arith.addf %400, %401 : vector<8x512xf32>
      %403 = arith.addi %359, %c0_i32_153 : i32
      %404 = arith.index_cast %403 : i32 to index
      %c0_167 = arith.constant 0 : index
      %c0_168 = arith.constant 0 : index
      %405 = vector.load %arg11[%404, %c0_167, %c0_168] : memref<16x8x512xf32, #tpu.memory_space<vmem>>, vector<1x8x512xf32>
      %406 = vector.shape_cast %405 : vector<1x8x512xf32> to vector<8x512xf32>
      %407 = vector.shape_cast %402 : vector<8x512xf32> to vector<1x8x512xf32>
      tpu.vector_store %arg11[%404, %c0_167, %c0_168], %407 {strides = array<i32>} : memref<16x8x512xf32, #tpu.memory_space<vmem>>, vector<1x8x512xf32>,
      %c1_i32_169 = arith.constant 1 : i32
      %cst_170 = arith.constant dense<0.000000e+00> : vector<8x512xf32>
      %408 = tpu.matmul %399, %349, %cst_170 {dimension_numbers = #tpu.dot_dimension_numbers<[1], [0], [0], [1], [0, 0, 1, 1], [], []>} : vector<8x128xbf16>, vector<128x512xbf16>, vector<8x512xf32> -> vector<8x512xf32>
      %409 = arith.addi %350, %c1_i32_169 : i32
      %410 = arith.index_cast %409 : i32 to index
      %c0_171 = arith.constant 0 : index
      %c0_172 = arith.constant 0 : index
      %411 = vector.load %arg11[%410, %c0_171, %c0_172] : memref<16x8x512xf32, #tpu.memory_space<vmem>>, vector<1x8x512xf32>
      %412 = vector.shape_cast %411 : vector<1x8x512xf32> to vector<8x512xf32>
      %413 = arith.addf %408, %412 : vector<8x512xf32>
      %414 = vector.extract_strided_slice %413 {offsets = [0, 0], sizes = [8, 128], strides = [1, 1]} : vector<8x512xf32> to vector<8x128xf32>
      %cst_173 = arith.constant 5.000000e-01 : f32
      %415 = vector.broadcast %cst_173 : f32 to vector<8x128xf32>
      %416 = arith.mulf %415, %414 : vector<8x128xf32>
      %417 = math.tanh %416 : vector<8x128xf32>
      %cst_174 = arith.constant 5.000000e-01 : f32
      %418 = vector.broadcast %cst_174 : f32 to vector<8x128xf32>
      %419 = arith.mulf %418, %417 : vector<8x128xf32>
      %cst_175 = arith.constant 5.000000e-01 : f32
      %420 = vector.broadcast %cst_175 : f32 to vector<8x128xf32>
      %421 = arith.addf %419, %420 : vector<8x128xf32>
      %422 = vector.extract_strided_slice %413 {offsets = [0, 128], sizes = [8, 128], strides = [1, 1]} : vector<8x512xf32> to vector<8x128xf32>
      %cst_176 = arith.constant 5.000000e-01 : f32
      %423 = vector.broadcast %cst_176 : f32 to vector<8x128xf32>
      %424 = arith.mulf %423, %422 : vector<8x128xf32>
      %425 = math.tanh %424 : vector<8x128xf32>
      %cst_177 = arith.constant 5.000000e-01 : f32
      %426 = vector.broadcast %cst_177 : f32 to vector<8x128xf32>
      %427 = arith.mulf %426, %425 : vector<8x128xf32>
      %cst_178 = arith.constant 5.000000e-01 : f32
      %428 = vector.broadcast %cst_178 : f32 to vector<8x128xf32>
      %429 = arith.addf %427, %428 : vector<8x128xf32>
      %430 = vector.extract_strided_slice %413 {offsets = [0, 256], sizes = [8, 128], strides = [1, 1]} : vector<8x512xf32> to vector<8x128xf32>
      %431 = math.tanh %430 : vector<8x128xf32>
      %432 = vector.extract_strided_slice %413 {offsets = [0, 384], sizes = [8, 128], strides = [1, 1]} : vector<8x512xf32> to vector<8x128xf32>
      %cst_179 = arith.constant 5.000000e-01 : f32
      %433 = vector.broadcast %cst_179 : f32 to vector<8x128xf32>
      %434 = arith.mulf %433, %432 : vector<8x128xf32>
      %435 = math.tanh %434 : vector<8x128xf32>
      %cst_180 = arith.constant 5.000000e-01 : f32
      %436 = vector.broadcast %cst_180 : f32 to vector<8x128xf32>
      %437 = arith.mulf %436, %435 : vector<8x128xf32>
      %cst_181 = arith.constant 5.000000e-01 : f32
      %438 = vector.broadcast %cst_181 : f32 to vector<8x128xf32>
      %439 = arith.addf %437, %438 : vector<8x128xf32>
      %440 = arith.mulf %429, %396 : vector<8x128xf32>
      %441 = arith.mulf %421, %431 : vector<8x128xf32>
      %442 = arith.addf %440, %441 : vector<8x128xf32>
      %443 = math.tanh %442 : vector<8x128xf32>
      %444 = arith.mulf %439, %443 : vector<8x128xf32>
      %445 = arith.truncf %444 : vector<8x128xf32> to vector<8x128xbf16>
      %cst_182 = arith.constant dense<0.000000e+00> : vector<8x512xf32>
      %446 = tpu.matmul %445, %353, %cst_182 {dimension_numbers = #tpu.dot_dimension_numbers<[1], [0], [0], [1], [0, 0, 1, 1], [], []>} : vector<8x128xbf16>, vector<128x512xbf16>, vector<8x512xf32> -> vector<8x512xf32>
      %447 = vector.broadcast %357 : vector<1x512xf32> to vector<8x512xf32>
      %448 = arith.addf %446, %447 : vector<8x512xf32>
      %449 = arith.addi %359, %c1_i32_169 : i32
      %450 = arith.index_cast %449 : i32 to index
      %c0_183 = arith.constant 0 : index
      %c0_184 = arith.constant 0 : index
      %451 = vector.load %arg11[%450, %c0_183, %c0_184] : memref<16x8x512xf32, #tpu.memory_space<vmem>>, vector<1x8x512xf32>
      %452 = vector.shape_cast %451 : vector<1x8x512xf32> to vector<8x512xf32>
      %453 = vector.shape_cast %448 : vector<8x512xf32> to vector<1x8x512xf32>
      tpu.vector_store %arg11[%450, %c0_183, %c0_184], %453 {strides = array<i32>} : memref<16x8x512xf32, #tpu.memory_space<vmem>>, vector<1x8x512xf32>,
      %c2_i32_185 = arith.constant 2 : i32
      %cst_186 = arith.constant dense<0.000000e+00> : vector<8x512xf32>
      %454 = tpu.matmul %445, %349, %cst_186 {dimension_numbers = #tpu.dot_dimension_numbers<[1], [0], [0], [1], [0, 0, 1, 1], [], []>} : vector<8x128xbf16>, vector<128x512xbf16>, vector<8x512xf32> -> vector<8x512xf32>
      %455 = arith.addi %350, %c2_i32_185 : i32
      %456 = arith.index_cast %455 : i32 to index
      %c0_187 = arith.constant 0 : index
      %c0_188 = arith.constant 0 : index
      %457 = vector.load %arg11[%456, %c0_187, %c0_188] : memref<16x8x512xf32, #tpu.memory_space<vmem>>, vector<1x8x512xf32>
      %458 = vector.shape_cast %457 : vector<1x8x512xf32> to vector<8x512xf32>
      %459 = arith.addf %454, %458 : vector<8x512xf32>
      %460 = vector.extract_strided_slice %459 {offsets = [0, 0], sizes = [8, 128], strides = [1, 1]} : vector<8x512xf32> to vector<8x128xf32>
      %cst_189 = arith.constant 5.000000e-01 : f32
      %461 = vector.broadcast %cst_189 : f32 to vector<8x128xf32>
      %462 = arith.mulf %461, %460 : vector<8x128xf32>
      %463 = math.tanh %462 : vector<8x128xf32>
      %cst_190 = arith.constant 5.000000e-01 : f32
      %464 = vector.broadcast %cst_190 : f32 to vector<8x128xf32>
      %465 = arith.mulf %464, %463 : vector<8x128xf32>
      %cst_191 = arith.constant 5.000000e-01 : f32
      %466 = vector.broadcast %cst_191 : f32 to vector<8x128xf32>
      %467 = arith.addf %465, %466 : vector<8x128xf32>
      %468 = vector.extract_strided_slice %459 {offsets = [0, 128], sizes = [8, 128], strides = [1, 1]} : vector<8x512xf32> to vector<8x128xf32>
      %cst_192 = arith.constant 5.000000e-01 : f32
      %469 = vector.broadcast %cst_192 : f32 to vector<8x128xf32>
      %470 = arith.mulf %469, %468 : vector<8x128xf32>
      %471 = math.tanh %470 : vector<8x128xf32>
      %cst_193 = arith.constant 5.000000e-01 : f32
      %472 = vector.broadcast %cst_193 : f32 to vector<8x128xf32>
      %473 = arith.mulf %472, %471 : vector<8x128xf32>
      %cst_194 = arith.constant 5.000000e-01 : f32
      %474 = vector.broadcast %cst_194 : f32 to vector<8x128xf32>
      %475 = arith.addf %473, %474 : vector<8x128xf32>
      %476 = vector.extract_strided_slice %459 {offsets = [0, 256], sizes = [8, 128], strides = [1, 1]} : vector<8x512xf32> to vector<8x128xf32>
      %477 = math.tanh %476 : vector<8x128xf32>
      %478 = vector.extract_strided_slice %459 {offsets = [0, 384], sizes = [8, 128], strides = [1, 1]} : vector<8x512xf32> to vector<8x128xf32>
      %cst_195 = arith.constant 5.000000e-01 : f32
      %479 = vector.broadcast %cst_195 : f32 to vector<8x128xf32>
      %480 = arith.mulf %479, %478 : vector<8x128xf32>
      %481 = math.tanh %480 : vector<8x128xf32>
      %cst_196 = arith.constant 5.000000e-01 : f32
      %482 = vector.broadcast %cst_196 : f32 to vector<8x128xf32>
      %483 = arith.mulf %482, %481 : vector<8x128xf32>
      %cst_197 = arith.constant 5.000000e-01 : f32
      %484 = vector.broadcast %cst_197 : f32 to vector<8x128xf32>
      %485 = arith.addf %483, %484 : vector<8x128xf32>
      %486 = arith.mulf %475, %442 : vector<8x128xf32>
      %487 = arith.mulf %467, %477 : vector<8x128xf32>
      %488 = arith.addf %486, %487 : vector<8x128xf32>
      %489 = math.tanh %488 : vector<8x128xf32>
      %490 = arith.mulf %485, %489 : vector<8x128xf32>
      %491 = arith.truncf %490 : vector<8x128xf32> to vector<8x128xbf16>
      %cst_198 = arith.constant dense<0.000000e+00> : vector<8x512xf32>
      %492 = tpu.matmul %491, %353, %cst_198 {dimension_numbers = #tpu.dot_dimension_numbers<[1], [0], [0], [1], [0, 0, 1, 1], [], []>} : vector<8x128xbf16>, vector<128x512xbf16>, vector<8x512xf32> -> vector<8x512xf32>
      %493 = vector.broadcast %357 : vector<1x512xf32> to vector<8x512xf32>
      %494 = arith.addf %492, %493 : vector<8x512xf32>
      %495 = arith.addi %359, %c2_i32_185 : i32
      %496 = arith.index_cast %495 : i32 to index
      %c0_199 = arith.constant 0 : index
      %c0_200 = arith.constant 0 : index
      %497 = vector.load %arg11[%496, %c0_199, %c0_200] : memref<16x8x512xf32, #tpu.memory_space<vmem>>, vector<1x8x512xf32>
      %498 = vector.shape_cast %497 : vector<1x8x512xf32> to vector<8x512xf32>
      %499 = vector.shape_cast %494 : vector<8x512xf32> to vector<1x8x512xf32>
      tpu.vector_store %arg11[%496, %c0_199, %c0_200], %499 {strides = array<i32>} : memref<16x8x512xf32, #tpu.memory_space<vmem>>, vector<1x8x512xf32>,
      %c3_i32_201 = arith.constant 3 : i32
      %cst_202 = arith.constant dense<0.000000e+00> : vector<8x512xf32>
      %500 = tpu.matmul %491, %349, %cst_202 {dimension_numbers = #tpu.dot_dimension_numbers<[1], [0], [0], [1], [0, 0, 1, 1], [], []>} : vector<8x128xbf16>, vector<128x512xbf16>, vector<8x512xf32> -> vector<8x512xf32>
      %501 = arith.addi %350, %c3_i32_201 : i32
      %502 = arith.index_cast %501 : i32 to index
      %c0_203 = arith.constant 0 : index
      %c0_204 = arith.constant 0 : index
      %503 = vector.load %arg11[%502, %c0_203, %c0_204] : memref<16x8x512xf32, #tpu.memory_space<vmem>>, vector<1x8x512xf32>
      %504 = vector.shape_cast %503 : vector<1x8x512xf32> to vector<8x512xf32>
      %505 = arith.addf %500, %504 : vector<8x512xf32>
      %506 = vector.extract_strided_slice %505 {offsets = [0, 0], sizes = [8, 128], strides = [1, 1]} : vector<8x512xf32> to vector<8x128xf32>
      %cst_205 = arith.constant 5.000000e-01 : f32
      %507 = vector.broadcast %cst_205 : f32 to vector<8x128xf32>
      %508 = arith.mulf %507, %506 : vector<8x128xf32>
      %509 = math.tanh %508 : vector<8x128xf32>
      %cst_206 = arith.constant 5.000000e-01 : f32
      %510 = vector.broadcast %cst_206 : f32 to vector<8x128xf32>
      %511 = arith.mulf %510, %509 : vector<8x128xf32>
      %cst_207 = arith.constant 5.000000e-01 : f32
      %512 = vector.broadcast %cst_207 : f32 to vector<8x128xf32>
      %513 = arith.addf %511, %512 : vector<8x128xf32>
      %514 = vector.extract_strided_slice %505 {offsets = [0, 128], sizes = [8, 128], strides = [1, 1]} : vector<8x512xf32> to vector<8x128xf32>
      %cst_208 = arith.constant 5.000000e-01 : f32
      %515 = vector.broadcast %cst_208 : f32 to vector<8x128xf32>
      %516 = arith.mulf %515, %514 : vector<8x128xf32>
      %517 = math.tanh %516 : vector<8x128xf32>
      %cst_209 = arith.constant 5.000000e-01 : f32
      %518 = vector.broadcast %cst_209 : f32 to vector<8x128xf32>
      %519 = arith.mulf %518, %517 : vector<8x128xf32>
      %cst_210 = arith.constant 5.000000e-01 : f32
      %520 = vector.broadcast %cst_210 : f32 to vector<8x128xf32>
      %521 = arith.addf %519, %520 : vector<8x128xf32>
      %522 = vector.extract_strided_slice %505 {offsets = [0, 256], sizes = [8, 128], strides = [1, 1]} : vector<8x512xf32> to vector<8x128xf32>
      %523 = math.tanh %522 : vector<8x128xf32>
      %524 = vector.extract_strided_slice %505 {offsets = [0, 384], sizes = [8, 128], strides = [1, 1]} : vector<8x512xf32> to vector<8x128xf32>
      %cst_211 = arith.constant 5.000000e-01 : f32
      %525 = vector.broadcast %cst_211 : f32 to vector<8x128xf32>
      %526 = arith.mulf %525, %524 : vector<8x128xf32>
      %527 = math.tanh %526 : vector<8x128xf32>
      %cst_212 = arith.constant 5.000000e-01 : f32
      %528 = vector.broadcast %cst_212 : f32 to vector<8x128xf32>
      %529 = arith.mulf %528, %527 : vector<8x128xf32>
      %cst_213 = arith.constant 5.000000e-01 : f32
      %530 = vector.broadcast %cst_213 : f32 to vector<8x128xf32>
      %531 = arith.addf %529, %530 : vector<8x128xf32>
      %532 = arith.mulf %521, %488 : vector<8x128xf32>
      %533 = arith.mulf %513, %523 : vector<8x128xf32>
      %534 = arith.addf %532, %533 : vector<8x128xf32>
      %535 = math.tanh %534 : vector<8x128xf32>
      %536 = arith.mulf %531, %535 : vector<8x128xf32>
      %537 = arith.truncf %536 : vector<8x128xf32> to vector<8x128xbf16>
      %cst_214 = arith.constant dense<0.000000e+00> : vector<8x512xf32>
      %538 = tpu.matmul %537, %353, %cst_214 {dimension_numbers = #tpu.dot_dimension_numbers<[1], [0], [0], [1], [0, 0, 1, 1], [], []>} : vector<8x128xbf16>, vector<128x512xbf16>, vector<8x512xf32> -> vector<8x512xf32>
      %539 = vector.broadcast %357 : vector<1x512xf32> to vector<8x512xf32>
      %540 = arith.addf %538, %539 : vector<8x512xf32>
      %541 = arith.addi %359, %c3_i32_201 : i32
      %542 = arith.index_cast %541 : i32 to index
      %c0_215 = arith.constant 0 : index
      %c0_216 = arith.constant 0 : index
      %543 = vector.load %arg11[%542, %c0_215, %c0_216] : memref<16x8x512xf32, #tpu.memory_space<vmem>>, vector<1x8x512xf32>
      %544 = vector.shape_cast %543 : vector<1x8x512xf32> to vector<8x512xf32>
      %545 = vector.shape_cast %540 : vector<8x512xf32> to vector<1x8x512xf32>
      tpu.vector_store %arg11[%542, %c0_215, %c0_216], %545 {strides = array<i32>} : memref<16x8x512xf32, #tpu.memory_space<vmem>>, vector<1x8x512xf32>,
      %c4_i32_217 = arith.constant 4 : i32
      %cst_218 = arith.constant dense<0.000000e+00> : vector<8x512xf32>
      %546 = tpu.matmul %537, %349, %cst_218 {dimension_numbers = #tpu.dot_dimension_numbers<[1], [0], [0], [1], [0, 0, 1, 1], [], []>} : vector<8x128xbf16>, vector<128x512xbf16>, vector<8x512xf32> -> vector<8x512xf32>
      %547 = arith.addi %350, %c4_i32_217 : i32
      %548 = arith.index_cast %547 : i32 to index
      %c0_219 = arith.constant 0 : index
      %c0_220 = arith.constant 0 : index
      %549 = vector.load %arg11[%548, %c0_219, %c0_220] : memref<16x8x512xf32, #tpu.memory_space<vmem>>, vector<1x8x512xf32>
      %550 = vector.shape_cast %549 : vector<1x8x512xf32> to vector<8x512xf32>
      %551 = arith.addf %546, %550 : vector<8x512xf32>
      %552 = vector.extract_strided_slice %551 {offsets = [0, 0], sizes = [8, 128], strides = [1, 1]} : vector<8x512xf32> to vector<8x128xf32>
      %cst_221 = arith.constant 5.000000e-01 : f32
      %553 = vector.broadcast %cst_221 : f32 to vector<8x128xf32>
      %554 = arith.mulf %553, %552 : vector<8x128xf32>
      %555 = math.tanh %554 : vector<8x128xf32>
      %cst_222 = arith.constant 5.000000e-01 : f32
      %556 = vector.broadcast %cst_222 : f32 to vector<8x128xf32>
      %557 = arith.mulf %556, %555 : vector<8x128xf32>
      %cst_223 = arith.constant 5.000000e-01 : f32
      %558 = vector.broadcast %cst_223 : f32 to vector<8x128xf32>
      %559 = arith.addf %557, %558 : vector<8x128xf32>
      %560 = vector.extract_strided_slice %551 {offsets = [0, 128], sizes = [8, 128], strides = [1, 1]} : vector<8x512xf32> to vector<8x128xf32>
      %cst_224 = arith.constant 5.000000e-01 : f32
      %561 = vector.broadcast %cst_224 : f32 to vector<8x128xf32>
      %562 = arith.mulf %561, %560 : vector<8x128xf32>
      %563 = math.tanh %562 : vector<8x128xf32>
      %cst_225 = arith.constant 5.000000e-01 : f32
      %564 = vector.broadcast %cst_225 : f32 to vector<8x128xf32>
      %565 = arith.mulf %564, %563 : vector<8x128xf32>
      %cst_226 = arith.constant 5.000000e-01 : f32
      %566 = vector.broadcast %cst_226 : f32 to vector<8x128xf32>
      %567 = arith.addf %565, %566 : vector<8x128xf32>
      %568 = vector.extract_strided_slice %551 {offsets = [0, 256], sizes = [8, 128], strides = [1, 1]} : vector<8x512xf32> to vector<8x128xf32>
      %569 = math.tanh %568 : vector<8x128xf32>
      %570 = vector.extract_strided_slice %551 {offsets = [0, 384], sizes = [8, 128], strides = [1, 1]} : vector<8x512xf32> to vector<8x128xf32>
      %cst_227 = arith.constant 5.000000e-01 : f32
      %571 = vector.broadcast %cst_227 : f32 to vector<8x128xf32>
      %572 = arith.mulf %571, %570 : vector<8x128xf32>
      %573 = math.tanh %572 : vector<8x128xf32>
      %cst_228 = arith.constant 5.000000e-01 : f32
      %574 = vector.broadcast %cst_228 : f32 to vector<8x128xf32>
      %575 = arith.mulf %574, %573 : vector<8x128xf32>
      %cst_229 = arith.constant 5.000000e-01 : f32
      %576 = vector.broadcast %cst_229 : f32 to vector<8x128xf32>
      %577 = arith.addf %575, %576 : vector<8x128xf32>
      %578 = arith.mulf %567, %534 : vector<8x128xf32>
      %579 = arith.mulf %559, %569 : vector<8x128xf32>
      %580 = arith.addf %578, %579 : vector<8x128xf32>
      %581 = math.tanh %580 : vector<8x128xf32>
      %582 = arith.mulf %577, %581 : vector<8x128xf32>
      %583 = arith.truncf %582 : vector<8x128xf32> to vector<8x128xbf16>
      %cst_230 = arith.constant dense<0.000000e+00> : vector<8x512xf32>
      %584 = tpu.matmul %583, %353, %cst_230 {dimension_numbers = #tpu.dot_dimension_numbers<[1], [0], [0], [1], [0, 0, 1, 1], [], []>} : vector<8x128xbf16>, vector<128x512xbf16>, vector<8x512xf32> -> vector<8x512xf32>
      %585 = vector.broadcast %357 : vector<1x512xf32> to vector<8x512xf32>
      %586 = arith.addf %584, %585 : vector<8x512xf32>
      %587 = arith.addi %359, %c4_i32_217 : i32
      %588 = arith.index_cast %587 : i32 to index
      %c0_231 = arith.constant 0 : index
      %c0_232 = arith.constant 0 : index
      %589 = vector.load %arg11[%588, %c0_231, %c0_232] : memref<16x8x512xf32, #tpu.memory_space<vmem>>, vector<1x8x512xf32>
      %590 = vector.shape_cast %589 : vector<1x8x512xf32> to vector<8x512xf32>
      %591 = vector.shape_cast %586 : vector<8x512xf32> to vector<1x8x512xf32>
      tpu.vector_store %arg11[%588, %c0_231, %c0_232], %591 {strides = array<i32>} : memref<16x8x512xf32, #tpu.memory_space<vmem>>, vector<1x8x512xf32>,
      %c5_i32_233 = arith.constant 5 : i32
      %cst_234 = arith.constant dense<0.000000e+00> : vector<8x512xf32>
      %592 = tpu.matmul %583, %349, %cst_234 {dimension_numbers = #tpu.dot_dimension_numbers<[1], [0], [0], [1], [0, 0, 1, 1], [], []>} : vector<8x128xbf16>, vector<128x512xbf16>, vector<8x512xf32> -> vector<8x512xf32>
      %593 = arith.addi %350, %c5_i32_233 : i32
      %594 = arith.index_cast %593 : i32 to index
      %c0_235 = arith.constant 0 : index
      %c0_236 = arith.constant 0 : index
      %595 = vector.load %arg11[%594, %c0_235, %c0_236] : memref<16x8x512xf32, #tpu.memory_space<vmem>>, vector<1x8x512xf32>
      %596 = vector.shape_cast %595 : vector<1x8x512xf32> to vector<8x512xf32>
      %597 = arith.addf %592, %596 : vector<8x512xf32>
      %598 = vector.extract_strided_slice %597 {offsets = [0, 0], sizes = [8, 128], strides = [1, 1]} : vector<8x512xf32> to vector<8x128xf32>
      %cst_237 = arith.constant 5.000000e-01 : f32
      %599 = vector.broadcast %cst_237 : f32 to vector<8x128xf32>
      %600 = arith.mulf %599, %598 : vector<8x128xf32>
      %601 = math.tanh %600 : vector<8x128xf32>
      %cst_238 = arith.constant 5.000000e-01 : f32
      %602 = vector.broadcast %cst_238 : f32 to vector<8x128xf32>
      %603 = arith.mulf %602, %601 : vector<8x128xf32>
      %cst_239 = arith.constant 5.000000e-01 : f32
      %604 = vector.broadcast %cst_239 : f32 to vector<8x128xf32>
      %605 = arith.addf %603, %604 : vector<8x128xf32>
      %606 = vector.extract_strided_slice %597 {offsets = [0, 128], sizes = [8, 128], strides = [1, 1]} : vector<8x512xf32> to vector<8x128xf32>
      %cst_240 = arith.constant 5.000000e-01 : f32
      %607 = vector.broadcast %cst_240 : f32 to vector<8x128xf32>
      %608 = arith.mulf %607, %606 : vector<8x128xf32>
      %609 = math.tanh %608 : vector<8x128xf32>
      %cst_241 = arith.constant 5.000000e-01 : f32
      %610 = vector.broadcast %cst_241 : f32 to vector<8x128xf32>
      %611 = arith.mulf %610, %609 : vector<8x128xf32>
      %cst_242 = arith.constant 5.000000e-01 : f32
      %612 = vector.broadcast %cst_242 : f32 to vector<8x128xf32>
      %613 = arith.addf %611, %612 : vector<8x128xf32>
      %614 = vector.extract_strided_slice %597 {offsets = [0, 256], sizes = [8, 128], strides = [1, 1]} : vector<8x512xf32> to vector<8x128xf32>
      %615 = math.tanh %614 : vector<8x128xf32>
      %616 = vector.extract_strided_slice %597 {offsets = [0, 384], sizes = [8, 128], strides = [1, 1]} : vector<8x512xf32> to vector<8x128xf32>
      %cst_243 = arith.constant 5.000000e-01 : f32
      %617 = vector.broadcast %cst_243 : f32 to vector<8x128xf32>
      %618 = arith.mulf %617, %616 : vector<8x128xf32>
      %619 = math.tanh %618 : vector<8x128xf32>
      %cst_244 = arith.constant 5.000000e-01 : f32
      %620 = vector.broadcast %cst_244 : f32 to vector<8x128xf32>
      %621 = arith.mulf %620, %619 : vector<8x128xf32>
      %cst_245 = arith.constant 5.000000e-01 : f32
      %622 = vector.broadcast %cst_245 : f32 to vector<8x128xf32>
      %623 = arith.addf %621, %622 : vector<8x128xf32>
      %624 = arith.mulf %613, %580 : vector<8x128xf32>
      %625 = arith.mulf %605, %615 : vector<8x128xf32>
      %626 = arith.addf %624, %625 : vector<8x128xf32>
      %627 = math.tanh %626 : vector<8x128xf32>
      %628 = arith.mulf %623, %627 : vector<8x128xf32>
      %629 = arith.truncf %628 : vector<8x128xf32> to vector<8x128xbf16>
      %cst_246 = arith.constant dense<0.000000e+00> : vector<8x512xf32>
      %630 = tpu.matmul %629, %353, %cst_246 {dimension_numbers = #tpu.dot_dimension_numbers<[1], [0], [0], [1], [0, 0, 1, 1], [], []>} : vector<8x128xbf16>, vector<128x512xbf16>, vector<8x512xf32> -> vector<8x512xf32>
      %631 = vector.broadcast %357 : vector<1x512xf32> to vector<8x512xf32>
      %632 = arith.addf %630, %631 : vector<8x512xf32>
      %633 = arith.addi %359, %c5_i32_233 : i32
      %634 = arith.index_cast %633 : i32 to index
      %c0_247 = arith.constant 0 : index
      %c0_248 = arith.constant 0 : index
      %635 = vector.load %arg11[%634, %c0_247, %c0_248] : memref<16x8x512xf32, #tpu.memory_space<vmem>>, vector<1x8x512xf32>
      %636 = vector.shape_cast %635 : vector<1x8x512xf32> to vector<8x512xf32>
      %637 = vector.shape_cast %632 : vector<8x512xf32> to vector<1x8x512xf32>
      tpu.vector_store %arg11[%634, %c0_247, %c0_248], %637 {strides = array<i32>} : memref<16x8x512xf32, #tpu.memory_space<vmem>>, vector<1x8x512xf32>,
      %c6_i32_249 = arith.constant 6 : i32
      %cst_250 = arith.constant dense<0.000000e+00> : vector<8x512xf32>
      %638 = tpu.matmul %629, %349, %cst_250 {dimension_numbers = #tpu.dot_dimension_numbers<[1], [0], [0], [1], [0, 0, 1, 1], [], []>} : vector<8x128xbf16>, vector<128x512xbf16>, vector<8x512xf32> -> vector<8x512xf32>
      %639 = arith.addi %350, %c6_i32_249 : i32
      %640 = arith.index_cast %639 : i32 to index
      %c0_251 = arith.constant 0 : index
      %c0_252 = arith.constant 0 : index
      %641 = vector.load %arg11[%640, %c0_251, %c0_252] : memref<16x8x512xf32, #tpu.memory_space<vmem>>, vector<1x8x512xf32>
      %642 = vector.shape_cast %641 : vector<1x8x512xf32> to vector<8x512xf32>
      %643 = arith.addf %638, %642 : vector<8x512xf32>
      %644 = vector.extract_strided_slice %643 {offsets = [0, 0], sizes = [8, 128], strides = [1, 1]} : vector<8x512xf32> to vector<8x128xf32>
      %cst_253 = arith.constant 5.000000e-01 : f32
      %645 = vector.broadcast %cst_253 : f32 to vector<8x128xf32>
      %646 = arith.mulf %645, %644 : vector<8x128xf32>
      %647 = math.tanh %646 : vector<8x128xf32>
      %cst_254 = arith.constant 5.000000e-01 : f32
      %648 = vector.broadcast %cst_254 : f32 to vector<8x128xf32>
      %649 = arith.mulf %648, %647 : vector<8x128xf32>
      %cst_255 = arith.constant 5.000000e-01 : f32
      %650 = vector.broadcast %cst_255 : f32 to vector<8x128xf32>
      %651 = arith.addf %649, %650 : vector<8x128xf32>
      %652 = vector.extract_strided_slice %643 {offsets = [0, 128], sizes = [8, 128], strides = [1, 1]} : vector<8x512xf32> to vector<8x128xf32>
      %cst_256 = arith.constant 5.000000e-01 : f32
      %653 = vector.broadcast %cst_256 : f32 to vector<8x128xf32>
      %654 = arith.mulf %653, %652 : vector<8x128xf32>
      %655 = math.tanh %654 : vector<8x128xf32>
      %cst_257 = arith.constant 5.000000e-01 : f32
      %656 = vector.broadcast %cst_257 : f32 to vector<8x128xf32>
      %657 = arith.mulf %656, %655 : vector<8x128xf32>
      %cst_258 = arith.constant 5.000000e-01 : f32
      %658 = vector.broadcast %cst_258 : f32 to vector<8x128xf32>
      %659 = arith.addf %657, %658 : vector<8x128xf32>
      %660 = vector.extract_strided_slice %643 {offsets = [0, 256], sizes = [8, 128], strides = [1, 1]} : vector<8x512xf32> to vector<8x128xf32>
      %661 = math.tanh %660 : vector<8x128xf32>
      %662 = vector.extract_strided_slice %643 {offsets = [0, 384], sizes = [8, 128], strides = [1, 1]} : vector<8x512xf32> to vector<8x128xf32>
      %cst_259 = arith.constant 5.000000e-01 : f32
      %663 = vector.broadcast %cst_259 : f32 to vector<8x128xf32>
      %664 = arith.mulf %663, %662 : vector<8x128xf32>
      %665 = math.tanh %664 : vector<8x128xf32>
      %cst_260 = arith.constant 5.000000e-01 : f32
      %666 = vector.broadcast %cst_260 : f32 to vector<8x128xf32>
      %667 = arith.mulf %666, %665 : vector<8x128xf32>
      %cst_261 = arith.constant 5.000000e-01 : f32
      %668 = vector.broadcast %cst_261 : f32 to vector<8x128xf32>
      %669 = arith.addf %667, %668 : vector<8x128xf32>
      %670 = arith.mulf %659, %626 : vector<8x128xf32>
      %671 = arith.mulf %651, %661 : vector<8x128xf32>
      %672 = arith.addf %670, %671 : vector<8x128xf32>
      %673 = math.tanh %672 : vector<8x128xf32>
      %674 = arith.mulf %669, %673 : vector<8x128xf32>
      %675 = arith.truncf %674 : vector<8x128xf32> to vector<8x128xbf16>
      %cst_262 = arith.constant dense<0.000000e+00> : vector<8x512xf32>
      %676 = tpu.matmul %675, %353, %cst_262 {dimension_numbers = #tpu.dot_dimension_numbers<[1], [0], [0], [1], [0, 0, 1, 1], [], []>} : vector<8x128xbf16>, vector<128x512xbf16>, vector<8x512xf32> -> vector<8x512xf32>
      %677 = vector.broadcast %357 : vector<1x512xf32> to vector<8x512xf32>
      %678 = arith.addf %676, %677 : vector<8x512xf32>
      %679 = arith.addi %359, %c6_i32_249 : i32
      %680 = arith.index_cast %679 : i32 to index
      %c0_263 = arith.constant 0 : index
      %c0_264 = arith.constant 0 : index
      %681 = vector.load %arg11[%680, %c0_263, %c0_264] : memref<16x8x512xf32, #tpu.memory_space<vmem>>, vector<1x8x512xf32>
      %682 = vector.shape_cast %681 : vector<1x8x512xf32> to vector<8x512xf32>
      %683 = vector.shape_cast %678 : vector<8x512xf32> to vector<1x8x512xf32>
      tpu.vector_store %arg11[%680, %c0_263, %c0_264], %683 {strides = array<i32>} : memref<16x8x512xf32, #tpu.memory_space<vmem>>, vector<1x8x512xf32>,
      %c7_i32_265 = arith.constant 7 : i32
      %cst_266 = arith.constant dense<0.000000e+00> : vector<8x512xf32>
      %684 = tpu.matmul %675, %349, %cst_266 {dimension_numbers = #tpu.dot_dimension_numbers<[1], [0], [0], [1], [0, 0, 1, 1], [], []>} : vector<8x128xbf16>, vector<128x512xbf16>, vector<8x512xf32> -> vector<8x512xf32>
      %685 = arith.addi %350, %c7_i32_265 : i32
      %686 = arith.index_cast %685 : i32 to index
      %c0_267 = arith.constant 0 : index
      %c0_268 = arith.constant 0 : index
      %687 = vector.load %arg11[%686, %c0_267, %c0_268] : memref<16x8x512xf32, #tpu.memory_space<vmem>>, vector<1x8x512xf32>
      %688 = vector.shape_cast %687 : vector<1x8x512xf32> to vector<8x512xf32>
      %689 = arith.addf %684, %688 : vector<8x512xf32>
      %690 = vector.extract_strided_slice %689 {offsets = [0, 0], sizes = [8, 128], strides = [1, 1]} : vector<8x512xf32> to vector<8x128xf32>
      %cst_269 = arith.constant 5.000000e-01 : f32
      %691 = vector.broadcast %cst_269 : f32 to vector<8x128xf32>
      %692 = arith.mulf %691, %690 : vector<8x128xf32>
      %693 = math.tanh %692 : vector<8x128xf32>
      %cst_270 = arith.constant 5.000000e-01 : f32
      %694 = vector.broadcast %cst_270 : f32 to vector<8x128xf32>
      %695 = arith.mulf %694, %693 : vector<8x128xf32>
      %cst_271 = arith.constant 5.000000e-01 : f32
      %696 = vector.broadcast %cst_271 : f32 to vector<8x128xf32>
      %697 = arith.addf %695, %696 : vector<8x128xf32>
      %698 = vector.extract_strided_slice %689 {offsets = [0, 128], sizes = [8, 128], strides = [1, 1]} : vector<8x512xf32> to vector<8x128xf32>
      %cst_272 = arith.constant 5.000000e-01 : f32
      %699 = vector.broadcast %cst_272 : f32 to vector<8x128xf32>
      %700 = arith.mulf %699, %698 : vector<8x128xf32>
      %701 = math.tanh %700 : vector<8x128xf32>
      %cst_273 = arith.constant 5.000000e-01 : f32
      %702 = vector.broadcast %cst_273 : f32 to vector<8x128xf32>
      %703 = arith.mulf %702, %701 : vector<8x128xf32>
      %cst_274 = arith.constant 5.000000e-01 : f32
      %704 = vector.broadcast %cst_274 : f32 to vector<8x128xf32>
      %705 = arith.addf %703, %704 : vector<8x128xf32>
      %706 = vector.extract_strided_slice %689 {offsets = [0, 256], sizes = [8, 128], strides = [1, 1]} : vector<8x512xf32> to vector<8x128xf32>
      %707 = math.tanh %706 : vector<8x128xf32>
      %708 = vector.extract_strided_slice %689 {offsets = [0, 384], sizes = [8, 128], strides = [1, 1]} : vector<8x512xf32> to vector<8x128xf32>
      %cst_275 = arith.constant 5.000000e-01 : f32
      %709 = vector.broadcast %cst_275 : f32 to vector<8x128xf32>
      %710 = arith.mulf %709, %708 : vector<8x128xf32>
      %711 = math.tanh %710 : vector<8x128xf32>
      %cst_276 = arith.constant 5.000000e-01 : f32
      %712 = vector.broadcast %cst_276 : f32 to vector<8x128xf32>
      %713 = arith.mulf %712, %711 : vector<8x128xf32>
      %cst_277 = arith.constant 5.000000e-01 : f32
      %714 = vector.broadcast %cst_277 : f32 to vector<8x128xf32>
      %715 = arith.addf %713, %714 : vector<8x128xf32>
      %716 = arith.mulf %705, %672 : vector<8x128xf32>
      %717 = arith.mulf %697, %707 : vector<8x128xf32>
      %718 = arith.addf %716, %717 : vector<8x128xf32>
      %719 = math.tanh %718 : vector<8x128xf32>
      %720 = arith.mulf %715, %719 : vector<8x128xf32>
      %721 = arith.truncf %720 : vector<8x128xf32> to vector<8x128xbf16>
      %cst_278 = arith.constant dense<0.000000e+00> : vector<8x512xf32>
      %722 = tpu.matmul %721, %353, %cst_278 {dimension_numbers = #tpu.dot_dimension_numbers<[1], [0], [0], [1], [0, 0, 1, 1], [], []>} : vector<8x128xbf16>, vector<128x512xbf16>, vector<8x512xf32> -> vector<8x512xf32>
      %723 = vector.broadcast %357 : vector<1x512xf32> to vector<8x512xf32>
      %724 = arith.addf %722, %723 : vector<8x512xf32>
      %725 = arith.addi %359, %c7_i32_265 : i32
      %726 = arith.index_cast %725 : i32 to index
      %c0_279 = arith.constant 0 : index
      %c0_280 = arith.constant 0 : index
      %727 = vector.load %arg11[%726, %c0_279, %c0_280] : memref<16x8x512xf32, #tpu.memory_space<vmem>>, vector<1x8x512xf32>
      %728 = vector.shape_cast %727 : vector<1x8x512xf32> to vector<8x512xf32>
      %729 = vector.shape_cast %724 : vector<8x512xf32> to vector<1x8x512xf32>
      tpu.vector_store %arg11[%726, %c0_279, %c0_280], %729 {strides = array<i32>} : memref<16x8x512xf32, #tpu.memory_space<vmem>>, vector<1x8x512xf32>,
      %c8_i32_281 = arith.constant 8 : i32
    }
    %c11_i32_10 = arith.constant 11 : i32
    %c11 = arith.constant 11 : index
    %c0_11 = arith.constant 0 : index
    %c0_12 = arith.constant 0 : index
    %13 = vector.load %arg3[%c11, %c0_11, %c0_12] : memref<12x128x512xbf16, #tpu.memory_space<vmem>>, vector<1x128x512xbf16>
    %14 = vector.shape_cast %13 : vector<1x128x512xbf16> to vector<128x512xbf16>
    %cst = arith.constant 0.000000e+00 : bf16
    %15 = vector.broadcast %cst : bf16 to vector<8x128xbf16>
    %cst_13 = arith.constant 0.000000e+00 : f32
    %16 = vector.broadcast %cst_13 : f32 to vector<8x128xf32>
    %c0_i32_14 = arith.constant 0 : i32
    %cst_15 = arith.constant dense<0.000000e+00> : vector<8x512xf32>
    %17 = tpu.matmul %15, %14, %cst_15 {dimension_numbers = #tpu.dot_dimension_numbers<[1], [0], [0], [1], [0, 0, 1, 1], [], []>} : vector<8x128xbf16>, vector<128x512xbf16>, vector<8x512xf32> -> vector<8x512xf32>
    %c8_i32 = arith.constant 8 : i32
    %18 = arith.addi %c8_i32, %c0_i32_14 : i32
    %19 = arith.index_cast %18 : i32 to index
    %c0_16 = arith.constant 0 : index
    %c0_17 = arith.constant 0 : index
    %20 = vector.load %arg11[%19, %c0_16, %c0_17] : memref<16x8x512xf32, #tpu.memory_space<vmem>>, vector<1x8x512xf32>
    %21 = vector.shape_cast %20 : vector<1x8x512xf32> to vector<8x512xf32>
    %22 = arith.addf %17, %21 : vector<8x512xf32>
    %23 = vector.extract_strided_slice %22 {offsets = [0, 0], sizes = [8, 128], strides = [1, 1]} : vector<8x512xf32> to vector<8x128xf32>
    %cst_18 = arith.constant 5.000000e-01 : f32
    %24 = vector.broadcast %cst_18 : f32 to vector<8x128xf32>
    %25 = arith.mulf %24, %23 : vector<8x128xf32>
    %26 = math.tanh %25 : vector<8x128xf32>
    %cst_19 = arith.constant 5.000000e-01 : f32
    %27 = vector.broadcast %cst_19 : f32 to vector<8x128xf32>
    %28 = arith.mulf %27, %26 : vector<8x128xf32>
    %cst_20 = arith.constant 5.000000e-01 : f32
    %29 = vector.broadcast %cst_20 : f32 to vector<8x128xf32>
    %30 = arith.addf %28, %29 : vector<8x128xf32>
    %31 = vector.extract_strided_slice %22 {offsets = [0, 128], sizes = [8, 128], strides = [1, 1]} : vector<8x512xf32> to vector<8x128xf32>
    %cst_21 = arith.constant 5.000000e-01 : f32
    %32 = vector.broadcast %cst_21 : f32 to vector<8x128xf32>
    %33 = arith.mulf %32, %31 : vector<8x128xf32>
    %34 = math.tanh %33 : vector<8x128xf32>
    %cst_22 = arith.constant 5.000000e-01 : f32
    %35 = vector.broadcast %cst_22 : f32 to vector<8x128xf32>
    %36 = arith.mulf %35, %34 : vector<8x128xf32>
    %cst_23 = arith.constant 5.000000e-01 : f32
    %37 = vector.broadcast %cst_23 : f32 to vector<8x128xf32>
    %38 = arith.addf %36, %37 : vector<8x128xf32>
    %39 = vector.extract_strided_slice %22 {offsets = [0, 256], sizes = [8, 128], strides = [1, 1]} : vector<8x512xf32> to vector<8x128xf32>
    %40 = math.tanh %39 : vector<8x128xf32>
    %41 = vector.extract_strided_slice %22 {offsets = [0, 384], sizes = [8, 128], strides = [1, 1]} : vector<8x512xf32> to vector<8x128xf32>
    %cst_24 = arith.constant 5.000000e-01 : f32
    %42 = vector.broadcast %cst_24 : f32 to vector<8x128xf32>
    %43 = arith.mulf %42, %41 : vector<8x128xf32>
    %44 = math.tanh %43 : vector<8x128xf32>
    %cst_25 = arith.constant 5.000000e-01 : f32
    %45 = vector.broadcast %cst_25 : f32 to vector<8x128xf32>
    %46 = arith.mulf %45, %44 : vector<8x128xf32>
    %cst_26 = arith.constant 5.000000e-01 : f32
    %47 = vector.broadcast %cst_26 : f32 to vector<8x128xf32>
    %48 = arith.addf %46, %47 : vector<8x128xf32>
    %49 = arith.mulf %38, %16 : vector<8x128xf32>
    %50 = arith.mulf %30, %40 : vector<8x128xf32>
    %51 = arith.addf %49, %50 : vector<8x128xf32>
    %52 = math.tanh %51 : vector<8x128xf32>
    %53 = arith.mulf %48, %52 : vector<8x128xf32>
    %54 = arith.truncf %53 : vector<8x128xf32> to vector<8x128xbf16>
    %c1_i32_27 = arith.constant 1 : i32
    %cst_28 = arith.constant dense<0.000000e+00> : vector<8x512xf32>
    %55 = tpu.matmul %54, %14, %cst_28 {dimension_numbers = #tpu.dot_dimension_numbers<[1], [0], [0], [1], [0, 0, 1, 1], [], []>} : vector<8x128xbf16>, vector<128x512xbf16>, vector<8x512xf32> -> vector<8x512xf32>
    %c8_i32_29 = arith.constant 8 : i32
    %56 = arith.addi %c8_i32_29, %c1_i32_27 : i32
    %57 = arith.index_cast %56 : i32 to index
    %c0_30 = arith.constant 0 : index
    %c0_31 = arith.constant 0 : index
    %58 = vector.load %arg11[%57, %c0_30, %c0_31] : memref<16x8x512xf32, #tpu.memory_space<vmem>>, vector<1x8x512xf32>
    %59 = vector.shape_cast %58 : vector<1x8x512xf32> to vector<8x512xf32>
    %60 = arith.addf %55, %59 : vector<8x512xf32>
    %61 = vector.extract_strided_slice %60 {offsets = [0, 0], sizes = [8, 128], strides = [1, 1]} : vector<8x512xf32> to vector<8x128xf32>
    %cst_32 = arith.constant 5.000000e-01 : f32
    %62 = vector.broadcast %cst_32 : f32 to vector<8x128xf32>
    %63 = arith.mulf %62, %61 : vector<8x128xf32>
    %64 = math.tanh %63 : vector<8x128xf32>
    %cst_33 = arith.constant 5.000000e-01 : f32
    %65 = vector.broadcast %cst_33 : f32 to vector<8x128xf32>
    %66 = arith.mulf %65, %64 : vector<8x128xf32>
    %cst_34 = arith.constant 5.000000e-01 : f32
    %67 = vector.broadcast %cst_34 : f32 to vector<8x128xf32>
    %68 = arith.addf %66, %67 : vector<8x128xf32>
    %69 = vector.extract_strided_slice %60 {offsets = [0, 128], sizes = [8, 128], strides = [1, 1]} : vector<8x512xf32> to vector<8x128xf32>
    %cst_35 = arith.constant 5.000000e-01 : f32
    %70 = vector.broadcast %cst_35 : f32 to vector<8x128xf32>
    %71 = arith.mulf %70, %69 : vector<8x128xf32>
    %72 = math.tanh %71 : vector<8x128xf32>
    %cst_36 = arith.constant 5.000000e-01 : f32
    %73 = vector.broadcast %cst_36 : f32 to vector<8x128xf32>
    %74 = arith.mulf %73, %72 : vector<8x128xf32>
    %cst_37 = arith.constant 5.000000e-01 : f32
    %75 = vector.broadcast %cst_37 : f32 to vector<8x128xf32>
    %76 = arith.addf %74, %75 : vector<8x128xf32>
    %77 = vector.extract_strided_slice %60 {offsets = [0, 256], sizes = [8, 128], strides = [1, 1]} : vector<8x512xf32> to vector<8x128xf32>
    %78 = math.tanh %77 : vector<8x128xf32>
    %79 = vector.extract_strided_slice %60 {offsets = [0, 384], sizes = [8, 128], strides = [1, 1]} : vector<8x512xf32> to vector<8x128xf32>
    %cst_38 = arith.constant 5.000000e-01 : f32
    %80 = vector.broadcast %cst_38 : f32 to vector<8x128xf32>
    %81 = arith.mulf %80, %79 : vector<8x128xf32>
    %82 = math.tanh %81 : vector<8x128xf32>
    %cst_39 = arith.constant 5.000000e-01 : f32
    %83 = vector.broadcast %cst_39 : f32 to vector<8x128xf32>
    %84 = arith.mulf %83, %82 : vector<8x128xf32>
    %cst_40 = arith.constant 5.000000e-01 : f32
    %85 = vector.broadcast %cst_40 : f32 to vector<8x128xf32>
    %86 = arith.addf %84, %85 : vector<8x128xf32>
    %87 = arith.mulf %76, %51 : vector<8x128xf32>
    %88 = arith.mulf %68, %78 : vector<8x128xf32>
    %89 = arith.addf %87, %88 : vector<8x128xf32>
    %90 = math.tanh %89 : vector<8x128xf32>
    %91 = arith.mulf %86, %90 : vector<8x128xf32>
    %92 = arith.truncf %91 : vector<8x128xf32> to vector<8x128xbf16>
    %c2_i32 = arith.constant 2 : i32
    %cst_41 = arith.constant dense<0.000000e+00> : vector<8x512xf32>
    %93 = tpu.matmul %92, %14, %cst_41 {dimension_numbers = #tpu.dot_dimension_numbers<[1], [0], [0], [1], [0, 0, 1, 1], [], []>} : vector<8x128xbf16>, vector<128x512xbf16>, vector<8x512xf32> -> vector<8x512xf32>
    %c8_i32_42 = arith.constant 8 : i32
    %94 = arith.addi %c8_i32_42, %c2_i32 : i32
    %95 = arith.index_cast %94 : i32 to index
    %c0_43 = arith.constant 0 : index
    %c0_44 = arith.constant 0 : index
    %96 = vector.load %arg11[%95, %c0_43, %c0_44] : memref<16x8x512xf32, #tpu.memory_space<vmem>>, vector<1x8x512xf32>
    %97 = vector.shape_cast %96 : vector<1x8x512xf32> to vector<8x512xf32>
    %98 = arith.addf %93, %97 : vector<8x512xf32>
    %99 = vector.extract_strided_slice %98 {offsets = [0, 0], sizes = [8, 128], strides = [1, 1]} : vector<8x512xf32> to vector<8x128xf32>
    %cst_45 = arith.constant 5.000000e-01 : f32
    %100 = vector.broadcast %cst_45 : f32 to vector<8x128xf32>
    %101 = arith.mulf %100, %99 : vector<8x128xf32>
    %102 = math.tanh %101 : vector<8x128xf32>
    %cst_46 = arith.constant 5.000000e-01 : f32
    %103 = vector.broadcast %cst_46 : f32 to vector<8x128xf32>
    %104 = arith.mulf %103, %102 : vector<8x128xf32>
    %cst_47 = arith.constant 5.000000e-01 : f32
    %105 = vector.broadcast %cst_47 : f32 to vector<8x128xf32>
    %106 = arith.addf %104, %105 : vector<8x128xf32>
    %107 = vector.extract_strided_slice %98 {offsets = [0, 128], sizes = [8, 128], strides = [1, 1]} : vector<8x512xf32> to vector<8x128xf32>
    %cst_48 = arith.constant 5.000000e-01 : f32
    %108 = vector.broadcast %cst_48 : f32 to vector<8x128xf32>
    %109 = arith.mulf %108, %107 : vector<8x128xf32>
    %110 = math.tanh %109 : vector<8x128xf32>
    %cst_49 = arith.constant 5.000000e-01 : f32
    %111 = vector.broadcast %cst_49 : f32 to vector<8x128xf32>
    %112 = arith.mulf %111, %110 : vector<8x128xf32>
    %cst_50 = arith.constant 5.000000e-01 : f32
    %113 = vector.broadcast %cst_50 : f32 to vector<8x128xf32>
    %114 = arith.addf %112, %113 : vector<8x128xf32>
    %115 = vector.extract_strided_slice %98 {offsets = [0, 256], sizes = [8, 128], strides = [1, 1]} : vector<8x512xf32> to vector<8x128xf32>
    %116 = math.tanh %115 : vector<8x128xf32>
    %117 = vector.extract_strided_slice %98 {offsets = [0, 384], sizes = [8, 128], strides = [1, 1]} : vector<8x512xf32> to vector<8x128xf32>
    %cst_51 = arith.constant 5.000000e-01 : f32
    %118 = vector.broadcast %cst_51 : f32 to vector<8x128xf32>
    %119 = arith.mulf %118, %117 : vector<8x128xf32>
    %120 = math.tanh %119 : vector<8x128xf32>
    %cst_52 = arith.constant 5.000000e-01 : f32
    %121 = vector.broadcast %cst_52 : f32 to vector<8x128xf32>
    %122 = arith.mulf %121, %120 : vector<8x128xf32>
    %cst_53 = arith.constant 5.000000e-01 : f32
    %123 = vector.broadcast %cst_53 : f32 to vector<8x128xf32>
    %124 = arith.addf %122, %123 : vector<8x128xf32>
    %125 = arith.mulf %114, %89 : vector<8x128xf32>
    %126 = arith.mulf %106, %116 : vector<8x128xf32>
    %127 = arith.addf %125, %126 : vector<8x128xf32>
    %128 = math.tanh %127 : vector<8x128xf32>
    %129 = arith.mulf %124, %128 : vector<8x128xf32>
    %130 = arith.truncf %129 : vector<8x128xf32> to vector<8x128xbf16>
    %c3_i32 = arith.constant 3 : i32
    %cst_54 = arith.constant dense<0.000000e+00> : vector<8x512xf32>
    %131 = tpu.matmul %130, %14, %cst_54 {dimension_numbers = #tpu.dot_dimension_numbers<[1], [0], [0], [1], [0, 0, 1, 1], [], []>} : vector<8x128xbf16>, vector<128x512xbf16>, vector<8x512xf32> -> vector<8x512xf32>
    %c8_i32_55 = arith.constant 8 : i32
    %132 = arith.addi %c8_i32_55, %c3_i32 : i32
    %133 = arith.index_cast %132 : i32 to index
    %c0_56 = arith.constant 0 : index
    %c0_57 = arith.constant 0 : index
    %134 = vector.load %arg11[%133, %c0_56, %c0_57] : memref<16x8x512xf32, #tpu.memory_space<vmem>>, vector<1x8x512xf32>
    %135 = vector.shape_cast %134 : vector<1x8x512xf32> to vector<8x512xf32>
    %136 = arith.addf %131, %135 : vector<8x512xf32>
    %137 = vector.extract_strided_slice %136 {offsets = [0, 0], sizes = [8, 128], strides = [1, 1]} : vector<8x512xf32> to vector<8x128xf32>
    %cst_58 = arith.constant 5.000000e-01 : f32
    %138 = vector.broadcast %cst_58 : f32 to vector<8x128xf32>
    %139 = arith.mulf %138, %137 : vector<8x128xf32>
    %140 = math.tanh %139 : vector<8x128xf32>
    %cst_59 = arith.constant 5.000000e-01 : f32
    %141 = vector.broadcast %cst_59 : f32 to vector<8x128xf32>
    %142 = arith.mulf %141, %140 : vector<8x128xf32>
    %cst_60 = arith.constant 5.000000e-01 : f32
    %143 = vector.broadcast %cst_60 : f32 to vector<8x128xf32>
    %144 = arith.addf %142, %143 : vector<8x128xf32>
    %145 = vector.extract_strided_slice %136 {offsets = [0, 128], sizes = [8, 128], strides = [1, 1]} : vector<8x512xf32> to vector<8x128xf32>
    %cst_61 = arith.constant 5.000000e-01 : f32
    %146 = vector.broadcast %cst_61 : f32 to vector<8x128xf32>
    %147 = arith.mulf %146, %145 : vector<8x128xf32>
    %148 = math.tanh %147 : vector<8x128xf32>
    %cst_62 = arith.constant 5.000000e-01 : f32
    %149 = vector.broadcast %cst_62 : f32 to vector<8x128xf32>
    %150 = arith.mulf %149, %148 : vector<8x128xf32>
    %cst_63 = arith.constant 5.000000e-01 : f32
    %151 = vector.broadcast %cst_63 : f32 to vector<8x128xf32>
    %152 = arith.addf %150, %151 : vector<8x128xf32>
    %153 = vector.extract_strided_slice %136 {offsets = [0, 256], sizes = [8, 128], strides = [1, 1]} : vector<8x512xf32> to vector<8x128xf32>
    %154 = math.tanh %153 : vector<8x128xf32>
    %155 = vector.extract_strided_slice %136 {offsets = [0, 384], sizes = [8, 128], strides = [1, 1]} : vector<8x512xf32> to vector<8x128xf32>
    %cst_64 = arith.constant 5.000000e-01 : f32
    %156 = vector.broadcast %cst_64 : f32 to vector<8x128xf32>
    %157 = arith.mulf %156, %155 : vector<8x128xf32>
    %158 = math.tanh %157 : vector<8x128xf32>
    %cst_65 = arith.constant 5.000000e-01 : f32
    %159 = vector.broadcast %cst_65 : f32 to vector<8x128xf32>
    %160 = arith.mulf %159, %158 : vector<8x128xf32>
    %cst_66 = arith.constant 5.000000e-01 : f32
    %161 = vector.broadcast %cst_66 : f32 to vector<8x128xf32>
    %162 = arith.addf %160, %161 : vector<8x128xf32>
    %163 = arith.mulf %152, %127 : vector<8x128xf32>
    %164 = arith.mulf %144, %154 : vector<8x128xf32>
    %165 = arith.addf %163, %164 : vector<8x128xf32>
    %166 = math.tanh %165 : vector<8x128xf32>
    %167 = arith.mulf %162, %166 : vector<8x128xf32>
    %168 = arith.truncf %167 : vector<8x128xf32> to vector<8x128xbf16>
    %c4_i32 = arith.constant 4 : i32
    %cst_67 = arith.constant dense<0.000000e+00> : vector<8x512xf32>
    %169 = tpu.matmul %168, %14, %cst_67 {dimension_numbers = #tpu.dot_dimension_numbers<[1], [0], [0], [1], [0, 0, 1, 1], [], []>} : vector<8x128xbf16>, vector<128x512xbf16>, vector<8x512xf32> -> vector<8x512xf32>
    %c8_i32_68 = arith.constant 8 : i32
    %170 = arith.addi %c8_i32_68, %c4_i32 : i32
    %171 = arith.index_cast %170 : i32 to index
    %c0_69 = arith.constant 0 : index
    %c0_70 = arith.constant 0 : index
    %172 = vector.load %arg11[%171, %c0_69, %c0_70] : memref<16x8x512xf32, #tpu.memory_space<vmem>>, vector<1x8x512xf32>
    %173 = vector.shape_cast %172 : vector<1x8x512xf32> to vector<8x512xf32>
    %174 = arith.addf %169, %173 : vector<8x512xf32>
    %175 = vector.extract_strided_slice %174 {offsets = [0, 0], sizes = [8, 128], strides = [1, 1]} : vector<8x512xf32> to vector<8x128xf32>
    %cst_71 = arith.constant 5.000000e-01 : f32
    %176 = vector.broadcast %cst_71 : f32 to vector<8x128xf32>
    %177 = arith.mulf %176, %175 : vector<8x128xf32>
    %178 = math.tanh %177 : vector<8x128xf32>
    %cst_72 = arith.constant 5.000000e-01 : f32
    %179 = vector.broadcast %cst_72 : f32 to vector<8x128xf32>
    %180 = arith.mulf %179, %178 : vector<8x128xf32>
    %cst_73 = arith.constant 5.000000e-01 : f32
    %181 = vector.broadcast %cst_73 : f32 to vector<8x128xf32>
    %182 = arith.addf %180, %181 : vector<8x128xf32>
    %183 = vector.extract_strided_slice %174 {offsets = [0, 128], sizes = [8, 128], strides = [1, 1]} : vector<8x512xf32> to vector<8x128xf32>
    %cst_74 = arith.constant 5.000000e-01 : f32
    %184 = vector.broadcast %cst_74 : f32 to vector<8x128xf32>
    %185 = arith.mulf %184, %183 : vector<8x128xf32>
    %186 = math.tanh %185 : vector<8x128xf32>
    %cst_75 = arith.constant 5.000000e-01 : f32
    %187 = vector.broadcast %cst_75 : f32 to vector<8x128xf32>
    %188 = arith.mulf %187, %186 : vector<8x128xf32>
    %cst_76 = arith.constant 5.000000e-01 : f32
    %189 = vector.broadcast %cst_76 : f32 to vector<8x128xf32>
    %190 = arith.addf %188, %189 : vector<8x128xf32>
    %191 = vector.extract_strided_slice %174 {offsets = [0, 256], sizes = [8, 128], strides = [1, 1]} : vector<8x512xf32> to vector<8x128xf32>
    %192 = math.tanh %191 : vector<8x128xf32>
    %193 = vector.extract_strided_slice %174 {offsets = [0, 384], sizes = [8, 128], strides = [1, 1]} : vector<8x512xf32> to vector<8x128xf32>
    %cst_77 = arith.constant 5.000000e-01 : f32
    %194 = vector.broadcast %cst_77 : f32 to vector<8x128xf32>
    %195 = arith.mulf %194, %193 : vector<8x128xf32>
    %196 = math.tanh %195 : vector<8x128xf32>
    %cst_78 = arith.constant 5.000000e-01 : f32
    %197 = vector.broadcast %cst_78 : f32 to vector<8x128xf32>
    %198 = arith.mulf %197, %196 : vector<8x128xf32>
    %cst_79 = arith.constant 5.000000e-01 : f32
    %199 = vector.broadcast %cst_79 : f32 to vector<8x128xf32>
    %200 = arith.addf %198, %199 : vector<8x128xf32>
    %201 = arith.mulf %190, %165 : vector<8x128xf32>
    %202 = arith.mulf %182, %192 : vector<8x128xf32>
    %203 = arith.addf %201, %202 : vector<8x128xf32>
    %204 = math.tanh %203 : vector<8x128xf32>
    %205 = arith.mulf %200, %204 : vector<8x128xf32>
    %206 = arith.truncf %205 : vector<8x128xf32> to vector<8x128xbf16>
    %c5_i32 = arith.constant 5 : i32
    %cst_80 = arith.constant dense<0.000000e+00> : vector<8x512xf32>
    %207 = tpu.matmul %206, %14, %cst_80 {dimension_numbers = #tpu.dot_dimension_numbers<[1], [0], [0], [1], [0, 0, 1, 1], [], []>} : vector<8x128xbf16>, vector<128x512xbf16>, vector<8x512xf32> -> vector<8x512xf32>
    %c8_i32_81 = arith.constant 8 : i32
    %208 = arith.addi %c8_i32_81, %c5_i32 : i32
    %209 = arith.index_cast %208 : i32 to index
    %c0_82 = arith.constant 0 : index
    %c0_83 = arith.constant 0 : index
    %210 = vector.load %arg11[%209, %c0_82, %c0_83] : memref<16x8x512xf32, #tpu.memory_space<vmem>>, vector<1x8x512xf32>
    %211 = vector.shape_cast %210 : vector<1x8x512xf32> to vector<8x512xf32>
    %212 = arith.addf %207, %211 : vector<8x512xf32>
    %213 = vector.extract_strided_slice %212 {offsets = [0, 0], sizes = [8, 128], strides = [1, 1]} : vector<8x512xf32> to vector<8x128xf32>
    %cst_84 = arith.constant 5.000000e-01 : f32
    %214 = vector.broadcast %cst_84 : f32 to vector<8x128xf32>
    %215 = arith.mulf %214, %213 : vector<8x128xf32>
    %216 = math.tanh %215 : vector<8x128xf32>
    %cst_85 = arith.constant 5.000000e-01 : f32
    %217 = vector.broadcast %cst_85 : f32 to vector<8x128xf32>
    %218 = arith.mulf %217, %216 : vector<8x128xf32>
    %cst_86 = arith.constant 5.000000e-01 : f32
    %219 = vector.broadcast %cst_86 : f32 to vector<8x128xf32>
    %220 = arith.addf %218, %219 : vector<8x128xf32>
    %221 = vector.extract_strided_slice %212 {offsets = [0, 128], sizes = [8, 128], strides = [1, 1]} : vector<8x512xf32> to vector<8x128xf32>
    %cst_87 = arith.constant 5.000000e-01 : f32
    %222 = vector.broadcast %cst_87 : f32 to vector<8x128xf32>
    %223 = arith.mulf %222, %221 : vector<8x128xf32>
    %224 = math.tanh %223 : vector<8x128xf32>
    %cst_88 = arith.constant 5.000000e-01 : f32
    %225 = vector.broadcast %cst_88 : f32 to vector<8x128xf32>
    %226 = arith.mulf %225, %224 : vector<8x128xf32>
    %cst_89 = arith.constant 5.000000e-01 : f32
    %227 = vector.broadcast %cst_89 : f32 to vector<8x128xf32>
    %228 = arith.addf %226, %227 : vector<8x128xf32>
    %229 = vector.extract_strided_slice %212 {offsets = [0, 256], sizes = [8, 128], strides = [1, 1]} : vector<8x512xf32> to vector<8x128xf32>
    %230 = math.tanh %229 : vector<8x128xf32>
    %231 = vector.extract_strided_slice %212 {offsets = [0, 384], sizes = [8, 128], strides = [1, 1]} : vector<8x512xf32> to vector<8x128xf32>
    %cst_90 = arith.constant 5.000000e-01 : f32
    %232 = vector.broadcast %cst_90 : f32 to vector<8x128xf32>
    %233 = arith.mulf %232, %231 : vector<8x128xf32>
    %234 = math.tanh %233 : vector<8x128xf32>
    %cst_91 = arith.constant 5.000000e-01 : f32
    %235 = vector.broadcast %cst_91 : f32 to vector<8x128xf32>
    %236 = arith.mulf %235, %234 : vector<8x128xf32>
    %cst_92 = arith.constant 5.000000e-01 : f32
    %237 = vector.broadcast %cst_92 : f32 to vector<8x128xf32>
    %238 = arith.addf %236, %237 : vector<8x128xf32>
    %239 = arith.mulf %228, %203 : vector<8x128xf32>
    %240 = arith.mulf %220, %230 : vector<8x128xf32>
    %241 = arith.addf %239, %240 : vector<8x128xf32>
    %242 = math.tanh %241 : vector<8x128xf32>
    %243 = arith.mulf %238, %242 : vector<8x128xf32>
    %244 = arith.truncf %243 : vector<8x128xf32> to vector<8x128xbf16>
    %c6_i32 = arith.constant 6 : i32
    %cst_93 = arith.constant dense<0.000000e+00> : vector<8x512xf32>
    %245 = tpu.matmul %244, %14, %cst_93 {dimension_numbers = #tpu.dot_dimension_numbers<[1], [0], [0], [1], [0, 0, 1, 1], [], []>} : vector<8x128xbf16>, vector<128x512xbf16>, vector<8x512xf32> -> vector<8x512xf32>
    %c8_i32_94 = arith.constant 8 : i32
    %246 = arith.addi %c8_i32_94, %c6_i32 : i32
    %247 = arith.index_cast %246 : i32 to index
    %c0_95 = arith.constant 0 : index
    %c0_96 = arith.constant 0 : index
    %248 = vector.load %arg11[%247, %c0_95, %c0_96] : memref<16x8x512xf32, #tpu.memory_space<vmem>>, vector<1x8x512xf32>
    %249 = vector.shape_cast %248 : vector<1x8x512xf32> to vector<8x512xf32>
    %250 = arith.addf %245, %249 : vector<8x512xf32>
    %251 = vector.extract_strided_slice %250 {offsets = [0, 0], sizes = [8, 128], strides = [1, 1]} : vector<8x512xf32> to vector<8x128xf32>
    %cst_97 = arith.constant 5.000000e-01 : f32
    %252 = vector.broadcast %cst_97 : f32 to vector<8x128xf32>
    %253 = arith.mulf %252, %251 : vector<8x128xf32>
    %254 = math.tanh %253 : vector<8x128xf32>
    %cst_98 = arith.constant 5.000000e-01 : f32
    %255 = vector.broadcast %cst_98 : f32 to vector<8x128xf32>
    %256 = arith.mulf %255, %254 : vector<8x128xf32>
    %cst_99 = arith.constant 5.000000e-01 : f32
    %257 = vector.broadcast %cst_99 : f32 to vector<8x128xf32>
    %258 = arith.addf %256, %257 : vector<8x128xf32>
    %259 = vector.extract_strided_slice %250 {offsets = [0, 128], sizes = [8, 128], strides = [1, 1]} : vector<8x512xf32> to vector<8x128xf32>
    %cst_100 = arith.constant 5.000000e-01 : f32
    %260 = vector.broadcast %cst_100 : f32 to vector<8x128xf32>
    %261 = arith.mulf %260, %259 : vector<8x128xf32>
    %262 = math.tanh %261 : vector<8x128xf32>
    %cst_101 = arith.constant 5.000000e-01 : f32
    %263 = vector.broadcast %cst_101 : f32 to vector<8x128xf32>
    %264 = arith.mulf %263, %262 : vector<8x128xf32>
    %cst_102 = arith.constant 5.000000e-01 : f32
    %265 = vector.broadcast %cst_102 : f32 to vector<8x128xf32>
    %266 = arith.addf %264, %265 : vector<8x128xf32>
    %267 = vector.extract_strided_slice %250 {offsets = [0, 256], sizes = [8, 128], strides = [1, 1]} : vector<8x512xf32> to vector<8x128xf32>
    %268 = math.tanh %267 : vector<8x128xf32>
    %269 = vector.extract_strided_slice %250 {offsets = [0, 384], sizes = [8, 128], strides = [1, 1]} : vector<8x512xf32> to vector<8x128xf32>
    %cst_103 = arith.constant 5.000000e-01 : f32
    %270 = vector.broadcast %cst_103 : f32 to vector<8x128xf32>
    %271 = arith.mulf %270, %269 : vector<8x128xf32>
    %272 = math.tanh %271 : vector<8x128xf32>
    %cst_104 = arith.constant 5.000000e-01 : f32
    %273 = vector.broadcast %cst_104 : f32 to vector<8x128xf32>
    %274 = arith.mulf %273, %272 : vector<8x128xf32>
    %cst_105 = arith.constant 5.000000e-01 : f32
    %275 = vector.broadcast %cst_105 : f32 to vector<8x128xf32>
    %276 = arith.addf %274, %275 : vector<8x128xf32>
    %277 = arith.mulf %266, %241 : vector<8x128xf32>
    %278 = arith.mulf %258, %268 : vector<8x128xf32>
    %279 = arith.addf %277, %278 : vector<8x128xf32>
    %280 = math.tanh %279 : vector<8x128xf32>
    %281 = arith.mulf %276, %280 : vector<8x128xf32>
    %282 = arith.truncf %281 : vector<8x128xf32> to vector<8x128xbf16>
    %c7_i32 = arith.constant 7 : i32
    %cst_106 = arith.constant dense<0.000000e+00> : vector<8x512xf32>
    %283 = tpu.matmul %282, %14, %cst_106 {dimension_numbers = #tpu.dot_dimension_numbers<[1], [0], [0], [1], [0, 0, 1, 1], [], []>} : vector<8x128xbf16>, vector<128x512xbf16>, vector<8x512xf32> -> vector<8x512xf32>
    %c8_i32_107 = arith.constant 8 : i32
    %284 = arith.addi %c8_i32_107, %c7_i32 : i32
    %285 = arith.index_cast %284 : i32 to index
    %c0_108 = arith.constant 0 : index
    %c0_109 = arith.constant 0 : index
    %286 = vector.load %arg11[%285, %c0_108, %c0_109] : memref<16x8x512xf32, #tpu.memory_space<vmem>>, vector<1x8x512xf32>
    %287 = vector.shape_cast %286 : vector<1x8x512xf32> to vector<8x512xf32>
    %288 = arith.addf %283, %287 : vector<8x512xf32>
    %289 = vector.extract_strided_slice %288 {offsets = [0, 0], sizes = [8, 128], strides = [1, 1]} : vector<8x512xf32> to vector<8x128xf32>
    %cst_110 = arith.constant 5.000000e-01 : f32
    %290 = vector.broadcast %cst_110 : f32 to vector<8x128xf32>
    %291 = arith.mulf %290, %289 : vector<8x128xf32>
    %292 = math.tanh %291 : vector<8x128xf32>
    %cst_111 = arith.constant 5.000000e-01 : f32
    %293 = vector.broadcast %cst_111 : f32 to vector<8x128xf32>
    %294 = arith.mulf %293, %292 : vector<8x128xf32>
    %cst_112 = arith.constant 5.000000e-01 : f32
    %295 = vector.broadcast %cst_112 : f32 to vector<8x128xf32>
    %296 = arith.addf %294, %295 : vector<8x128xf32>
    %297 = vector.extract_strided_slice %288 {offsets = [0, 128], sizes = [8, 128], strides = [1, 1]} : vector<8x512xf32> to vector<8x128xf32>
    %cst_113 = arith.constant 5.000000e-01 : f32
    %298 = vector.broadcast %cst_113 : f32 to vector<8x128xf32>
    %299 = arith.mulf %298, %297 : vector<8x128xf32>
    %300 = math.tanh %299 : vector<8x128xf32>
    %cst_114 = arith.constant 5.000000e-01 : f32
    %301 = vector.broadcast %cst_114 : f32 to vector<8x128xf32>
    %302 = arith.mulf %301, %300 : vector<8x128xf32>
    %cst_115 = arith.constant 5.000000e-01 : f32
    %303 = vector.broadcast %cst_115 : f32 to vector<8x128xf32>
    %304 = arith.addf %302, %303 : vector<8x128xf32>
    %305 = vector.extract_strided_slice %288 {offsets = [0, 256], sizes = [8, 128], strides = [1, 1]} : vector<8x512xf32> to vector<8x128xf32>
    %306 = math.tanh %305 : vector<8x128xf32>
    %307 = vector.extract_strided_slice %288 {offsets = [0, 384], sizes = [8, 128], strides = [1, 1]} : vector<8x512xf32> to vector<8x128xf32>
    %cst_116 = arith.constant 5.000000e-01 : f32
    %308 = vector.broadcast %cst_116 : f32 to vector<8x128xf32>
    %309 = arith.mulf %308, %307 : vector<8x128xf32>
    %310 = math.tanh %309 : vector<8x128xf32>
    %cst_117 = arith.constant 5.000000e-01 : f32
    %311 = vector.broadcast %cst_117 : f32 to vector<8x128xf32>
    %312 = arith.mulf %311, %310 : vector<8x128xf32>
    %cst_118 = arith.constant 5.000000e-01 : f32
    %313 = vector.broadcast %cst_118 : f32 to vector<8x128xf32>
    %314 = arith.addf %312, %313 : vector<8x128xf32>
    %315 = arith.mulf %304, %279 : vector<8x128xf32>
    %316 = arith.mulf %296, %306 : vector<8x128xf32>
    %317 = arith.addf %315, %316 : vector<8x128xf32>
    %318 = math.tanh %317 : vector<8x128xf32>
    %319 = arith.mulf %314, %318 : vector<8x128xf32>
    %320 = arith.truncf %319 : vector<8x128xf32> to vector<8x128xbf16>
    %c8_i32_119 = arith.constant 8 : i32
    %c0_120 = arith.constant 0 : index
    %c0_121 = arith.constant 0 : index
    %321 = vector.load %arg5[%c0_120, %c0_121] : memref<8x128xbf16, #tpu.memory_space<vmem>>, vector<8x128xbf16>
    %322 = tpu.concatenate %320, %321 in 1 : vector<8x128xbf16>, vector<8x128xbf16> -> vector<8x256xbf16>
    %c0_122 = arith.constant 0 : index
    %c0_123 = arith.constant 0 : index
    %323 = vector.load %arg6[%c0_122, %c0_123] : memref<256x512xbf16, #tpu.memory_space<vmem>>, vector<256x512xbf16>
    %cst_124 = arith.constant dense<0.000000e+00> : vector<8x512xf32>
    %324 = tpu.matmul %322, %323, %cst_124 {dimension_numbers = #tpu.dot_dimension_numbers<[1], [0], [0], [1], [0, 0, 1, 1], [], []>} : vector<8x256xbf16>, vector<256x512xbf16>, vector<8x512xf32> -> vector<8x512xf32>
    %c0_125 = arith.constant 0 : index
    %c0_126 = arith.constant 0 : index
    %325 = vector.load %arg7[%c0_125, %c0_126] : memref<1x512xf32, #tpu.memory_space<vmem>>, vector<1x512xf32>
    %326 = vector.broadcast %325 : vector<1x512xf32> to vector<8x512xf32>
    %327 = arith.addf %324, %326 : vector<8x512xf32>
    %cst_127 = arith.constant 0.000000e+00 : f32
    %328 = vector.broadcast %cst_127 : f32 to vector<8x512xf32>
    %329 = arith.maximumf %327, %328 : vector<8x512xf32>
    %330 = arith.truncf %329 : vector<8x512xf32> to vector<8x512xbf16>
    %c0_128 = arith.constant 0 : index
    %c0_129 = arith.constant 0 : index
    %331 = vector.load %arg8[%c0_128, %c0_129] : memref<512x128xbf16, #tpu.memory_space<vmem>>, vector<512x128xbf16>
    %cst_130 = arith.constant dense<0.000000e+00> : vector<8x128xf32>
    %332 = tpu.matmul %330, %331, %cst_130 {dimension_numbers = #tpu.dot_dimension_numbers<[1], [0], [0], [1], [0, 0, 1, 1], [], []>} : vector<8x512xbf16>, vector<512x128xbf16>, vector<8x128xf32> -> vector<8x128xf32>
    %c0_131 = arith.constant 0 : index
    %c0_132 = arith.constant 0 : index
    %333 = vector.load %arg9[%c0_131, %c0_132] : memref<1x128xf32, #tpu.memory_space<vmem>>, vector<1x128xf32>
    %334 = vector.broadcast %333 : vector<1x128xf32> to vector<8x128xf32>
    %335 = arith.addf %332, %334 : vector<8x128xf32>
    %c0_133 = arith.constant 0 : index
    %c0_134 = arith.constant 0 : index
    %336 = vector.load %arg10[%c0_133, %c0_134] : memref<8x128xf32, #tpu.memory_space<vmem>>, vector<8x128xf32>
    tpu.vector_store %arg10[%c0_133, %c0_134], %335 {strides = array<i32>} : memref<8x128xf32, #tpu.memory_space<vmem>>, vector<8x128xf32>,
    return
  }
}

</mosaic_0001>

<bundles_post_ra>
// kernel: model_forward.1
= control target key start
LH: loop header
LB: loop body
LE: loop exit
PB: predicated region body
PF: predicated region fallthrough
CT: control target
= control target key end

     0   :  { %15 = vsyncpa [#allocation4], 0  ;;  %s6550_s0 = inlined_call_operand.vmem [shape: f32[8,8,1], index: 0, kind: input, shape index: {}]   ;;  %s6551_s1 = inlined_call_operand.hbm [shape: f32[1,512], index: 1, kind: input, shape index: {}]   ;;  %s6552_s2 = inlined_call_operand.hbm [shape: bf16[11,128,512], index: 2, kind: input, shape index: {}]   ;;  %s6553_s3 = inlined_call_operand.hbm [shape: bf16[12,128,512], index: 3, kind: input, shape index: {}]   ;;  %s6554_s4 = inlined_call_operand.hbm [shape: f32[12,1,512], index: 4, kind: input, shape index: {}]   ;;  %s6555_s5 = inlined_call_operand.vmem [shape: bf16[8,128], index: 5, kind: input, shape index: {}]   ;;  %s6556_s6 = inlined_call_operand.hbm [shape: bf16[256,512], index: 6, kind: input, shape index: {}]   ;;  %s6557_s7 = inlined_call_operand.hbm [shape: f32[1,512], index: 7, kind: input, shape index: {}]   ;;  %s6558_s8 = inlined_call_operand.hbm [shape: bf16[512,128], index: 8, kind: input, shape index: {}]   ;;  %s6559_s9 = inlined_call_operand.hbm [shape: f32[1,128], index: 9, kind: input, shape index: {}]   ;;  %s6560_s10 = inlined_call_operand.vmem [shape: f32[8,128], index: 10, kind: output, shape index: {}]  }
   0x1   :  { %16 = vsyncpa [#allocation6], 0 }
   0x2   :  { %17 = vsyncpa [#allocation9], 0 }
   0x3   :  { %18 = vsyncpa [#allocation12], 0  ;;  %s37_s15 = sshll.u32 %s6552_s2, 4  ;;  %s38_s15 = int_to_ptr.hbm [resolvable:$true] %s37_s15 }
   0x4   :  { %19 = vsyncpa [#allocation15], 0  ;;  %s5028_s16 = smov [#allocation5]   ;;  %s63_s20 = sshll.u32 %s6554_s4, 4  ;;  %s64_s20 = int_to_ptr.hbm [resolvable:$true] %s63_s20 }
   0x5   :  { %s39_s17 = sshll.u32 %s5028_s16, 4  ;;  %s5029_s21 = smov 256   ;;  %s40_s17 = int_to_ptr.vmem [resolvable:$true] %s39_s17 }
   0x6   :  { %s5030_s22 = smov 16   ;;  %s5031_s23 = smov [#allocation8]  }
   0x7   :  { %45 = dma.hbm_to_vmem [thread:$0]  %s38_s15, 45056, %s40_s17, [#allocation6], %s5029_s21, %s5029_s21, %s5030_s22  }
   0x8   :  { %s65_s24 = sshll.u32 %s5031_s23, 4  ;;  %s5032_s2 = smov 64   ;;  %s66_s24 = int_to_ptr.vmem [resolvable:$true] %s65_s24 }
   0x9   :  { %s5033_s25 = smov 4   ;;  %s92_s4 = sshll.u32 %s6557_s7, 4  ;;  %s93_s4 = int_to_ptr.hbm [resolvable:$true] %s92_s4 }
   0xa   :  { %71 = dma.hbm_to_vmem [thread:$0]  %s64_s20, 768, %s66_s24, [#allocation9], %s5032_s2, %s5032_s2, %s5033_s25  }
   0xb   :  { %s5034_s28 = smov [#allocation11]   ;;  %s27_s12 = sshll.u32 %s6551_s1, 4  ;;  %s28_s12 = int_to_ptr.hbm [resolvable:$true] %s27_s12 }
   0xc   :  { %s94_s29 = sshll.u32 %s5034_s28, 4  ;;  %s5035_s13 = smov [#allocation3]   ;;  %s95_s29 = int_to_ptr.vmem [resolvable:$true] %s94_s29 }
   0xd   :  { %97 = dma.hbm_to_vmem [thread:$0]  %s93_s4, 64, %s95_s29, [#allocation12]  }
   0xe   :  { %s29_s14 = sshll.u32 %s5035_s13, 4  ;;  %s50_s17 = sshll.u32 %s6553_s3, 4  ;;  %s30_s14 = int_to_ptr.vmem [resolvable:$true] %s29_s14  ;;  %s51_s17 = int_to_ptr.hbm [resolvable:$true] %s50_s17 }
   0xf   :  { %32 = dma.hbm_to_vmem [thread:$0]  %s28_s12, 64, %s30_s14, [#allocation4]  }
  0x10   :  { %s78_s19 = sshll.u32 %s6556_s6, 4  ;;  %s5036_s20 = smov [#allocation7]   ;;  %s79_s19 = int_to_ptr.hbm [resolvable:$true] %s78_s19 }
  0x11   :  { %s52_s23 = sshll.u32 %s5036_s20, 4  ;;  %s5037_s1 = smov [#allocation10]   ;;  %s53_s23 = int_to_ptr.vmem [resolvable:$true] %s52_s23 }
  0x12   :  { %58 = dma.hbm_to_vmem [thread:$0]  %s51_s17, 49152, %s53_s23, [#allocation6], %s5029_s21, %s5029_s21, %s5030_s22  }
  0x13   :  { %s80_s24 = sshll.u32 %s5037_s1, 4  ;;  %s102_s3 = sshll.u32 %s6558_s8, 4  ;;  %s81_s24 = int_to_ptr.vmem [resolvable:$true] %s80_s24  ;;  %s103_s3 = int_to_ptr.hbm [resolvable:$true] %s102_s3 }
  0x14   :  { %86 = dma.hbm_to_vmem [thread:$0]  %s79_s19, 8192, %s81_s24, [#allocation9], %s5029_s21, %s5029_s21, %s5030_s22  }
  0x15   :  { %s116_s28 = sshll.u32 %s6559_s9, 4  ;;  %s5038_s29 = smov [#allocation13]   ;;  %s117_s28 = int_to_ptr.hbm [resolvable:$true] %s116_s28 }
  0x16   :  { %s104_s30 = sshll.u32 %s5038_s29, 4  ;;  %s5039_s11 = smov [#allocation14]   ;;  %s105_s30 = int_to_ptr.vmem [resolvable:$true] %s104_s30 }
  0x17   :  { %110 = dma.hbm_to_vmem [thread:$0]  %s103_s3, 4096, %s105_s30, [#allocation12], %s5032_s2, %s5032_s2, %s5033_s25  }
  0x18   :  { %s118_s8 = sshll.u32 %s5039_s11, 4  ;;  %s119_s8 = int_to_ptr.vmem [resolvable:$true] %s118_s8 }
  0x19   :  { %121 = dma.hbm_to_vmem [thread:$0]  %s117_s28, 16, %s119_s8, [#allocation15]  }
  0x1a   :  { %5014 = dma.done.wait [#allocation4], 64  }
  0x1b   :  { %5015 = vsyncadd [#allocation4], 4294967232 }
  0x1c   :  { %5016 = dma.done.wait [#allocation6], 94208  }
  0x1d   :  { %5017 = vsyncadd [#allocation6], 4294873088 }
  0x1e   :  { %5018 = dma.done.wait [#allocation9], 8960  }
  0x1f   :  { %5019 = vsyncadd [#allocation9], 4294958336 }
  0x20   :  { %5020 = dma.done.wait [#allocation12], 4160  }
  0x21   :  { %5021 = vsyncadd [#allocation12], 4294963136 }
  0x22   :  { %5022 = dma.done.wait [#allocation15], 16  }
  0x23   :  { %5023 = vsyncadd [#allocation15], 4294967280  ;;  %v6561_v0 = vmov 0   ;;  %v157_v1 = vld [vmem:[%s6550_s0 + $0x10] sm:$0xff]  ;;  %v155_v2 = vld [vmem:[%s6550_s0] sm:$0xff] }
  0x24   :  { %4655 = vset.pattern.permute.xlu1 %v6561_v0  ;;  %4654 = vset.pattern.permute.xlu0 %v6561_v0  ;;  %v159_v3 = vld [vmem:[%s6550_s0 + $0x20] sm:$0xff]  ;;  %v158_v4 = vld [vmem:[%s6550_s0 + $0x18] sm:$0xff]  ;;  %v156_v5 = vld [vmem:[%s6550_s0 + $0x8] sm:$0xff] }
  0x25   :  { %4656 = vset.pattern.permute.xlu2 %v6561_v0  ;;  %177 = vperm.xlu1 %4655, %v157_v1   ;;  %v160_v6 = vld [vmem:[%s6550_s0 + $0x28] sm:$0xff]  ;;  %v162_v7 = vld [vmem:[%s6550_s0 + $0x38] sm:$0xff]  ;;  %v161_v8 = vld [vmem:[%s6550_s0 + $0x30] sm:$0xff]  ;;  %s5243_s0 = smov 0  }
  0x26   :  { %167 = vperm.xlu0 %4654, %v155_v2   ;;  %187 = vperm.xlu2 %4656, %v159_v3   ;;  %v163_v9 = vld [vmem:[#allocation3] sm:$0xf]  ;;  %v164_v10 = vld [vmem:[#allocation8] sm:$0xf] }
  0x27   :  { %v5163_v11 = vperm.slane %v163_v9, 0  ;;  %v5165_v12 = vperm.slane %v163_v9, 1  ;;  %v5167_v13 = vperm.slane %v163_v9, 2  ;;  %v5169_v14 = vperm.slane %v163_v9, 3 }
  0x28   :  { %v5171_v15 = vperm.slane %v164_v10, 0  ;;  %v5173_v16 = vperm.slane %v164_v10, 1  ;;  %v5175_v17 = vperm.slane %v164_v10, 2  ;;  %v5181_v23 = vperm.slane %v164_v10, 3 }
  0x2d   :  { %182 = vperm.xlu1 %4655, %v158_v4  }
  0x2e   :  { %172 = vperm.xlu0 %4654, %v156_v5   ;;  %192 = vperm.xlu2 %4656, %v160_v6  }
  0x35   :  { %202 = vperm.xlu1 %4655, %v162_v7  }
  0x36   :  { %197 = vperm.xlu0 %4654, %v161_v8  }
  0x80   :  { %v188_v18 = vpop.permute.xlu2 %187 }
  0x81   :  { %v230_v19 = vmul.f32 %v5163_v11, %v188_v18  ;;  %v231_v20 = vmul.f32 %v5165_v12, %v188_v18  ;;  %v232_v21 = vmul.f32 %v5167_v13, %v188_v18  ;;  %v233_v22 = vmul.f32 %v5169_v14, %v188_v18 }
  0x83   :  { %v271_v24 = vadd.f32 %v5171_v15, %v230_v19  ;;  %v272_v25 = vadd.f32 %v5173_v16, %v231_v20  ;;  %v273_v26 = vadd.f32 %v5175_v17, %v232_v21  ;;  %v274_v27 = vadd.f32 %v5181_v23, %v233_v22 }
  0x85   :  { %303 = vst [vmem:[#allocation2 + $0x80] sm:$0xff] %v271_v24 }
  0x86   :  { %304 = vst [vmem:[#allocation2 + $0x88] sm:$0xff] %v272_v25 }
  0x87   :  { %305 = vst [vmem:[#allocation2 + $0x90] sm:$0xff] %v273_v26 }
  0x88   :  { %306 = vst [vmem:[#allocation2 + $0x98] sm:$0xff] %v274_v27  ;;  %v193_v28 = vpop.permute.xlu2 %192 }
  0x89   :  { %v234_v29 = vmul.f32 %v5163_v11, %v193_v28  ;;  %v235_v30 = vmul.f32 %v5165_v12, %v193_v28  ;;  %v236_v31 = vmul.f32 %v5167_v13, %v193_v28  ;;  %v237_v32 = vmul.f32 %v5169_v14, %v193_v28 }
  0x8b   :  { %v275_v33 = vadd.f32 %v5171_v15, %v234_v29  ;;  %v276_v34 = vadd.f32 %v5173_v16, %v235_v30  ;;  %v277_v35 = vadd.f32 %v5175_v17, %v236_v31  ;;  %v278_v36 = vadd.f32 %v5181_v23, %v237_v32 }
  0x8d   :  { %307 = vst [vmem:[#allocation2 + $0xa0] sm:$0xff] %v275_v33 }
  0x8e   :  { %308 = vst [vmem:[#allocation2 + $0xa8] sm:$0xff] %v276_v34 }
  0x8f   :  { %309 = vst [vmem:[#allocation2 + $0xb0] sm:$0xff] %v277_v35 }
  0x90   :  { %310 = vst [vmem:[#allocation2 + $0xb8] sm:$0xff] %v278_v36 }
  0x97   :  { %v178_v37 = vpop.permute.xlu1 %177 }
  0x98   :  { %v168_v38 = vpop.permute.xlu0 %167  ;;  %v222_v39 = vmul.f32 %v5163_v11, %v178_v37  ;;  %v223_v40 = vmul.f32 %v5165_v12, %v178_v37  ;;  %v224_v41 = vmul.f32 %v5167_v13, %v178_v37  ;;  %v225_v42 = vmul.f32 %v5169_v14, %v178_v37 }
  0x99   :  { %v214_v43 = vmul.f32 %v5163_v11, %v168_v38  ;;  %v215_v44 = vmul.f32 %v5165_v12, %v168_v38  ;;  %v216_v48 = vmul.f32 %v5167_v13, %v168_v38  ;;  %v217_v50 = vmul.f32 %v5169_v14, %v168_v38 }
  0x9a   :  { %v263_v45 = vadd.f32 %v5171_v15, %v222_v39  ;;  %v264_v46 = vadd.f32 %v5173_v16, %v223_v40  ;;  %v265_v47 = vadd.f32 %v5175_v17, %v224_v41  ;;  %v266_v49 = vadd.f32 %v5181_v23, %v225_v42 }
  0x9b   :  { %v255_v51 = vadd.f32 %v5171_v15, %v214_v43  ;;  %v256_v52 = vadd.f32 %v5173_v16, %v215_v44  ;;  %v257_v53 = vadd.f32 %v5175_v17, %v216_v48  ;;  %v258_v54 = vadd.f32 %v5181_v23, %v217_v50 }
  0x9c   :  { %295 = vst [vmem:[#allocation2 + $0x40] sm:$0xff] %v263_v45 }
  0x9d   :  { %296 = vst [vmem:[#allocation2 + $0x48] sm:$0xff] %v264_v46 }
  0x9e   :  { %297 = vst [vmem:[#allocation2 + $0x50] sm:$0xff] %v265_v47 }
  0x9f   :  { %298 = vst [vmem:[#allocation2 + $0x58] sm:$0xff] %v266_v49  ;;  %v183_v55 = vpop.permute.xlu1 %182 }
  0xa0   :  { %v173_v56 = vpop.permute.xlu0 %172  ;;  %287 = vst [vmem:[#allocation2] sm:$0xff] %v255_v51  ;;  %v226_v57 = vmul.f32 %v5163_v11, %v183_v55  ;;  %v227_v58 = vmul.f32 %v5165_v12, %v183_v55  ;;  %v228_v59 = vmul.f32 %v5167_v13, %v183_v55  ;;  %v229_v60 = vmul.f32 %v5169_v14, %v183_v55 }
  0xa1   :  { %288 = vst [vmem:[#allocation2 + $0x8] sm:$0xff] %v256_v52  ;;  %v218_v61 = vmul.f32 %v5163_v11, %v173_v56  ;;  %v219_v62 = vmul.f32 %v5165_v12, %v173_v56  ;;  %v220_v3 = vmul.f32 %v5167_v13, %v173_v56  ;;  %v221_v5 = vmul.f32 %v5169_v14, %v173_v56 }
  0xa2   :  { %289 = vst [vmem:[#allocation2 + $0x10] sm:$0xff] %v257_v53  ;;  %v267_v63 = vadd.f32 %v5171_v15, %v226_v57  ;;  %v268_v1 = vadd.f32 %v5173_v16, %v227_v58  ;;  %v269_v2 = vadd.f32 %v5175_v17, %v228_v59  ;;  %v270_v4 = vadd.f32 %v5181_v23, %v229_v60 }
  0xa3   :  { %290 = vst [vmem:[#allocation2 + $0x18] sm:$0xff] %v258_v54  ;;  %v259_v6 = vadd.f32 %v5171_v15, %v218_v61  ;;  %v260_v7 = vadd.f32 %v5173_v16, %v219_v62  ;;  %v261_v8 = vadd.f32 %v5175_v17, %v220_v3  ;;  %v262_v9 = vadd.f32 %v5181_v23, %v221_v5 }
  0xa4   :  { %299 = vst [vmem:[#allocation2 + $0x60] sm:$0xff] %v267_v63 }
  0xa5   :  { %300 = vst [vmem:[#allocation2 + $0x68] sm:$0xff] %v268_v1 }
  0xa6   :  { %301 = vst [vmem:[#allocation2 + $0x70] sm:$0xff] %v269_v2 }
  0xa7   :  { %302 = vst [vmem:[#allocation2 + $0x78] sm:$0xff] %v270_v4  ;;  %v203_v10 = vpop.permute.xlu1 %202 }
  0xa8   :  { %v198_v18 = vpop.permute.xlu0 %197  ;;  %291 = vst [vmem:[#allocation2 + $0x20] sm:$0xff] %v259_v6  ;;  %v242_v19 = vmul.f32 %v5163_v11, %v203_v10  ;;  %v243_v20 = vmul.f32 %v5165_v12, %v203_v10  ;;  %v244_v21 = vmul.f32 %v5167_v13, %v203_v10  ;;  %v245_v22 = vmul.f32 %v5169_v14, %v203_v10 }
  0xa9   :  { %292 = vst [vmem:[#allocation2 + $0x28] sm:$0xff] %v260_v7  ;;  %v238_v24 = vmul.f32 %v5163_v11, %v198_v18  ;;  %v239_v25 = vmul.f32 %v5165_v12, %v198_v18  ;;  %v240_v29 = vmul.f32 %v5167_v13, %v198_v18  ;;  %v241_v31 = vmul.f32 %v5169_v14, %v198_v18 }
  0xaa   :  { %293 = vst [vmem:[#allocation2 + $0x30] sm:$0xff] %v261_v8  ;;  %v283_v26 = vadd.f32 %v5171_v15, %v242_v19  ;;  %v284_v27 = vadd.f32 %v5173_v16, %v243_v20  ;;  %v285_v28 = vadd.f32 %v5175_v17, %v244_v21  ;;  %v286_v30 = vadd.f32 %v5181_v23, %v245_v22 }
  0xab   :  { %294 = vst [vmem:[#allocation2 + $0x38] sm:$0xff] %v262_v9  ;;  %v279_v32 = vadd.f32 %v5171_v15, %v238_v24  ;;  %v280_v11 = vadd.f32 %v5173_v16, %v239_v25  ;;  %v281_v12 = vadd.f32 %v5175_v17, %v240_v29  ;;  %v282_v33 = vadd.f32 %v5181_v23, %v241_v31 }
  0xac   :  { %315 = vst [vmem:[#allocation2 + $0xe0] sm:$0xff] %v283_v26 }
  0xad   :  { %316 = vst [vmem:[#allocation2 + $0xe8] sm:$0xff] %v284_v27 }
  0xae   :  { %317 = vst [vmem:[#allocation2 + $0xf0] sm:$0xff] %v285_v28 }
  0xaf   :  { %318 = vst [vmem:[#allocation2 + $0xf8] sm:$0xff] %v286_v30 }
  0xb0   :  { %311 = vst [vmem:[#allocation2 + $0xc0] sm:$0xff] %v279_v32 }
  0xb1   :  { %312 = vst [vmem:[#allocation2 + $0xc8] sm:$0xff] %v280_v11 }
  0xb2   :  { %313 = vst [vmem:[#allocation2 + $0xd0] sm:$0xff] %v281_v12 }
  0xb3   :  { %314 = vst [vmem:[#allocation2 + $0xd8] sm:$0xff] %v282_v33 }
  0xb4 LB: > { %s4420_s1 = sshll.u32 %s5026_s0, 8  ;;  %s326_s27 = ssub.s32 0, %s5026_s0  ;;  %s5026_s0 = sphi %s5243_s0, %s324_s0  }
  0xb5   : > { %s5251_s24 = scalar_lea.vmem [#allocation7], %s4420_s1  ;;  %s5399_s26 = scalar_lea.vmem [#allocation5], %s4420_s1 }
  0xb6   : > { %v3680_v13 = vld [vmem:[%s5251_s24 + $0xe0] sm:$0xf]  ;;  %v4451_v14 = vld [vmem:[%s5251_s24 + $0xec] sm:$0xf0]  ;;  %v4449_v15 = vld [vmem:[%s5251_s24 + $0xe4] sm:$0xf]  ;;  %s5499_s3 = smin.u32 %s5026_s0, %s326_s27 }
  0xb7   : > { %v5256_v16 = vor.u32 %v4451_v14, %v3680_v13  ;;  %v3682_v17 = vld [vmem:[%s5251_s24 + $0xf0] sm:$0xf0]  ;;  %v3688_v23 = vld [vmem:[%s5251_s24 + $0xe8] sm:$0xf]  ;;  %v4452_v34 = vld [vmem:[%s5251_s24 + $0xf4] sm:$0xf0] }
  0xb8   : > { %v5261_v35 = vor.u32 %v4449_v15, %v3682_v17  ;;  %v5263_v36 = vor.u32 %v4452_v34, %v3688_v23  ;;  %v4450_v37 = vld [vmem:[%s5251_s24 + $0xec] sm:$0xf]  ;;  %v3690_v38 = vld [vmem:[%s5251_s24 + $0xf8] sm:$0xf0]  ;;  %v3664_v39 = vld [vmem:[%s5251_s24 + $0xc0] sm:$0xf] }
  0xb9   : > { %580 = vmatpush.bf16.msra.mxu0 %v5256_v16  ;;  %v5269_v40 = vor.u32 %v4450_v37, %v3690_v38  ;;  %v4447_v41 = vld [vmem:[%s5251_s24 + $0xcc] sm:$0xf0]  ;;  %v4445_v42 = vld [vmem:[%s5251_s24 + $0xc4] sm:$0xf]  ;;  %v3666_v43 = vld [vmem:[%s5251_s24 + $0xd0] sm:$0xf0] }
  0xba   : > { %593 = vmatpush.bf16.msra.mxu1 %v5261_v35  ;;  %606 = vmatpush.bf16.msra.mxu2 %v5263_v36  ;;  %v5276_v44 = vor.u32 %v4447_v41, %v3664_v39  ;;  %v5278_v45 = vor.u32 %v4445_v42, %v3666_v43  ;;  %v3672_v46 = vld [vmem:[%s5251_s24 + $0xc8] sm:$0xf]  ;;  %v4448_v47 = vld [vmem:[%s5251_s24 + $0xd4] sm:$0xf0]  ;;  %v4446_v48 = vld [vmem:[%s5251_s24 + $0xcc] sm:$0xf] }
  0xbb   : > { %619 = vmatpush.bf16.msra.mxu3 %v5269_v40  ;;  %v5284_v49 = vor.u32 %v4448_v47, %v3672_v46  ;;  %v3674_v50 = vld [vmem:[%s5251_s24 + $0xd8] sm:$0xf0]  ;;  %v3648_v51 = vld [vmem:[%s5251_s24 + $0xa0] sm:$0xf]  ;;  %v4443_v52 = vld [vmem:[%s5251_s24 + $0xac] sm:$0xf0] }
  0xbc   : > { %v5289_v53 = vor.u32 %v4446_v48, %v3674_v50  ;;  %v4441_v54 = vld [vmem:[%s5251_s24 + $0xa4] sm:$0xf]  ;;  %v3650_v55 = vld [vmem:[%s5251_s24 + $0xb0] sm:$0xf0]  ;;  %v3656_v56 = vld [vmem:[%s5251_s24 + $0xa8] sm:$0xf]  ;;  %v5295_v57 = vor.u32 %v4443_v52, %v3648_v51 }
  0xbd   : > { %581 = vmatpush.bf16.msra.mxu0 %v5276_v44  ;;  %v4444_v58 = vld [vmem:[%s5251_s24 + $0xb4] sm:$0xf0]  ;;  %v4442_v59 = vld [vmem:[%s5251_s24 + $0xac] sm:$0xf]  ;;  %v3658_v60 = vld [vmem:[%s5251_s24 + $0xb8] sm:$0xf0]  ;;  %v5302_v61 = vor.u32 %v4441_v54, %v3650_v55 }
  0xbe   : > { %594 = vmatpush.bf16.msra.mxu1 %v5278_v45  ;;  %607 = vmatpush.bf16.msra.mxu2 %v5284_v49  ;;  %v5304_v62 = vor.u32 %v4444_v58, %v3656_v56  ;;  %v3632_v63 = vld [vmem:[%s5251_s24 + $0x80] sm:$0xf]  ;;  %v4439_v1 = vld [vmem:[%s5251_s24 + $0x8c] sm:$0xf0]  ;;  %v4437_v2 = vld [vmem:[%s5251_s24 + $0x84] sm:$0xf]  ;;  %v5310_v3 = vor.u32 %v4442_v59, %v3658_v60 }
  0xbf   : > { %620 = vmatpush.bf16.msra.mxu3 %v5289_v53  ;;  %v3634_v4 = vld [vmem:[%s5251_s24 + $0x90] sm:$0xf0]  ;;  %v3640_v5 = vld [vmem:[%s5251_s24 + $0x88] sm:$0xf]  ;;  %v4440_v6 = vld [vmem:[%s5251_s24 + $0x94] sm:$0xf0]  ;;  %v5318_v9 = vor.u32 %v4439_v1, %v3632_v63 }
  0xc0   : > { %6631 = vst [vmem:[#allocation21_spill] sm:$0xff] %v5304_v62  ;;  %v4438_v7 = vld [vmem:[%s5251_s24 + $0x8c] sm:$0xf]  ;;  %v3642_v8 = vld [vmem:[%s5251_s24 + $0x98] sm:$0xf0]  ;;  %v5322_v10 = vor.u32 %v4437_v2, %v3634_v4  ;;  %v5324_v18 = vor.u32 %v4440_v6, %v3640_v5  ;;  %s328_s6 = sand.u32 1, %s5499_s3  }
  0xc1   : > { %6632 = vst [vmem:[#allocation22_spill] sm:$0xff] %v5310_v3  ;;  %582 = vmatpush.bf16.msra.mxu0 %v5295_v57  ;;  %v3616_v19 = vld [vmem:[%s5251_s24 + $0x60] sm:$0xf]  ;;  %v4435_v20 = vld [vmem:[%s5251_s24 + $0x6c] sm:$0xf0]  ;;  %v5330_v22 = vor.u32 %v4438_v7, %v3642_v8  ;;  %p325_p0 = scmp.lt.s32.totalorder %s5026_s0, 0 }
  0xc2   : > { %6633 = vst [vmem:[#allocation23_spill] sm:$0xff] %v5318_v9  ;;  %595 = vmatpush.bf16.msra.mxu1 %v5302_v61  ;;  %608 = vmatpush.bf16.msra.mxu2 %v5304_v62  ;;  %v4433_v21 = vld [vmem:[%s5251_s24 + $0x64] sm:$0xf]  ;;  %v3618_v24 = vld [vmem:[%s5251_s24 + $0x70] sm:$0xf0]  ;;  %v5338_v29 = vor.u32 %v4435_v20, %v3616_v19  ;;  %s329_s4 = ssub.s32 0, %s328_s6 }
  0xc3   : > { %6634 = vst [vmem:[#allocation24_spill] sm:$0xff] %v5322_v10  ;;  %621 = vmatpush.bf16.msra.mxu3 %v5310_v3  ;;  %v3624_v25 = vld [vmem:[%s5251_s24 + $0x68] sm:$0xf]  ;;  %v4436_v26 = vld [vmem:[%s5251_s24 + $0x74] sm:$0xf0]  ;;  %v5342_v30 = vor.u32 %v4433_v21, %v3618_v24  ;;  %s6810_s4 = smov (!%p325_p0, %s329_s4), %s328_s6  ;;  %s3561_s11 = sshll.u32 %s5026_s0, 2 }
  0xc4   : > { %6635 = vst [vmem:[#allocation25_spill] sm:$0xff] %v5324_v18  ;;  %v4434_v27 = vld [vmem:[%s5251_s24 + $0x6c] sm:$0xf]  ;;  %v3626_v28 = vld [vmem:[%s5251_s24 + $0x78] sm:$0xf0]  ;;  %v5344_v31 = vor.u32 %v4436_v26, %v3624_v25  ;;  %p3556_p1 = scmp.lt.s32.totalorder %s6810_s4, 0 }
  0xc5   : > { %6636 = vst [vmem:[#allocation26_spill] sm:$0xff] %v5330_v22  ;;  %583 = vmatpush.bf16.msra.mxu0 %v5318_v9  ;;  %v3600_v32 = vld [vmem:[%s5251_s24 + $0x40] sm:$0xf]  ;;  %v4431_v11 = vld [vmem:[%s5251_s24 + $0x4c] sm:$0xf0]  ;;  %v5350_v33 = vor.u32 %v4434_v27, %v3626_v28  ;;  %s335_s28 = sadd.s32 2, %s6810_s4 }
  0xc6   : > { %6637 = vst [vmem:[#allocation27_spill] sm:$0xff] %v5338_v29  ;;  %596 = vmatpush.bf16.msra.mxu1 %v5322_v10  ;;  %609 = vmatpush.bf16.msra.mxu2 %v5324_v18  ;;  %v4429_v12 = vld [vmem:[%s5251_s24 + $0x44] sm:$0xf]  ;;  %v3602_v13 = vld [vmem:[%s5251_s24 + $0x50] sm:$0xf0]  ;;  %v5358_v34 = vor.u32 %v4431_v11, %v3600_v32  ;;  %s6812_s28 = smov (!%p3556_p1, %s335_s28), %s6810_s4  ;;  %s3487_s8 = scalar_lea.vmem [#allocation8], %s3561_s11 }
  0xc7   : > { %6638 = vst [vmem:[#allocation28_spill] sm:$0xff] %v5342_v30  ;;  %622 = vmatpush.bf16.msra.mxu3 %v5330_v22  ;;  %v3608_v14 = vld [vmem:[%s5251_s24 + $0x48] sm:$0xf]  ;;  %v4432_v15 = vld [vmem:[%s5251_s24 + $0x54] sm:$0xf0]  ;;  %v5362_v37 = vor.u32 %v4429_v12, %v3602_v13  ;;  %s4487_s29 = sshll.u32 %s6812_s28, 8 }
  0xc8   : > { %6639 = vst [vmem:[#allocation29_spill] sm:$0xff] %v5344_v31  ;;  %v4430_v17 = vld [vmem:[%s5251_s24 + $0x4c] sm:$0xf]  ;;  %v3610_v23 = vld [vmem:[%s5251_s24 + $0x58] sm:$0xf0]  ;;  %v5364_v38 = vor.u32 %v4432_v15, %v3608_v14  ;;  %s5609_s30 = scalar_lea.vmem [#allocation2], %s4487_s29 }
  0xc9   : > { %6640 = vst [vmem:[#allocation30_spill] sm:$0xff] %v5350_v33  ;;  %584 = vmatpush.bf16.msra.mxu0 %v5338_v29  ;;  %v3584_v39 = vld [vmem:[%s5251_s24 + $0x20] sm:$0xf]  ;;  %v4427_v41 = vld [vmem:[%s5251_s24 + $0x2c] sm:$0xf0]  ;;  %v5370_v43 = vor.u32 %v4430_v17, %v3610_v23  ;;  %s411_s9 = ssub.s32 1, %s6812_s28 }
  0xca   : > { %6641 = vst [vmem:[#allocation31_spill] sm:$0xff] %v5358_v34  ;;  %597 = vmatpush.bf16.msra.mxu1 %v5342_v30  ;;  %610 = vmatpush.bf16.msra.mxu2 %v5344_v31  ;;  %v4425_v42 = vld [vmem:[%s5251_s24 + $0x24] sm:$0xf]  ;;  %v3586_v46 = vld [vmem:[%s5251_s24 + $0x30] sm:$0xf0]  ;;  %v5378_v52 = vor.u32 %v4427_v41, %v3584_v39  ;;  %s4489_s21 = sshll.u32 %s411_s9, 8 }
  0xcb   : > { %6642 = vst [vmem:[#allocation32_spill] sm:$0xff] %v5362_v37  ;;  %623 = vmatpush.bf16.msra.mxu3 %v5350_v33  ;;  %v3592_v47 = vld [vmem:[%s5251_s24 + $0x28] sm:$0xf]  ;;  %v4428_v48 = vld [vmem:[%s5251_s24 + $0x34] sm:$0xf0]  ;;  %v5383_v55 = vor.u32 %v4425_v42, %v3586_v46  ;;  %s5710_s22 = scalar_lea.vmem [#allocation2], %s4489_s21 }
  0xcc   : > { %6643 = vst [vmem:[#allocation33_spill] sm:$0xff] %v5364_v38  ;;  %v4426_v50 = vld [vmem:[%s5251_s24 + $0x2c] sm:$0xf]  ;;  %v3594_v51 = vld [vmem:[%s5251_s24 + $0x38] sm:$0xf0]  ;;  %v5385_v56 = vor.u32 %v4428_v48, %v3592_v47  ;;  %v5041_v48 = vmov 0  }
  0xcd   : > { %6644 = vst [vmem:[#allocation34_spill] sm:$0xff] %v5370_v43  ;;  %585 = vmatpush.bf16.msra.mxu0 %v5358_v34  ;;  %v3568_v54 = vld [vmem:[%s5251_s24] sm:$0xf]  ;;  %v4423_v58 = vld [vmem:[%s5251_s24 + $0xc] sm:$0xf0]  ;;  %v5391_v63 = vor.u32 %v4426_v50, %v3594_v51  ;;  %s324_s0 = sadd.s32 1, %s5026_s0  }
  0xce   : > { %6645 = vst [vmem:[#allocation35_spill] sm:$0xff] %v5378_v52  ;;  %598 = vmatpush.bf16.msra.mxu1 %v5362_v37  ;;  %611 = vmatpush.bf16.msra.mxu2 %v5364_v38  ;;  %v4421_v59 = vld [vmem:[%s5251_s24 + $0x4] sm:$0xf]  ;;  %v3570_v60 = vld [vmem:[%s5251_s24 + $0x10] sm:$0xf0]  ;;  %v5404_v8 = vor.u32 %v4423_v58, %v3568_v54  ;;  %p321_p2 = scmp.ge.s32.totalorder %s324_s0, 11  }
  0xcf   : > { %6646 = vst [vmem:[#allocation36_spill] sm:$0xff] %v5383_v55  ;;  %624 = vmatpush.bf16.msra.mxu3 %v5370_v43  ;;  %v3576_v1 = vld [vmem:[%s5251_s24 + $0x8] sm:$0xf]  ;;  %v4424_v2 = vld [vmem:[%s5251_s24 + $0x14] sm:$0xf0]  ;;  %v5410_v21 = vor.u32 %v4421_v59, %v3570_v60 }
  0xd0   : > { %6647 = vst [vmem:[#allocation37_spill] sm:$0xff] %v5385_v56  ;;  %v4422_v4 = vld [vmem:[%s5251_s24 + $0xc] sm:$0xf]  ;;  %v3578_v5 = vld [vmem:[%s5251_s24 + $0x18] sm:$0xf0]  ;;  %v5412_v24 = vor.u32 %v4424_v2, %v3576_v1 }
  0xd1   : > { %6648 = vst [vmem:[#allocation38_spill] sm:$0xff] %v5391_v63  ;;  %v3808_v6 = vld [vmem:[%s5399_s26 + $0xe0] sm:$0xf]  ;;  %v4484_v7 = vld [vmem:[%s5399_s26 + $0xec] sm:$0xf0]  ;;  %586 = vmatpush.bf16.msra.mxu0 %v5378_v52  ;;  %v5415_v25 = vor.u32 %v4422_v4, %v3578_v5 }
  0xd2   : > { %6649 = vst [vmem:[#allocation39_spill] sm:$0xff] %v5404_v8  ;;  %v4482_v19 = vld [vmem:[%s5399_s26 + $0xe4] sm:$0xf]  ;;  %v3810_v20 = vld [vmem:[%s5399_s26 + $0xf0] sm:$0xf0]  ;;  %599 = vmatpush.bf16.msra.mxu1 %v5383_v55  ;;  %612 = vmatpush.bf16.msra.mxu2 %v5385_v56  ;;  %v5417_v26 = vor.u32 %v4484_v7, %v3808_v6 }
  0xd3   : > { %6650 = vst [vmem:[#allocation40_spill] sm:$0xff] %v5410_v21  ;;  %625 = vmatpush.bf16.msra.mxu3 %v5391_v63  ;;  %v3816_v27 = vld [vmem:[%s5399_s26 + $0xe8] sm:$0xf]  ;;  %v4485_v28 = vld [vmem:[%s5399_s26 + $0xf4] sm:$0xf0]  ;;  %v5422_v11 = vor.u32 %v4482_v19, %v3810_v20 }
  0xd4   : > { %6651 = vst [vmem:[#allocation41_spill] sm:$0xff] %v5412_v24  ;;  %v4483_v32 = vld [vmem:[%s5399_s26 + $0xec] sm:$0xf]  ;;  %v3818_v12 = vld [vmem:[%s5399_s26 + $0xf8] sm:$0xf0]  ;;  %v5432_v23 = vor.u32 %v4485_v28, %v3816_v27 }
  0xd5   : > { %6652 = vst [vmem:[#allocation42_spill] sm:$0xff] %v5415_v25  ;;  %v3792_v13 = vld [vmem:[%s5399_s26 + $0xc0] sm:$0xf]  ;;  %v4480_v14 = vld [vmem:[%s5399_s26 + $0xcc] sm:$0xf0]  ;;  %587 = vmatpush.bf16.msra.mxu0 %v5404_v8  ;;  %v5436_v39 = vor.u32 %v4483_v32, %v3818_v12 }
  0xd6   : > { %v4478_v15 = vld [vmem:[%s5399_s26 + $0xc4] sm:$0xf]  ;;  %v3794_v17 = vld [vmem:[%s5399_s26 + $0xd0] sm:$0xf0]  ;;  %600 = vmatpush.bf16.msra.mxu1 %v5410_v21  ;;  %613 = vmatpush.bf16.msra.mxu2 %v5412_v24  ;;  %v5438_v41 = vor.u32 %v4480_v14, %v3792_v13  ;;  %v3800_v42 = vld [vmem:[%s5399_s26 + $0xc8] sm:$0xf] }
  0xd7   : > { %626 = vmatpush.bf16.msra.mxu3 %v5415_v25  ;;  %v4481_v46 = vld [vmem:[%s5399_s26 + $0xd4] sm:$0xf0]  ;;  %v4479_v47 = vld [vmem:[%s5399_s26 + $0xcc] sm:$0xf]  ;;  %v5444_v50 = vor.u32 %v4478_v15, %v3794_v17  ;;  %v3802_v51 = vld [vmem:[%s5399_s26 + $0xd8] sm:$0xf0] }
  0xd8   : > { %588 = vmatmul.bf16.vlgmr.msra.gmra.mxu0 %v5041_v48  ;;  %v3776_v54 = vld [vmem:[%s5399_s26 + $0xa0] sm:$0xf]  ;;  %v4476_v58 = vld [vmem:[%s5399_s26 + $0xac] sm:$0xf0]  ;;  %v4474_v59 = vld [vmem:[%s5399_s26 + $0xa4] sm:$0xf]  ;;  %v5452_v1 = vor.u32 %v4481_v46, %v3800_v42  ;;  %v5456_v2 = vor.u32 %v4479_v47, %v3802_v51 }
  0xd9   : > { %820 = vmatpush.bf16.msrb.mxu0 %v5417_v26  ;;  %601 = vmatmul.bf16.vlgmr.msra.gmra.mxu1 %v5041_v48  ;;  %v3778_v60 = vld [vmem:[%s5399_s26 + $0xb0] sm:$0xf0]  ;;  %v5458_v4 = vor.u32 %v4476_v58, %v3776_v54  ;;  %v3784_v5 = vld [vmem:[%s5399_s26 + $0xa8] sm:$0xf]  ;;  %v4477_v6 = vld [vmem:[%s5399_s26 + $0xb4] sm:$0xf0] }
  0xda   : > { %833 = vmatpush.bf16.msrb.mxu1 %v5422_v11  ;;  %614 = vmatmul.bf16.vlgmr.msra.gmra.mxu2 %v5041_v48  ;;  %v4475_v7 = vld [vmem:[%s5399_s26 + $0xac] sm:$0xf]  ;;  %v5464_v19 = vor.u32 %v4474_v59, %v3778_v60  ;;  %v3786_v20 = vld [vmem:[%s5399_s26 + $0xb8] sm:$0xf0]  ;;  %v3760_v27 = vld [vmem:[%s5399_s26 + $0x80] sm:$0xf]  ;;  %v5472_v13 = vor.u32 %v4477_v6, %v3784_v5 }
  0xdb   : > { %627 = vmatmul.bf16.vlgmr.msra.gmra.mxu3 %v5041_v48  ;;  %846 = vmatpush.bf16.msrb.mxu2 %v5432_v23  ;;  %v4472_v28 = vld [vmem:[%s5399_s26 + $0x8c] sm:$0xf0]  ;;  %v4470_v32 = vld [vmem:[%s5399_s26 + $0x84] sm:$0xf]  ;;  %v3762_v12 = vld [vmem:[%s5399_s26 + $0x90] sm:$0xf0]  ;;  %v5476_v14 = vor.u32 %v4475_v7, %v3786_v20 }
  0xdc   : > { %859 = vmatpush.bf16.msrb.mxu3 %v5436_v39  ;;  %v5478_v15 = vor.u32 %v4472_v28, %v3760_v27  ;;  %v3768_v17 = vld [vmem:[%s5399_s26 + $0x88] sm:$0xf]  ;;  %v4473_v42 = vld [vmem:[%s5399_s26 + $0x94] sm:$0xf0]  ;;  %v5483_v46 = vor.u32 %v4470_v32, %v3762_v12  ;;  %v4471_v47 = vld [vmem:[%s5399_s26 + $0x8c] sm:$0xf] }
  0xdd   : > { %821 = vmatpush.bf16.msrb.mxu0 %v5438_v41  ;;  %v3770_v48 = vld [vmem:[%s5399_s26 + $0x98] sm:$0xf0]  ;;  %v5488_v51 = vor.u32 %v4473_v42, %v3768_v17  ;;  %v3744_v58 = vld [vmem:[%s5399_s26 + $0x60] sm:$0xf]  ;;  %v4468_v59 = vld [vmem:[%s5399_s26 + $0x6c] sm:$0xf0] }
  0xde   : > { %834 = vmatpush.bf16.msrb.mxu1 %v5444_v50  ;;  %v5492_v54 = vor.u32 %v4471_v47, %v3770_v48  ;;  %v5503_v60 = vor.u32 %v4468_v59, %v3744_v58  ;;  %v4466_v5 = vld [vmem:[%s5399_s26 + $0x64] sm:$0xf]  ;;  %v3746_v6 = vld [vmem:[%s5399_s26 + $0x70] sm:$0xf0]  ;;  %v3752_v7 = vld [vmem:[%s5399_s26 + $0x68] sm:$0xf] }
  0xdf   : > { %847 = vmatpush.bf16.msrb.mxu2 %v5452_v1  ;;  %v5508_v20 = vor.u32 %v4466_v5, %v3746_v6  ;;  %v4469_v27 = vld [vmem:[%s5399_s26 + $0x74] sm:$0xf0]  ;;  %v4467_v28 = vld [vmem:[%s5399_s26 + $0x6c] sm:$0xf]  ;;  %v3754_v32 = vld [vmem:[%s5399_s26 + $0x78] sm:$0xf0] }
  0xe0   : > { %860 = vmatpush.bf16.msrb.mxu3 %v5456_v2  ;;  %v5515_v12 = vor.u32 %v4469_v27, %v3752_v7  ;;  %v5517_v17 = vor.u32 %v4467_v28, %v3754_v32  ;;  %v3728_v42 = vld [vmem:[%s5399_s26 + $0x40] sm:$0xf]  ;;  %v4464_v47 = vld [vmem:[%s5399_s26 + $0x4c] sm:$0xf0]  ;;  %v4462_v48 = vld [vmem:[%s5399_s26 + $0x44] sm:$0xf] }
  0xe1   : > { %822 = vmatpush.bf16.msrb.mxu0 %v5458_v4  ;;  %v5525_v58 = vor.u32 %v4464_v47, %v3728_v42  ;;  %v3730_v59 = vld [vmem:[%s5399_s26 + $0x50] sm:$0xf0]  ;;  %v3736_v5 = vld [vmem:[%s5399_s26 + $0x48] sm:$0xf]  ;;  %v4465_v6 = vld [vmem:[%s5399_s26 + $0x54] sm:$0xf0] }
  0xe2   : > { %835 = vmatpush.bf16.msrb.mxu1 %v5464_v19  ;;  %6653 = vst [vmem:[#allocation43_spill] sm:$0xff] %v5515_v12  ;;  %v5531_v7 = vor.u32 %v4462_v48, %v3730_v59  ;;  %v5533_v27 = vor.u32 %v4465_v6, %v3736_v5  ;;  %v4463_v28 = vld [vmem:[%s5399_s26 + $0x4c] sm:$0xf]  ;;  %v3738_v32 = vld [vmem:[%s5399_s26 + $0x58] sm:$0xf0] }
  0xe3   : > { %848 = vmatpush.bf16.msrb.mxu2 %v5472_v13  ;;  %6654 = vst [vmem:[#allocation44_spill] sm:$0xff] %v5517_v17  ;;  %v5540_v42 = vor.u32 %v4463_v28, %v3738_v32  ;;  %v3712_v47 = vld [vmem:[%s5399_s26 + $0x20] sm:$0xf]  ;;  %v4460_v48 = vld [vmem:[%s5399_s26 + $0x2c] sm:$0xf0] }
  0xe4   : > { %861 = vmatpush.bf16.msrb.mxu3 %v5476_v14  ;;  %6655 = vst [vmem:[#allocation45_spill] sm:$0xff] %v5525_v58  ;;  %v4458_v59 = vld [vmem:[%s5399_s26 + $0x24] sm:$0xf]  ;;  %v5548_v5 = vor.u32 %v4460_v48, %v3712_v47  ;;  %v3714_v6 = vld [vmem:[%s5399_s26 + $0x30] sm:$0xf0] }
  0xe5   : > { %823 = vmatpush.bf16.msrb.mxu0 %v5478_v15  ;;  %6656 = vst [vmem:[#allocation46_spill] sm:$0xff] %v5531_v7  ;;  %v3720_v0 = vld [vmem:[%s5399_s26 + $0x28] sm:$0xf]  ;;  %v5559_v28 = vor.u32 %v4458_v59, %v3714_v6  ;;  %v3696_v48 = vld [vmem:[%s5399_s26] sm:$0xf] }
  0xe6   : > { %836 = vmatpush.bf16.msrb.mxu1 %v5483_v46  ;;  %6657 = vst [vmem:[#allocation47_spill] sm:$0xff] %v5533_v27  ;;  %v3704_v59 = vld [vmem:[%s5399_s26 + $0x8] sm:$0xf]  ;;  %v4457_v6 = vld [vmem:[%s5399_s26 + $0x14] sm:$0xf0] }
  0xe7   : > { %849 = vmatpush.bf16.msrb.mxu2 %v5488_v51  ;;  %6658 = vst [vmem:[#allocation48_spill] sm:$0xff] %v5540_v42 }
  0xe8   : > { %862 = vmatpush.bf16.msrb.mxu3 %v5492_v54  ;;  %6659 = vst [vmem:[#allocation49_spill] sm:$0xff] %v5548_v5 }
  0xe9   : > { %824 = vmatpush.bf16.msrb.mxu0 %v5503_v60  ;;  %6660 = vst [vmem:[#allocation50_spill] sm:$0xff] %v5559_v28 }
  0xea   : > { %837 = vmatpush.bf16.msrb.mxu1 %v5508_v20 }
  0xeb   : > { %850 = vmatpush.bf16.msrb.mxu2 %v5515_v12 }
  0xec   : > { %863 = vmatpush.bf16.msrb.mxu3 %v5517_v17  ;;  %v4454_v17 = vld [vmem:[%s5399_s26 + $0x4] sm:$0xf] }
  0xed   : > { %825 = vmatpush.bf16.msrb.mxu0 %v5525_v58  ;;  %v4461_v58 = vld [vmem:[%s5399_s26 + $0x34] sm:$0xf0] }
  0xee   : > { %838 = vmatpush.bf16.msrb.mxu1 %v5531_v7  ;;  %v5561_v32 = vor.u32 %v4461_v58, %v3720_v0  ;;  %v3722_v7 = vld [vmem:[%s5399_s26 + $0x38] sm:$0xf0]  ;;  %v3698_v58 = vld [vmem:[%s5399_s26 + $0x10] sm:$0xf0] }
  0xef   : > { %851 = vmatpush.bf16.msrb.mxu2 %v5533_v27  ;;  %v4459_v27 = vld [vmem:[%s5399_s26 + $0x2c] sm:$0xf] }
  0xf0   : > { %864 = vmatpush.bf16.msrb.mxu3 %v5540_v42  ;;  %v5566_v47 = vor.u32 %v4459_v27, %v3722_v7  ;;  %v4456_v42 = vld [vmem:[%s5399_s26 + $0xc] sm:$0xf0]  ;;  %v5582_v7 = vor.u32 %v4457_v6, %v3704_v59  ;;  %v4455_v27 = vld [vmem:[%s5399_s26 + $0xc] sm:$0xf] }
  0xf1   : > { %826 = vmatpush.bf16.msrb.mxu0 %v5548_v5  ;;  %v5574_v0 = vor.u32 %v4456_v42, %v3696_v48  ;;  %v5580_v5 = vor.u32 %v4454_v17, %v3698_v58  ;;  %v416_v17 = vld [vmem:[%s5609_s30] sm:$0xff]  ;;  %v417_v42 = vld [vmem:[%s5609_s30 + $0x8] sm:$0xff] }
  0xf2   : > { %839 = vmatpush.bf16.msrb.mxu1 %v5559_v28  ;;  %v3706_v28 = vld [vmem:[%s5399_s26 + $0x18] sm:$0xf0] }
  0xf3   : > { %852 = vmatpush.bf16.msrb.mxu2 %v5561_v32  ;;  %v5588_v12 = vor.u32 %v4455_v27, %v3706_v28 }
  0xf4   : > { %865 = vmatpush.bf16.msrb.mxu3 %v5566_v47 }
  0xf5   : > { %827 = vmatpush.bf16.msrb.mxu0 %v5574_v0 }
  0xf6   : > { %840 = vmatpush.bf16.msrb.mxu1 %v5580_v5 }
  0xf7   : > { %853 = vmatpush.bf16.msrb.mxu2 %v5582_v7 }
  0xf8   : > { %866 = vmatpush.bf16.msrb.mxu3 %v5588_v12 }
  0xf9   : > { %887 = vmatpush.bf16.msra.mxu0 %v5256_v16 }
  0xfa   : > { %900 = vmatpush.bf16.msra.mxu1 %v5261_v35 }
  0xfb   : > { %913 = vmatpush.bf16.msra.mxu2 %v5263_v36 }
  0xfc   : > { %926 = vmatpush.bf16.msra.mxu3 %v5269_v40 }
  0xfd   : > { %888 = vmatpush.bf16.msra.mxu0 %v5276_v44 }
  0xfe   : > { %901 = vmatpush.bf16.msra.mxu1 %v5278_v45 }
  0xff   : > { %914 = vmatpush.bf16.msra.mxu2 %v5284_v49 }
 0x100   : > { %927 = vmatpush.bf16.msra.mxu3 %v5289_v53 }
 0x101   : > { %889 = vmatpush.bf16.msra.mxu0 %v5295_v57 }
 0x102   : > { %902 = vmatpush.bf16.msra.mxu1 %v5302_v61 }
 0x103   : > { %915 = vmatpush.bf16.msra.mxu2 %v5304_v62 }
 0x104   : > { %928 = vmatpush.bf16.msra.mxu3 %v5310_v3 }
 0x105   : > { %890 = vmatpush.bf16.msra.mxu0 %v5318_v9  ;;  %v418_v9 = vld [vmem:[%s5609_s30 + $0x10] sm:$0xff] }
 0x106   : > { %903 = vmatpush.bf16.msra.mxu1 %v5322_v10  ;;  %v419_v10 = vld [vmem:[%s5609_s30 + $0x18] sm:$0xff] }
 0x107   : > { %916 = vmatpush.bf16.msra.mxu2 %v5324_v18 }
 0x108   : > { %929 = vmatpush.bf16.msra.mxu3 %v5330_v22 }
 0x109   : > { %891 = vmatpush.bf16.msra.mxu0 %v5338_v29 }
 0x10a   : > { %904 = vmatpush.bf16.msra.mxu1 %v5342_v30 }
 0x10b   : > { %917 = vmatpush.bf16.msra.mxu2 %v5344_v31 }
 0x10c   : > { %930 = vmatpush.bf16.msra.mxu3 %v5350_v33 }
 0x10d   : > { %892 = vmatpush.bf16.msra.mxu0 %v5358_v34 }
 0x10e   : > { %905 = vmatpush.bf16.msra.mxu1 %v5362_v37 }
 0x10f   : > { %918 = vmatpush.bf16.msra.mxu2 %v5364_v38 }
 0x110   : > { %931 = vmatpush.bf16.msra.mxu3 %v5370_v43 }
 0x111   : > { %893 = vmatpush.bf16.msra.mxu0 %v5378_v52 }
 0x112   : > { %906 = vmatpush.bf16.msra.mxu1 %v5383_v55 }
 0x113   : > { %919 = vmatpush.bf16.msra.mxu2 %v5385_v56 }
 0x114   : > { %932 = vmatpush.bf16.msra.mxu3 %v5391_v63 }
 0x115   : > { %894 = vmatpush.bf16.msra.mxu0 %v5404_v8 }
 0x116   : > { %907 = vmatpush.bf16.msra.mxu1 %v5410_v21 }
 0x117   : > { %920 = vmatpush.bf16.msra.mxu2 %v5412_v24 }
 0x118   : > { %933 = vmatpush.bf16.msra.mxu3 %v5415_v25 }
 0x155   : > { %v589_v28 = vpop.f32.mrf.mxu0 }
 0x156   : > { %v590_v48 = vadd.f32 %v589_v28, %v416_v17  ;;  %v602_v58 = vpop.f32.mrf.mxu1 }
 0x157   : > { %v603_v59 = vadd.f32 %v602_v58, %v417_v42 }
 0x158   : > { %v632_v6 = vmul.f32 0.5, %v590_v48 }
 0x159   : > { %v636_v27 = vmul.f32 0.5, %v603_v59 }
 0x15a   : > { %4657 = vtanh.f32 %v632_v6 }
 0x15b   : > { %4659 = vtanh.f32 %v636_v27 }
 0x15d   : > { %v615_v17 = vpop.f32.mrf.mxu2  ;;  %v591_v42 = vpop.f32.mrf.mxu0 }
 0x15e   : > { %v616_v28 = vadd.f32 %v615_v17, %v418_v9  ;;  %v628_v22 = vpop.f32.mrf.mxu3  ;;  %v604_v58 = vpop.f32.mrf.mxu1 }
 0x15f   : > { %v629_v48 = vadd.f32 %v628_v22, %v419_v10 }
 0x160   : > { %4661 = vtanh.f32 %v616_v28  ;;  %v4658_v59 = vpop.eup %4657 }
 0x161   : > { %v641_v6 = vmul.f32 0.5, %v629_v48  ;;  %v4660_v27 = vpop.eup %4659  ;;  %v634_v33 = vmul.f32 0.5, %v4658_v59 }
 0x162   : > { %v638_v9 = vmul.f32 0.5, %v4660_v27 }
 0x163   : > { %4663 = vtanh.f32 %v641_v6  ;;  %v635_v17 = vadd.f32 0.5, %v634_v33 }
 0x164   : > { %v639_v10 = vadd.f32 0.5, %v638_v9 }
 0x165   : > { %v617_v22 = vpop.f32.mrf.mxu2 }
 0x166   : > { %v4662_v28 = vpop.eup %4661  ;;  %v630_v42 = vpop.f32.mrf.mxu3  ;;  %v645_v48 = vmul.f32 0.0, %v639_v10  ;;  %v6663_v10 = vld [vmem:[#allocation45_spill] sm:$0xff] }
 0x167   : > { %v646_v58 = vmul.f32 %v4662_v28, %v635_v17  ;;  %v6662_v17 = vld [vmem:[#allocation44_spill] sm:$0xff]  ;;  %v6664_v28 = vld [vmem:[#allocation46_spill] sm:$0xff]  ;;  %v6665_v42 = vld [vmem:[#allocation47_spill] sm:$0xff] }
 0x169   : > { %v4664_v59 = vpop.eup %4663  ;;  %v5635_v27 = vadd.f32 %v646_v58, %v645_v48  ;;  %v6666_v48 = vld [vmem:[#allocation48_spill] sm:$0xff]  ;;  %v6667_v58 = vld [vmem:[#allocation49_spill] sm:$0xff] }
 0x16a   : > { %v643_v6 = vmul.f32 0.5, %v4664_v59  ;;  %v6668_v59 = vld [vmem:[#allocation50_spill] sm:$0xff] }
 0x16b   : > { %4665 = vtanh.f32 %v5635_v27 }
 0x16c   : > { %v644_v33 = vadd.f32 0.5, %v643_v6  ;;  %v6669_v6 = vld [vmem:[#allocation23_spill] sm:$0xff] }
 0x171   : > { %v4666_v8 = vpop.eup %4665 }
 0x172   : > { %v649_v9 = vmul.f32 %v4666_v8, %v644_v33  ;;  %v6661_v8 = vld [vmem:[#allocation43_spill] sm:$0xff]  ;;  %v6670_v33 = vld [vmem:[#allocation24_spill] sm:$0xff] }
 0x174   : > { %v650_v22 = vpack.c.bf16 %v649_v9, %v649_v9  ;;  %v6671_v9 = vld [vmem:[#allocation26_spill] sm:$0xff] }
 0x176   : > { %828 = vmatmul.bf16.vlgmr.msrb.gmra.mxu0 %v650_v22  ;;  %841 = vmatmul.bf16.vlgmr.msrb.gmra.mxu1 %v650_v22 }
 0x177   : > { %854 = vmatmul.bf16.vlgmr.msrb.gmra.mxu2 %v650_v22  ;;  %867 = vmatmul.bf16.vlgmr.msrb.gmra.mxu3 %v650_v22 }
 0x178   : > { %958 = vmatpush.bf16.msrb.mxu0 %v5417_v26  ;;  %971 = vmatpush.bf16.msrb.mxu1 %v5422_v11 }
 0x179   : > { %984 = vmatpush.bf16.msrb.mxu2 %v5432_v23  ;;  %997 = vmatpush.bf16.msrb.mxu3 %v5436_v39 }
 0x17c   : > { %959 = vmatpush.bf16.msrb.mxu0 %v5438_v41  ;;  %972 = vmatpush.bf16.msrb.mxu1 %v5444_v50 }
 0x17d   : > { %985 = vmatpush.bf16.msrb.mxu2 %v5452_v1  ;;  %998 = vmatpush.bf16.msrb.mxu3 %v5456_v2 }
 0x180   : > { %960 = vmatpush.bf16.msrb.mxu0 %v5458_v4  ;;  %973 = vmatpush.bf16.msrb.mxu1 %v5464_v19 }
 0x181   : > { %986 = vmatpush.bf16.msrb.mxu2 %v5472_v13  ;;  %999 = vmatpush.bf16.msrb.mxu3 %v5476_v14 }
 0x184   : > { %961 = vmatpush.bf16.msrb.mxu0 %v5478_v15  ;;  %974 = vmatpush.bf16.msrb.mxu1 %v5483_v46 }
 0x185   : > { %987 = vmatpush.bf16.msrb.mxu2 %v5488_v51  ;;  %1000 = vmatpush.bf16.msrb.mxu3 %v5492_v54 }
 0x186   : > { %895 = vmatmul.bf16.vlgmr.msra.gmra.mxu0 %v650_v22  ;;  %908 = vmatmul.bf16.vlgmr.msra.gmra.mxu1 %v650_v22 }
 0x187   : > { %921 = vmatmul.bf16.vlgmr.msra.gmra.mxu2 %v650_v22  ;;  %934 = vmatmul.bf16.vlgmr.msra.gmra.mxu3 %v650_v22  ;;  %v6672_v22 = vld [vmem:[#allocation30_spill] sm:$0xff] }
 0x188   : > { %962 = vmatpush.bf16.msrb.mxu0 %v5503_v60  ;;  %975 = vmatpush.bf16.msrb.mxu1 %v5508_v20 }
 0x189   : > { %988 = vmatpush.bf16.msrb.mxu2 %v6661_v8  ;;  %1001 = vmatpush.bf16.msrb.mxu3 %v6662_v17 }
 0x18c   : > { %963 = vmatpush.bf16.msrb.mxu0 %v6663_v10  ;;  %976 = vmatpush.bf16.msrb.mxu1 %v6664_v28 }
 0x18d   : > { %989 = vmatpush.bf16.msrb.mxu2 %v6665_v42  ;;  %1002 = vmatpush.bf16.msrb.mxu3 %v6666_v48 }
 0x190   : > { %964 = vmatpush.bf16.msrb.mxu0 %v6667_v58  ;;  %977 = vmatpush.bf16.msrb.mxu1 %v6668_v59 }
 0x191   : > { %990 = vmatpush.bf16.msrb.mxu2 %v5561_v32  ;;  %1003 = vmatpush.bf16.msrb.mxu3 %v5566_v47 }
 0x194   : > { %965 = vmatpush.bf16.msrb.mxu0 %v5574_v0  ;;  %978 = vmatpush.bf16.msrb.mxu1 %v5580_v5 }
 0x195   : > { %991 = vmatpush.bf16.msrb.mxu2 %v5582_v7  ;;  %1004 = vmatpush.bf16.msrb.mxu3 %v5588_v12 }
 0x198   : > { %1026 = vmatpush.bf16.msra.mxu0 %v5256_v16  ;;  %1039 = vmatpush.bf16.msra.mxu1 %v5261_v35 }
 0x199   : > { %1052 = vmatpush.bf16.msra.mxu2 %v5263_v36  ;;  %1065 = vmatpush.bf16.msra.mxu3 %v5269_v40 }
 0x19c   : > { %1027 = vmatpush.bf16.msra.mxu0 %v5276_v44  ;;  %1040 = vmatpush.bf16.msra.mxu1 %v5278_v45 }
 0x19d   : > { %1053 = vmatpush.bf16.msra.mxu2 %v5284_v49  ;;  %1066 = vmatpush.bf16.msra.mxu3 %v5289_v53 }
 0x1a0   : > { %1028 = vmatpush.bf16.msra.mxu0 %v5295_v57  ;;  %1041 = vmatpush.bf16.msra.mxu1 %v5302_v61 }
 0x1a1   : > { %1054 = vmatpush.bf16.msra.mxu2 %v5304_v62  ;;  %1067 = vmatpush.bf16.msra.mxu3 %v5310_v3 }
 0x1a4   : > { %1029 = vmatpush.bf16.msra.mxu0 %v6669_v6  ;;  %1042 = vmatpush.bf16.msra.mxu1 %v6670_v33 }
 0x1a5   : > { %1055 = vmatpush.bf16.msra.mxu2 %v5324_v18  ;;  %1068 = vmatpush.bf16.msra.mxu3 %v6671_v9 }
 0x1a8   : > { %1030 = vmatpush.bf16.msra.mxu0 %v5338_v29  ;;  %1043 = vmatpush.bf16.msra.mxu1 %v5342_v30 }
 0x1a9   : > { %1056 = vmatpush.bf16.msra.mxu2 %v5344_v31  ;;  %1069 = vmatpush.bf16.msra.mxu3 %v6672_v22  ;;  %v6673_v31 = vld [vmem:[#allocation39_spill] sm:$0xff] }
 0x1ac   : > { %1031 = vmatpush.bf16.msra.mxu0 %v5358_v34  ;;  %1044 = vmatpush.bf16.msra.mxu1 %v5362_v37 }
 0x1ad   : > { %1057 = vmatpush.bf16.msra.mxu2 %v5364_v38  ;;  %1070 = vmatpush.bf16.msra.mxu3 %v5370_v43  ;;  %v3562_v38 = vld [vmem:[%s3487_s8 + $0x4] sm:$0xf] }
 0x1ae   : > { %v5704_v43 = vperm.slane %v3562_v38, 0 }
 0x1b0   : > { %1032 = vmatpush.bf16.msra.mxu0 %v5378_v52  ;;  %1045 = vmatpush.bf16.msra.mxu1 %v5383_v55  ;;  %6674 = vst [vmem:[#allocation43_spill] sm:$0xff] %v5704_v43  ;;  %v5706_v55 = vperm.slane %v3562_v38, 1 }
 0x1b1   : > { %1058 = vmatpush.bf16.msra.mxu2 %v5385_v56  ;;  %1071 = vmatpush.bf16.msra.mxu3 %v5391_v63 }
 0x1b2   : > { %6675 = vst [vmem:[#allocation44_spill] sm:$0xff] %v5706_v55 }
 0x1b4   : > { %1033 = vmatpush.bf16.msra.mxu0 %v6673_v31  ;;  %1046 = vmatpush.bf16.msra.mxu1 %v5410_v21 }
 0x1b5   : > { %1059 = vmatpush.bf16.msra.mxu2 %v5412_v24  ;;  %1072 = vmatpush.bf16.msra.mxu3 %v5415_v25  ;;  %v5714_v25 = vperm.slane %v3562_v38, 2  ;;  %v5716_v24 = vperm.slane %v3562_v38, 3 }
 0x1b7   : > { %6676 = vst [vmem:[#allocation45_spill] sm:$0xff] %v5714_v25 }
 0x1b8   : > { %6677 = vst [vmem:[#allocation46_spill] sm:$0xff] %v5716_v24 }
 0x1f3   : > { %v829_v56 = vpop.f32.mrf.mxu0  ;;  %v842_v52 = vpop.f32.mrf.mxu1 }
 0x1f4   : > { %v830_v31 = vadd.f32 %v829_v56, %v5704_v43  ;;  %v843_v21 = vadd.f32 %v842_v52, %v5706_v55 }
 0x1f6   : > { %875 = vst [vmem:[%s5710_s22] sm:$0xff] %v830_v31 }
 0x1f7   : > { %876 = vst [vmem:[%s5710_s22 + $0x8] sm:$0xff] %v843_v21 }
 0x1fa   : > { %v855_v63 = vpop.f32.mrf.mxu2  ;;  %v868_v37 = vpop.f32.mrf.mxu3 }
 0x1fb   : > { %v856_v34 = vadd.f32 %v855_v63, %v5714_v25  ;;  %v869_v56 = vadd.f32 %v868_v37, %v5716_v24  ;;  %v831_v52 = vpop.f32.mrf.mxu0  ;;  %v844_v55 = vpop.f32.mrf.mxu1 }
 0x1fd   : > { %877 = vst [vmem:[%s5710_s22 + $0x10] sm:$0xff] %v856_v34 }
 0x1fe   : > { %878 = vst [vmem:[%s5710_s22 + $0x18] sm:$0xff] %v869_v56 }
 0x202   : > { %v857_v31 = vpop.f32.mrf.mxu2  ;;  %v870_v21 = vpop.f32.mrf.mxu3 }
 0x203   : > { %v896_v30 = vpop.f32.mrf.mxu0  ;;  %v909_v29 = vpop.f32.mrf.mxu1 }
 0x205   : > { %v3826_v43 = vld [vmem:[%s5609_s30 + $0x20] sm:$0xff]  ;;  %v3827_v22 = vld [vmem:[%s5609_s30 + $0x28] sm:$0xff]  ;;  %v3828_v63 = vld [vmem:[%s5609_s30 + $0x30] sm:$0xff] }
 0x206   : > { %v897_v38 = vadd.f32 %v3826_v43, %v896_v30  ;;  %v910_v9 = vadd.f32 %v3827_v22, %v909_v29  ;;  %v3829_v25 = vld [vmem:[%s5609_s30 + $0x38] sm:$0xff] }
 0x208   : > { %v939_v18 = vmul.f32 0.5, %v897_v38  ;;  %v943_v33 = vmul.f32 0.5, %v910_v9 }
 0x20a   : > { %4667 = vtanh.f32 %v939_v18  ;;  %v922_v37 = vpop.f32.mrf.mxu2  ;;  %v935_v52 = vpop.f32.mrf.mxu3 }
 0x20b   : > { %4669 = vtanh.f32 %v943_v33  ;;  %v923_v24 = vadd.f32 %v3828_v63, %v922_v37  ;;  %v936_v55 = vadd.f32 %v3829_v25, %v935_v52  ;;  %v898_v34 = vpop.f32.mrf.mxu0  ;;  %v911_v56 = vpop.f32.mrf.mxu1 }
 0x20c   : > { %v6682_v34 = vld [vmem:[#allocation25_spill] sm:$0xff]  ;;  %v6683_v56 = vld [vmem:[#allocation26_spill] sm:$0xff] }
 0x20d   : > { %4671 = vtanh.f32 %v923_v24  ;;  %v948_v6 = vmul.f32 0.5, %v936_v55 }
 0x20f   : > { %4673 = vtanh.f32 %v948_v6  ;;  %v6681_v6 = vld [vmem:[#allocation24_spill] sm:$0xff] }
 0x210   : > { %v4668_v31 = vpop.eup %4667 }
 0x211   : > { %v4670_v21 = vpop.eup %4669  ;;  %v941_v3 = vmul.f32 0.5, %v4668_v31  ;;  %v6684_v31 = vld [vmem:[#allocation27_spill] sm:$0xff] }
 0x212   : > { %v945_v62 = vmul.f32 0.5, %v4670_v21  ;;  %v924_v43 = vpop.f32.mrf.mxu2  ;;  %v937_v18 = vpop.f32.mrf.mxu3  ;;  %v6685_v21 = vld [vmem:[#allocation28_spill] sm:$0xff] }
 0x213   : > { %v942_v29 = vadd.f32 0.5, %v941_v3  ;;  %v4672_v9 = vpop.eup %4671  ;;  %v6679_v3 = vld [vmem:[#allocation22_spill] sm:$0xff]  ;;  %v6688_v43 = vld [vmem:[#allocation31_spill] sm:$0xff]  ;;  %v6689_v18 = vld [vmem:[#allocation32_spill] sm:$0xff] }
 0x214   : > { %v946_v30 = vadd.f32 0.5, %v945_v62  ;;  %v6678_v62 = vld [vmem:[#allocation21_spill] sm:$0xff] }
 0x215   : > { %v953_v22 = vmul.f32 %v4672_v9, %v942_v29  ;;  %v4674_v38 = vpop.eup %4673  ;;  %v6686_v29 = vld [vmem:[#allocation29_spill] sm:$0xff] }
 0x216   : > { %v952_v33 = vmul.f32 %v946_v30, %v5635_v27  ;;  %v950_v24 = vmul.f32 0.5, %v4674_v38  ;;  %v6680_v27 = vld [vmem:[#allocation23_spill] sm:$0xff]  ;;  %v6687_v30 = vld [vmem:[#allocation30_spill] sm:$0xff]  ;;  %v6690_v9 = vld [vmem:[#allocation33_spill] sm:$0xff] }
 0x217   : > { %v6693_v38 = vld [vmem:[#allocation36_spill] sm:$0xff] }
 0x218   : > { %v5727_v63 = vadd.f32 %v953_v22, %v952_v33  ;;  %v951_v25 = vadd.f32 0.5, %v950_v24  ;;  %v6691_v33 = vld [vmem:[#allocation34_spill] sm:$0xff]  ;;  %v6692_v22 = vld [vmem:[#allocation35_spill] sm:$0xff]  ;;  %v6694_v24 = vld [vmem:[#allocation37_spill] sm:$0xff] }
 0x21a   : > { %4675 = vtanh.f32 %v5727_v63 }
 0x220   : > { %v4676_v37 = vpop.eup %4675 }
 0x221   : > { %v956_v52 = vmul.f32 %v4676_v37, %v951_v25  ;;  %v6695_v25 = vld [vmem:[#allocation38_spill] sm:$0xff]  ;;  %v6696_v37 = vld [vmem:[#allocation39_spill] sm:$0xff] }
 0x223   : > { %v957_v55 = vpack.c.bf16 %v956_v52, %v956_v52  ;;  %v6697_v52 = vld [vmem:[#allocation40_spill] sm:$0xff] }
 0x225   : > { %966 = vmatmul.bf16.vlgmr.msrb.gmra.mxu0 %v957_v55  ;;  %979 = vmatmul.bf16.vlgmr.msrb.gmra.mxu1 %v957_v55 }
 0x226   : > { %992 = vmatmul.bf16.vlgmr.msrb.gmra.mxu2 %v957_v55  ;;  %1005 = vmatmul.bf16.vlgmr.msrb.gmra.mxu3 %v957_v55 }
 0x227   : > { %1097 = vmatpush.bf16.msrb.mxu0 %v5417_v26  ;;  %1110 = vmatpush.bf16.msrb.mxu1 %v5422_v11 }
 0x228   : > { %1123 = vmatpush.bf16.msrb.mxu2 %v5432_v23  ;;  %1136 = vmatpush.bf16.msrb.mxu3 %v5436_v39 }
 0x22b   : > { %1098 = vmatpush.bf16.msrb.mxu0 %v5438_v41  ;;  %1111 = vmatpush.bf16.msrb.mxu1 %v5444_v50 }
 0x22c   : > { %1124 = vmatpush.bf16.msrb.mxu2 %v5452_v1  ;;  %1137 = vmatpush.bf16.msrb.mxu3 %v5456_v2 }
 0x22f   : > { %1099 = vmatpush.bf16.msrb.mxu0 %v5458_v4  ;;  %1112 = vmatpush.bf16.msrb.mxu1 %v5464_v19 }
 0x230   : > { %1125 = vmatpush.bf16.msrb.mxu2 %v5472_v13  ;;  %1138 = vmatpush.bf16.msrb.mxu3 %v5476_v14 }
 0x233   : > { %1100 = vmatpush.bf16.msrb.mxu0 %v5478_v15  ;;  %1113 = vmatpush.bf16.msrb.mxu1 %v5483_v46 }
 0x234   : > { %1126 = vmatpush.bf16.msrb.mxu2 %v5488_v51  ;;  %1139 = vmatpush.bf16.msrb.mxu3 %v5492_v54 }
 0x235   : > { %1034 = vmatmul.bf16.vlgmr.msra.gmra.mxu0 %v957_v55  ;;  %1047 = vmatmul.bf16.vlgmr.msra.gmra.mxu1 %v957_v55 }
 0x236   : > { %1060 = vmatmul.bf16.vlgmr.msra.gmra.mxu2 %v957_v55  ;;  %1073 = vmatmul.bf16.vlgmr.msra.gmra.mxu3 %v957_v55  ;;  %v6698_v55 = vld [vmem:[#allocation41_spill] sm:$0xff] }
 0x237   : > { %1101 = vmatpush.bf16.msrb.mxu0 %v5503_v60  ;;  %1114 = vmatpush.bf16.msrb.mxu1 %v5508_v20 }
 0x238   : > { %1127 = vmatpush.bf16.msrb.mxu2 %v6661_v8  ;;  %1140 = vmatpush.bf16.msrb.mxu3 %v6662_v17 }
 0x23b   : > { %1102 = vmatpush.bf16.msrb.mxu0 %v6663_v10  ;;  %1115 = vmatpush.bf16.msrb.mxu1 %v6664_v28 }
 0x23c   : > { %1128 = vmatpush.bf16.msrb.mxu2 %v6665_v42  ;;  %1141 = vmatpush.bf16.msrb.mxu3 %v6666_v48 }
 0x23f   : > { %1103 = vmatpush.bf16.msrb.mxu0 %v6667_v58  ;;  %1116 = vmatpush.bf16.msrb.mxu1 %v6668_v59 }
 0x240   : > { %1129 = vmatpush.bf16.msrb.mxu2 %v5561_v32  ;;  %1142 = vmatpush.bf16.msrb.mxu3 %v5566_v47 }
 0x243   : > { %1104 = vmatpush.bf16.msrb.mxu0 %v5574_v0  ;;  %1117 = vmatpush.bf16.msrb.mxu1 %v5580_v5 }
 0x244   : > { %1130 = vmatpush.bf16.msrb.mxu2 %v5582_v7  ;;  %1143 = vmatpush.bf16.msrb.mxu3 %v5588_v12 }
 0x247   : > { %1165 = vmatpush.bf16.msra.mxu0 %v5256_v16  ;;  %1178 = vmatpush.bf16.msra.mxu1 %v5261_v35 }
 0x248   : > { %1191 = vmatpush.bf16.msra.mxu2 %v5263_v36  ;;  %1204 = vmatpush.bf16.msra.mxu3 %v5269_v40 }
 0x24b   : > { %1166 = vmatpush.bf16.msra.mxu0 %v5276_v44  ;;  %1179 = vmatpush.bf16.msra.mxu1 %v5278_v45 }
 0x24c   : > { %1192 = vmatpush.bf16.msra.mxu2 %v5284_v49  ;;  %1205 = vmatpush.bf16.msra.mxu3 %v5289_v53 }
 0x24f   : > { %1167 = vmatpush.bf16.msra.mxu0 %v5295_v57  ;;  %1180 = vmatpush.bf16.msra.mxu1 %v5302_v61 }
 0x250   : > { %1193 = vmatpush.bf16.msra.mxu2 %v6678_v62  ;;  %1206 = vmatpush.bf16.msra.mxu3 %v6679_v3 }
 0x253   : > { %1168 = vmatpush.bf16.msra.mxu0 %v6680_v27  ;;  %1181 = vmatpush.bf16.msra.mxu1 %v6681_v6 }
 0x254   : > { %1194 = vmatpush.bf16.msra.mxu2 %v6682_v34  ;;  %1207 = vmatpush.bf16.msra.mxu3 %v6683_v56 }
 0x257   : > { %1169 = vmatpush.bf16.msra.mxu0 %v6684_v31  ;;  %1182 = vmatpush.bf16.msra.mxu1 %v6685_v21 }
 0x258   : > { %1195 = vmatpush.bf16.msra.mxu2 %v6686_v29  ;;  %1208 = vmatpush.bf16.msra.mxu3 %v6687_v30  ;;  %v6702_v30 = vld [vmem:[#allocation45_spill] sm:$0xff] }
 0x25b   : > { %1170 = vmatpush.bf16.msra.mxu0 %v6688_v43  ;;  %1183 = vmatpush.bf16.msra.mxu1 %v6689_v18  ;;  %v6699_v18 = vld [vmem:[#allocation42_spill] sm:$0xff]  ;;  %v6701_v43 = vld [vmem:[#allocation44_spill] sm:$0xff] }
 0x25c   : > { %1196 = vmatpush.bf16.msra.mxu2 %v6690_v9  ;;  %1209 = vmatpush.bf16.msra.mxu3 %v6691_v33  ;;  %v6700_v9 = vld [vmem:[#allocation43_spill] sm:$0xff] }
 0x25f   : > { %1171 = vmatpush.bf16.msra.mxu0 %v6692_v22  ;;  %1184 = vmatpush.bf16.msra.mxu1 %v6693_v38 }
 0x260   : > { %1197 = vmatpush.bf16.msra.mxu2 %v6694_v24  ;;  %1210 = vmatpush.bf16.msra.mxu3 %v6695_v25 }
 0x263   : > { %1172 = vmatpush.bf16.msra.mxu0 %v6696_v37  ;;  %1185 = vmatpush.bf16.msra.mxu1 %v6697_v52  ;;  %v6703_v52 = vld [vmem:[#allocation46_spill] sm:$0xff] }
 0x264   : > { %1198 = vmatpush.bf16.msra.mxu2 %v6698_v55  ;;  %1211 = vmatpush.bf16.msra.mxu3 %v6699_v18 }
 0x2a2   : > { %v967_v33 = vpop.f32.mrf.mxu0  ;;  %v980_v22 = vpop.f32.mrf.mxu1 }
 0x2a3   : > { %v968_v38 = vadd.f32 %v967_v33, %v6700_v9  ;;  %v981_v24 = vadd.f32 %v980_v22, %v6701_v43 }
 0x2a5   : > { %3832 = vst [vmem:[%s5710_s22 + $0x20] sm:$0xff] %v968_v38 }
 0x2a6   : > { %3833 = vst [vmem:[%s5710_s22 + $0x28] sm:$0xff] %v981_v24 }
 0x2a9   : > { %v993_v25 = vpop.f32.mrf.mxu2  ;;  %v1006_v37 = vpop.f32.mrf.mxu3 }
 0x2aa   : > { %v994_v29 = vadd.f32 %v993_v25, %v6702_v30  ;;  %v1007_v21 = vadd.f32 %v1006_v37, %v6703_v52  ;;  %v969_v55 = vpop.f32.mrf.mxu0  ;;  %v982_v31 = vpop.f32.mrf.mxu1 }
 0x2ac   : > { %3834 = vst [vmem:[%s5710_s22 + $0x30] sm:$0xff] %v994_v29 }
 0x2ad   : > { %3835 = vst [vmem:[%s5710_s22 + $0x38] sm:$0xff] %v1007_v21 }
 0x2b1   : > { %v995_v34 = vpop.f32.mrf.mxu2  ;;  %v1008_v33 = vpop.f32.mrf.mxu3 }
 0x2b2   : > { %v1035_v9 = vpop.f32.mrf.mxu0  ;;  %v1048_v22 = vpop.f32.mrf.mxu1 }
 0x2b4   : > { %v3838_v18 = vld [vmem:[%s5609_s30 + $0x40] sm:$0xff]  ;;  %v3839_v56 = vld [vmem:[%s5609_s30 + $0x48] sm:$0xff]  ;;  %v3840_v25 = vld [vmem:[%s5609_s30 + $0x50] sm:$0xff] }
 0x2b5   : > { %v1036_v38 = vadd.f32 %v3838_v18, %v1035_v9  ;;  %v1049_v24 = vadd.f32 %v3839_v56, %v1048_v22  ;;  %v3841_v30 = vld [vmem:[%s5609_s30 + $0x58] sm:$0xff] }
 0x2b7   : > { %v1078_v43 = vmul.f32 0.5, %v1036_v38  ;;  %v1082_v6 = vmul.f32 0.5, %v1049_v24 }
 0x2b9   : > { %4677 = vtanh.f32 %v1078_v43  ;;  %v1061_v37 = vpop.f32.mrf.mxu2  ;;  %v1074_v55 = vpop.f32.mrf.mxu3 }
 0x2ba   : > { %4679 = vtanh.f32 %v1082_v6  ;;  %v1062_v52 = vadd.f32 %v3840_v25, %v1061_v37  ;;  %v1075_v31 = vadd.f32 %v3841_v30, %v1074_v55  ;;  %v1037_v29 = vpop.f32.mrf.mxu0  ;;  %v1050_v21 = vpop.f32.mrf.mxu1 }
 0x2bb   : > { %v6708_v29 = vld [vmem:[#allocation25_spill] sm:$0xff]  ;;  %v6709_v21 = vld [vmem:[#allocation26_spill] sm:$0xff] }
 0x2bc   : > { %4681 = vtanh.f32 %v1062_v52  ;;  %v1087_v27 = vmul.f32 0.5, %v1075_v31 }
 0x2be   : > { %4683 = vtanh.f32 %v1087_v27  ;;  %v6707_v27 = vld [vmem:[#allocation24_spill] sm:$0xff] }
 0x2bf   : > { %v4678_v34 = vpop.eup %4677 }
 0x2c0   : > { %v4680_v33 = vpop.eup %4679  ;;  %v1080_v3 = vmul.f32 0.5, %v4678_v34  ;;  %v6710_v34 = vld [vmem:[#allocation27_spill] sm:$0xff] }
 0x2c1   : > { %v1084_v62 = vmul.f32 0.5, %v4680_v33  ;;  %v1063_v9 = vpop.f32.mrf.mxu2  ;;  %v1076_v43 = vpop.f32.mrf.mxu3  ;;  %v6711_v33 = vld [vmem:[#allocation28_spill] sm:$0xff] }
 0x2c2   : > { %v1081_v56 = vadd.f32 0.5, %v1080_v3  ;;  %v4682_v22 = vpop.eup %4681  ;;  %v6706_v3 = vld [vmem:[#allocation23_spill] sm:$0xff]  ;;  %v6715_v43 = vld [vmem:[#allocation32_spill] sm:$0xff] }
 0x2c3   : > { %v1085_v18 = vadd.f32 0.5, %v1084_v62  ;;  %v6705_v62 = vld [vmem:[#allocation22_spill] sm:$0xff]  ;;  %v6714_v9 = vld [vmem:[#allocation31_spill] sm:$0xff] }
 0x2c4   : > { %v1092_v38 = vmul.f32 %v4682_v22, %v1081_v56  ;;  %v4684_v24 = vpop.eup %4683  ;;  %v6712_v56 = vld [vmem:[#allocation29_spill] sm:$0xff] }
 0x2c5   : > { %v1091_v6 = vmul.f32 %v1085_v18, %v5727_v63  ;;  %v1089_v30 = vmul.f32 0.5, %v4684_v24  ;;  %v6704_v63 = vld [vmem:[#allocation21_spill] sm:$0xff]  ;;  %v6713_v18 = vld [vmem:[#allocation30_spill] sm:$0xff]  ;;  %v6719_v24 = vld [vmem:[#allocation36_spill] sm:$0xff] }
 0x2c6   : > { %v6716_v22 = vld [vmem:[#allocation33_spill] sm:$0xff] }
 0x2c7   : > { %v5807_v25 = vadd.f32 %v1092_v38, %v1091_v6  ;;  %v1090_v52 = vadd.f32 0.5, %v1089_v30  ;;  %v6717_v6 = vld [vmem:[#allocation34_spill] sm:$0xff]  ;;  %v6718_v38 = vld [vmem:[#allocation35_spill] sm:$0xff]  ;;  %v6720_v30 = vld [vmem:[#allocation37_spill] sm:$0xff] }
 0x2c9   : > { %4685 = vtanh.f32 %v5807_v25 }
 0x2cf   : > { %v4686_v37 = vpop.eup %4685 }
 0x2d0   : > { %v1095_v55 = vmul.f32 %v4686_v37, %v1090_v52  ;;  %v6721_v52 = vld [vmem:[#allocation38_spill] sm:$0xff]  ;;  %v6722_v37 = vld [vmem:[#allocation39_spill] sm:$0xff] }
 0x2d2   : > { %v1096_v31 = vpack.c.bf16 %v1095_v55, %v1095_v55  ;;  %v6723_v55 = vld [vmem:[#allocation40_spill] sm:$0xff] }
 0x2d4   : > { %1105 = vmatmul.bf16.vlgmr.msrb.gmra.mxu0 %v1096_v31  ;;  %1118 = vmatmul.bf16.vlgmr.msrb.gmra.mxu1 %v1096_v31 }
 0x2d5   : > { %1131 = vmatmul.bf16.vlgmr.msrb.gmra.mxu2 %v1096_v31  ;;  %1144 = vmatmul.bf16.vlgmr.msrb.gmra.mxu3 %v1096_v31 }
 0x2d6   : > { %1236 = vmatpush.bf16.msrb.mxu0 %v5417_v26  ;;  %1249 = vmatpush.bf16.msrb.mxu1 %v5422_v11 }
 0x2d7   : > { %1262 = vmatpush.bf16.msrb.mxu2 %v5432_v23  ;;  %1275 = vmatpush.bf16.msrb.mxu3 %v5436_v39 }
 0x2da   : > { %1237 = vmatpush.bf16.msrb.mxu0 %v5438_v41  ;;  %1250 = vmatpush.bf16.msrb.mxu1 %v5444_v50 }
 0x2db   : > { %1263 = vmatpush.bf16.msrb.mxu2 %v5452_v1  ;;  %1276 = vmatpush.bf16.msrb.mxu3 %v5456_v2 }
 0x2de   : > { %1238 = vmatpush.bf16.msrb.mxu0 %v5458_v4  ;;  %1251 = vmatpush.bf16.msrb.mxu1 %v5464_v19 }
 0x2df   : > { %1264 = vmatpush.bf16.msrb.mxu2 %v5472_v13  ;;  %1277 = vmatpush.bf16.msrb.mxu3 %v5476_v14 }
 0x2e2   : > { %1239 = vmatpush.bf16.msrb.mxu0 %v5478_v15  ;;  %1252 = vmatpush.bf16.msrb.mxu1 %v5483_v46 }
 0x2e3   : > { %1265 = vmatpush.bf16.msrb.mxu2 %v5488_v51  ;;  %1278 = vmatpush.bf16.msrb.mxu3 %v5492_v54 }
 0x2e4   : > { %1173 = vmatmul.bf16.vlgmr.msra.gmra.mxu0 %v1096_v31  ;;  %1186 = vmatmul.bf16.vlgmr.msra.gmra.mxu1 %v1096_v31 }
 0x2e5   : > { %1199 = vmatmul.bf16.vlgmr.msra.gmra.mxu2 %v1096_v31  ;;  %1212 = vmatmul.bf16.vlgmr.msra.gmra.mxu3 %v1096_v31  ;;  %v6724_v31 = vld [vmem:[#allocation41_spill] sm:$0xff] }
 0x2e6   : > { %1240 = vmatpush.bf16.msrb.mxu0 %v5503_v60  ;;  %1253 = vmatpush.bf16.msrb.mxu1 %v5508_v20 }
 0x2e7   : > { %1266 = vmatpush.bf16.msrb.mxu2 %v6661_v8  ;;  %1279 = vmatpush.bf16.msrb.mxu3 %v6662_v17 }
 0x2ea   : > { %1241 = vmatpush.bf16.msrb.mxu0 %v6663_v10  ;;  %1254 = vmatpush.bf16.msrb.mxu1 %v6664_v28 }
 0x2eb   : > { %1267 = vmatpush.bf16.msrb.mxu2 %v6665_v42  ;;  %1280 = vmatpush.bf16.msrb.mxu3 %v6666_v48 }
 0x2ee   : > { %1242 = vmatpush.bf16.msrb.mxu0 %v6667_v58  ;;  %1255 = vmatpush.bf16.msrb.mxu1 %v6668_v59 }
 0x2ef   : > { %1268 = vmatpush.bf16.msrb.mxu2 %v5561_v32  ;;  %1281 = vmatpush.bf16.msrb.mxu3 %v5566_v47 }
 0x2f2   : > { %1243 = vmatpush.bf16.msrb.mxu0 %v5574_v0  ;;  %1256 = vmatpush.bf16.msrb.mxu1 %v5580_v5 }
 0x2f3   : > { %1269 = vmatpush.bf16.msrb.mxu2 %v5582_v7  ;;  %1282 = vmatpush.bf16.msrb.mxu3 %v5588_v12 }
 0x2f6   : > { %1304 = vmatpush.bf16.msra.mxu0 %v5256_v16  ;;  %1317 = vmatpush.bf16.msra.mxu1 %v5261_v35 }
 0x2f7   : > { %1330 = vmatpush.bf16.msra.mxu2 %v5263_v36  ;;  %1343 = vmatpush.bf16.msra.mxu3 %v5269_v40 }
 0x2fa   : > { %1305 = vmatpush.bf16.msra.mxu0 %v5276_v44  ;;  %1318 = vmatpush.bf16.msra.mxu1 %v5278_v45 }
 0x2fb   : > { %1331 = vmatpush.bf16.msra.mxu2 %v5284_v49  ;;  %1344 = vmatpush.bf16.msra.mxu3 %v5289_v53 }
 0x2fe   : > { %1306 = vmatpush.bf16.msra.mxu0 %v5295_v57  ;;  %1319 = vmatpush.bf16.msra.mxu1 %v5302_v61 }
 0x2ff   : > { %1332 = vmatpush.bf16.msra.mxu2 %v6704_v63  ;;  %1345 = vmatpush.bf16.msra.mxu3 %v6705_v62 }
 0x302   : > { %1307 = vmatpush.bf16.msra.mxu0 %v6706_v3  ;;  %1320 = vmatpush.bf16.msra.mxu1 %v6707_v27 }
 0x303   : > { %1333 = vmatpush.bf16.msra.mxu2 %v6708_v29  ;;  %1346 = vmatpush.bf16.msra.mxu3 %v6709_v21 }
 0x306   : > { %1308 = vmatpush.bf16.msra.mxu0 %v6710_v34  ;;  %1321 = vmatpush.bf16.msra.mxu1 %v6711_v33 }
 0x307   : > { %1334 = vmatpush.bf16.msra.mxu2 %v6712_v56  ;;  %1347 = vmatpush.bf16.msra.mxu3 %v6713_v18  ;;  %v6728_v18 = vld [vmem:[#allocation45_spill] sm:$0xff] }
 0x30a   : > { %1309 = vmatpush.bf16.msra.mxu0 %v6714_v9  ;;  %1322 = vmatpush.bf16.msra.mxu1 %v6715_v43  ;;  %v6725_v43 = vld [vmem:[#allocation42_spill] sm:$0xff]  ;;  %v6727_v9 = vld [vmem:[#allocation44_spill] sm:$0xff] }
 0x30b   : > { %1335 = vmatpush.bf16.msra.mxu2 %v6716_v22  ;;  %1348 = vmatpush.bf16.msra.mxu3 %v6717_v6  ;;  %v6726_v22 = vld [vmem:[#allocation43_spill] sm:$0xff] }
 0x30e   : > { %1310 = vmatpush.bf16.msra.mxu0 %v6718_v38  ;;  %1323 = vmatpush.bf16.msra.mxu1 %v6719_v24 }
 0x30f   : > { %1336 = vmatpush.bf16.msra.mxu2 %v6720_v30  ;;  %1349 = vmatpush.bf16.msra.mxu3 %v6721_v52 }
 0x312   : > { %1311 = vmatpush.bf16.msra.mxu0 %v6722_v37  ;;  %1324 = vmatpush.bf16.msra.mxu1 %v6723_v55  ;;  %v6729_v55 = vld [vmem:[#allocation46_spill] sm:$0xff] }
 0x313   : > { %1337 = vmatpush.bf16.msra.mxu2 %v6724_v31  ;;  %1350 = vmatpush.bf16.msra.mxu3 %v6725_v43 }
 0x351   : > { %v1106_v6 = vpop.f32.mrf.mxu0  ;;  %v1119_v38 = vpop.f32.mrf.mxu1 }
 0x352   : > { %v1107_v24 = vadd.f32 %v1106_v6, %v6726_v22  ;;  %v1120_v30 = vadd.f32 %v1119_v38, %v6727_v9 }
 0x354   : > { %3844 = vst [vmem:[%s5710_s22 + $0x40] sm:$0xff] %v1107_v24 }
 0x355   : > { %3845 = vst [vmem:[%s5710_s22 + $0x48] sm:$0xff] %v1120_v30 }
 0x358   : > { %v1132_v52 = vpop.f32.mrf.mxu2  ;;  %v1145_v37 = vpop.f32.mrf.mxu3 }
 0x359   : > { %v1133_v56 = vadd.f32 %v1132_v52, %v6728_v18  ;;  %v1146_v33 = vadd.f32 %v1145_v37, %v6729_v55  ;;  %v1108_v31 = vpop.f32.mrf.mxu0  ;;  %v1121_v34 = vpop.f32.mrf.mxu1 }
 0x35b   : > { %3846 = vst [vmem:[%s5710_s22 + $0x50] sm:$0xff] %v1133_v56 }
 0x35c   : > { %3847 = vst [vmem:[%s5710_s22 + $0x58] sm:$0xff] %v1146_v33 }
 0x360   : > { %v1134_v29 = vpop.f32.mrf.mxu2  ;;  %v1147_v6 = vpop.f32.mrf.mxu3 }
 0x361   : > { %v1174_v22 = vpop.f32.mrf.mxu0  ;;  %v1187_v38 = vpop.f32.mrf.mxu1 }
 0x363   : > { %v3850_v43 = vld [vmem:[%s5609_s30 + $0x60] sm:$0xff]  ;;  %v3851_v21 = vld [vmem:[%s5609_s30 + $0x68] sm:$0xff]  ;;  %v3852_v52 = vld [vmem:[%s5609_s30 + $0x70] sm:$0xff] }
 0x364   : > { %v1175_v24 = vadd.f32 %v3850_v43, %v1174_v22  ;;  %v1188_v30 = vadd.f32 %v3851_v21, %v1187_v38  ;;  %v3853_v18 = vld [vmem:[%s5609_s30 + $0x78] sm:$0xff] }
 0x366   : > { %v1217_v9 = vmul.f32 0.5, %v1175_v24  ;;  %v1221_v27 = vmul.f32 0.5, %v1188_v30 }
 0x368   : > { %4687 = vtanh.f32 %v1217_v9  ;;  %v1200_v37 = vpop.f32.mrf.mxu2  ;;  %v1213_v31 = vpop.f32.mrf.mxu3 }
 0x369   : > { %4689 = vtanh.f32 %v1221_v27  ;;  %v1201_v55 = vadd.f32 %v3852_v52, %v1200_v37  ;;  %v1214_v34 = vadd.f32 %v3853_v18, %v1213_v31  ;;  %v1176_v56 = vpop.f32.mrf.mxu0  ;;  %v1189_v33 = vpop.f32.mrf.mxu1 }
 0x36a   : > { %v6734_v56 = vld [vmem:[#allocation25_spill] sm:$0xff]  ;;  %v6735_v33 = vld [vmem:[#allocation26_spill] sm:$0xff] }
 0x36b   : > { %4691 = vtanh.f32 %v1201_v55  ;;  %v1226_v3 = vmul.f32 0.5, %v1214_v34 }
 0x36d   : > { %4693 = vtanh.f32 %v1226_v3  ;;  %v6733_v3 = vld [vmem:[#allocation24_spill] sm:$0xff] }
 0x36e   : > { %v4688_v29 = vpop.eup %4687 }
 0x36f   : > { %v4690_v6 = vpop.eup %4689  ;;  %v1219_v62 = vmul.f32 0.5, %v4688_v29  ;;  %v6736_v29 = vld [vmem:[#allocation27_spill] sm:$0xff] }
 0x370   : > { %v1223_v63 = vmul.f32 0.5, %v4690_v6  ;;  %v1202_v22 = vpop.f32.mrf.mxu2  ;;  %v1215_v9 = vpop.f32.mrf.mxu3  ;;  %v6737_v6 = vld [vmem:[#allocation28_spill] sm:$0xff] }
 0x371   : > { %v1220_v21 = vadd.f32 0.5, %v1219_v62  ;;  %v4692_v38 = vpop.eup %4691  ;;  %v6732_v62 = vld [vmem:[#allocation23_spill] sm:$0xff]  ;;  %v6741_v9 = vld [vmem:[#allocation32_spill] sm:$0xff] }
 0x372   : > { %v1224_v43 = vadd.f32 0.5, %v1223_v63  ;;  %v6731_v63 = vld [vmem:[#allocation22_spill] sm:$0xff]  ;;  %v6740_v22 = vld [vmem:[#allocation31_spill] sm:$0xff] }
 0x373   : > { %v1231_v24 = vmul.f32 %v4692_v38, %v1220_v21  ;;  %v4694_v30 = vpop.eup %4693  ;;  %v6738_v21 = vld [vmem:[#allocation29_spill] sm:$0xff] }
 0x374   : > { %v1230_v27 = vmul.f32 %v1224_v43, %v5807_v25  ;;  %v1228_v18 = vmul.f32 0.5, %v4694_v30  ;;  %v6730_v25 = vld [vmem:[#allocation21_spill] sm:$0xff]  ;;  %v6739_v43 = vld [vmem:[#allocation30_spill] sm:$0xff]  ;;  %v6745_v30 = vld [vmem:[#allocation36_spill] sm:$0xff] }
 0x375   : > { %v6742_v38 = vld [vmem:[#allocation33_spill] sm:$0xff] }
 0x376   : > { %v5887_v52 = vadd.f32 %v1231_v24, %v1230_v27  ;;  %v1229_v55 = vadd.f32 0.5, %v1228_v18  ;;  %v6743_v27 = vld [vmem:[#allocation34_spill] sm:$0xff]  ;;  %v6744_v24 = vld [vmem:[#allocation35_spill] sm:$0xff]  ;;  %v6746_v18 = vld [vmem:[#allocation37_spill] sm:$0xff] }
 0x378   : > { %4695 = vtanh.f32 %v5887_v52 }
 0x37e   : > { %v4696_v37 = vpop.eup %4695 }
 0x37f   : > { %v1234_v31 = vmul.f32 %v4696_v37, %v1229_v55  ;;  %v6747_v55 = vld [vmem:[#allocation38_spill] sm:$0xff]  ;;  %v6748_v37 = vld [vmem:[#allocation39_spill] sm:$0xff] }
 0x381   : > { %v1235_v34 = vpack.c.bf16 %v1234_v31, %v1234_v31  ;;  %v6749_v31 = vld [vmem:[#allocation40_spill] sm:$0xff] }
 0x383   : > { %1244 = vmatmul.bf16.vlgmr.msrb.gmra.mxu0 %v1235_v34  ;;  %1257 = vmatmul.bf16.vlgmr.msrb.gmra.mxu1 %v1235_v34 }
 0x384   : > { %1270 = vmatmul.bf16.vlgmr.msrb.gmra.mxu2 %v1235_v34  ;;  %1283 = vmatmul.bf16.vlgmr.msrb.gmra.mxu3 %v1235_v34 }
 0x385   : > { %1375 = vmatpush.bf16.msrb.mxu0 %v5417_v26  ;;  %1388 = vmatpush.bf16.msrb.mxu1 %v5422_v11 }
 0x386   : > { %1401 = vmatpush.bf16.msrb.mxu2 %v5432_v23  ;;  %1414 = vmatpush.bf16.msrb.mxu3 %v5436_v39 }
 0x389   : > { %1376 = vmatpush.bf16.msrb.mxu0 %v5438_v41  ;;  %1389 = vmatpush.bf16.msrb.mxu1 %v5444_v50 }
 0x38a   : > { %1402 = vmatpush.bf16.msrb.mxu2 %v5452_v1  ;;  %1415 = vmatpush.bf16.msrb.mxu3 %v5456_v2 }
 0x38d   : > { %1377 = vmatpush.bf16.msrb.mxu0 %v5458_v4  ;;  %1390 = vmatpush.bf16.msrb.mxu1 %v5464_v19 }
 0x38e   : > { %1403 = vmatpush.bf16.msrb.mxu2 %v5472_v13  ;;  %1416 = vmatpush.bf16.msrb.mxu3 %v5476_v14 }
 0x391   : > { %1378 = vmatpush.bf16.msrb.mxu0 %v5478_v15  ;;  %1391 = vmatpush.bf16.msrb.mxu1 %v5483_v46 }
 0x392   : > { %1404 = vmatpush.bf16.msrb.mxu2 %v5488_v51  ;;  %1417 = vmatpush.bf16.msrb.mxu3 %v5492_v54 }
 0x393   : > { %1312 = vmatmul.bf16.vlgmr.msra.gmra.mxu0 %v1235_v34  ;;  %1325 = vmatmul.bf16.vlgmr.msra.gmra.mxu1 %v1235_v34 }
 0x394   : > { %1338 = vmatmul.bf16.vlgmr.msra.gmra.mxu2 %v1235_v34  ;;  %1351 = vmatmul.bf16.vlgmr.msra.gmra.mxu3 %v1235_v34  ;;  %v6750_v34 = vld [vmem:[#allocation41_spill] sm:$0xff] }
 0x395   : > { %1379 = vmatpush.bf16.msrb.mxu0 %v5503_v60  ;;  %1392 = vmatpush.bf16.msrb.mxu1 %v5508_v20 }
 0x396   : > { %1405 = vmatpush.bf16.msrb.mxu2 %v6661_v8  ;;  %1418 = vmatpush.bf16.msrb.mxu3 %v6662_v17 }
 0x399   : > { %1380 = vmatpush.bf16.msrb.mxu0 %v6663_v10  ;;  %1393 = vmatpush.bf16.msrb.mxu1 %v6664_v28 }
 0x39a   : > { %1406 = vmatpush.bf16.msrb.mxu2 %v6665_v42  ;;  %1419 = vmatpush.bf16.msrb.mxu3 %v6666_v48 }
 0x39d   : > { %1381 = vmatpush.bf16.msrb.mxu0 %v6667_v58  ;;  %1394 = vmatpush.bf16.msrb.mxu1 %v6668_v59 }
 0x39e   : > { %1407 = vmatpush.bf16.msrb.mxu2 %v5561_v32  ;;  %1420 = vmatpush.bf16.msrb.mxu3 %v5566_v47 }
 0x3a1   : > { %1382 = vmatpush.bf16.msrb.mxu0 %v5574_v0  ;;  %1395 = vmatpush.bf16.msrb.mxu1 %v5580_v5 }
 0x3a2   : > { %1408 = vmatpush.bf16.msrb.mxu2 %v5582_v7  ;;  %1421 = vmatpush.bf16.msrb.mxu3 %v5588_v12 }
 0x3a5   : > { %1443 = vmatpush.bf16.msra.mxu0 %v5256_v16  ;;  %1456 = vmatpush.bf16.msra.mxu1 %v5261_v35 }
 0x3a6   : > { %1469 = vmatpush.bf16.msra.mxu2 %v5263_v36  ;;  %1482 = vmatpush.bf16.msra.mxu3 %v5269_v40 }
 0x3a9   : > { %1444 = vmatpush.bf16.msra.mxu0 %v5276_v44  ;;  %1457 = vmatpush.bf16.msra.mxu1 %v5278_v45 }
 0x3aa   : > { %1470 = vmatpush.bf16.msra.mxu2 %v5284_v49  ;;  %1483 = vmatpush.bf16.msra.mxu3 %v5289_v53 }
 0x3ad   : > { %1445 = vmatpush.bf16.msra.mxu0 %v5295_v57  ;;  %1458 = vmatpush.bf16.msra.mxu1 %v5302_v61 }
 0x3ae   : > { %1471 = vmatpush.bf16.msra.mxu2 %v6730_v25  ;;  %1484 = vmatpush.bf16.msra.mxu3 %v6731_v63 }
 0x3b1   : > { %1446 = vmatpush.bf16.msra.mxu0 %v6732_v62  ;;  %1459 = vmatpush.bf16.msra.mxu1 %v6733_v3 }
 0x3b2   : > { %1472 = vmatpush.bf16.msra.mxu2 %v6734_v56  ;;  %1485 = vmatpush.bf16.msra.mxu3 %v6735_v33 }
 0x3b5   : > { %1447 = vmatpush.bf16.msra.mxu0 %v6736_v29  ;;  %1460 = vmatpush.bf16.msra.mxu1 %v6737_v6 }
 0x3b6   : > { %1473 = vmatpush.bf16.msra.mxu2 %v6738_v21  ;;  %1486 = vmatpush.bf16.msra.mxu3 %v6739_v43  ;;  %v6754_v43 = vld [vmem:[#allocation45_spill] sm:$0xff] }
 0x3b9   : > { %1448 = vmatpush.bf16.msra.mxu0 %v6740_v22  ;;  %1461 = vmatpush.bf16.msra.mxu1 %v6741_v9  ;;  %v6751_v9 = vld [vmem:[#allocation42_spill] sm:$0xff]  ;;  %v6753_v22 = vld [vmem:[#allocation44_spill] sm:$0xff] }
 0x3ba   : > { %1474 = vmatpush.bf16.msra.mxu2 %v6742_v38  ;;  %1487 = vmatpush.bf16.msra.mxu3 %v6743_v27  ;;  %v6752_v38 = vld [vmem:[#allocation43_spill] sm:$0xff] }
 0x3bd   : > { %1449 = vmatpush.bf16.msra.mxu0 %v6744_v24  ;;  %1462 = vmatpush.bf16.msra.mxu1 %v6745_v30 }
 0x3be   : > { %1475 = vmatpush.bf16.msra.mxu2 %v6746_v18  ;;  %1488 = vmatpush.bf16.msra.mxu3 %v6747_v55 }
 0x3c1   : > { %1450 = vmatpush.bf16.msra.mxu0 %v6748_v37  ;;  %1463 = vmatpush.bf16.msra.mxu1 %v6749_v31  ;;  %v6755_v31 = vld [vmem:[#allocation46_spill] sm:$0xff] }
 0x3c2   : > { %1476 = vmatpush.bf16.msra.mxu2 %v6750_v34  ;;  %1489 = vmatpush.bf16.msra.mxu3 %v6751_v9 }
 0x400   : > { %v1245_v27 = vpop.f32.mrf.mxu0  ;;  %v1258_v24 = vpop.f32.mrf.mxu1 }
 0x401   : > { %v1246_v30 = vadd.f32 %v1245_v27, %v6752_v38  ;;  %v1259_v18 = vadd.f32 %v1258_v24, %v6753_v22 }
 0x403   : > { %3856 = vst [vmem:[%s5710_s22 + $0x60] sm:$0xff] %v1246_v30 }
 0x404   : > { %3857 = vst [vmem:[%s5710_s22 + $0x68] sm:$0xff] %v1259_v18 }
 0x407   : > { %v1271_v55 = vpop.f32.mrf.mxu2  ;;  %v1284_v37 = vpop.f32.mrf.mxu3 }
 0x408   : > { %v1272_v21 = vadd.f32 %v1271_v55, %v6754_v43  ;;  %v1285_v6 = vadd.f32 %v1284_v37, %v6755_v31  ;;  %v1247_v34 = vpop.f32.mrf.mxu0  ;;  %v1260_v29 = vpop.f32.mrf.mxu1 }
 0x40a   : > { %3858 = vst [vmem:[%s5710_s22 + $0x70] sm:$0xff] %v1272_v21 }
 0x40b   : > { %3859 = vst [vmem:[%s5710_s22 + $0x78] sm:$0xff] %v1285_v6 }
 0x40f   : > { %v1273_v56 = vpop.f32.mrf.mxu2  ;;  %v1286_v27 = vpop.f32.mrf.mxu3 }
 0x410   : > { %v1313_v38 = vpop.f32.mrf.mxu0  ;;  %v1326_v24 = vpop.f32.mrf.mxu1 }
 0x412   : > { %v3862_v9 = vld [vmem:[%s5609_s30 + $0x80] sm:$0xff]  ;;  %v3863_v33 = vld [vmem:[%s5609_s30 + $0x88] sm:$0xff]  ;;  %v3864_v55 = vld [vmem:[%s5609_s30 + $0x90] sm:$0xff] }
 0x413   : > { %v1314_v30 = vadd.f32 %v3862_v9, %v1313_v38  ;;  %v1327_v18 = vadd.f32 %v3863_v33, %v1326_v24  ;;  %v3865_v43 = vld [vmem:[%s5609_s30 + $0x98] sm:$0xff] }
 0x415   : > { %v1356_v22 = vmul.f32 0.5, %v1314_v30  ;;  %v1360_v3 = vmul.f32 0.5, %v1327_v18 }
 0x417   : > { %4697 = vtanh.f32 %v1356_v22  ;;  %v1339_v37 = vpop.f32.mrf.mxu2  ;;  %v1352_v34 = vpop.f32.mrf.mxu3 }
 0x418   : > { %4699 = vtanh.f32 %v1360_v3  ;;  %v1340_v31 = vadd.f32 %v3864_v55, %v1339_v37  ;;  %v1353_v29 = vadd.f32 %v3865_v43, %v1352_v34  ;;  %v1315_v21 = vpop.f32.mrf.mxu0  ;;  %v1328_v6 = vpop.f32.mrf.mxu1 }
 0x419   : > { %v6760_v21 = vld [vmem:[#allocation25_spill] sm:$0xff]  ;;  %v6761_v6 = vld [vmem:[#allocation26_spill] sm:$0xff] }
 0x41a   : > { %4701 = vtanh.f32 %v1340_v31  ;;  %v1365_v62 = vmul.f32 0.5, %v1353_v29 }
 0x41c   : > { %4703 = vtanh.f32 %v1365_v62  ;;  %v6759_v62 = vld [vmem:[#allocation24_spill] sm:$0xff] }
 0x41d   : > { %v4698_v56 = vpop.eup %4697 }
 0x41e   : > { %v4700_v27 = vpop.eup %4699  ;;  %v1358_v63 = vmul.f32 0.5, %v4698_v56  ;;  %v6762_v56 = vld [vmem:[#allocation27_spill] sm:$0xff] }
 0x41f   : > { %v1362_v25 = vmul.f32 0.5, %v4700_v27  ;;  %v1341_v38 = vpop.f32.mrf.mxu2  ;;  %v1354_v22 = vpop.f32.mrf.mxu3  ;;  %v6763_v27 = vld [vmem:[#allocation28_spill] sm:$0xff] }
 0x420   : > { %v1359_v33 = vadd.f32 0.5, %v1358_v63  ;;  %v4702_v24 = vpop.eup %4701  ;;  %v6758_v63 = vld [vmem:[#allocation23_spill] sm:$0xff]  ;;  %v6767_v22 = vld [vmem:[#allocation32_spill] sm:$0xff] }
 0x421   : > { %v1363_v9 = vadd.f32 0.5, %v1362_v25  ;;  %v6757_v25 = vld [vmem:[#allocation22_spill] sm:$0xff]  ;;  %v6766_v38 = vld [vmem:[#allocation31_spill] sm:$0xff] }
 0x422   : > { %v1370_v30 = vmul.f32 %v4702_v24, %v1359_v33  ;;  %v4704_v18 = vpop.eup %4703  ;;  %v6764_v33 = vld [vmem:[#allocation29_spill] sm:$0xff] }
 0x423   : > { %v1369_v3 = vmul.f32 %v1363_v9, %v5887_v52  ;;  %v1367_v43 = vmul.f32 0.5, %v4704_v18  ;;  %v6756_v52 = vld [vmem:[#allocation21_spill] sm:$0xff]  ;;  %v6765_v9 = vld [vmem:[#allocation30_spill] sm:$0xff]  ;;  %v6771_v18 = vld [vmem:[#allocation36_spill] sm:$0xff] }
 0x424   : > { %v6768_v24 = vld [vmem:[#allocation33_spill] sm:$0xff] }
 0x425   : > { %v5967_v55 = vadd.f32 %v1370_v30, %v1369_v3  ;;  %v1368_v31 = vadd.f32 0.5, %v1367_v43  ;;  %v6769_v3 = vld [vmem:[#allocation34_spill] sm:$0xff]  ;;  %v6770_v30 = vld [vmem:[#allocation35_spill] sm:$0xff]  ;;  %v6772_v43 = vld [vmem:[#allocation37_spill] sm:$0xff] }
 0x427   : > { %4705 = vtanh.f32 %v5967_v55 }
 0x42d   : > { %v4706_v37 = vpop.eup %4705 }
 0x42e   : > { %v1373_v34 = vmul.f32 %v4706_v37, %v1368_v31  ;;  %v6773_v31 = vld [vmem:[#allocation38_spill] sm:$0xff]  ;;  %v6774_v37 = vld [vmem:[#allocation39_spill] sm:$0xff] }
 0x430   : > { %v1374_v29 = vpack.c.bf16 %v1373_v34, %v1373_v34  ;;  %v6775_v34 = vld [vmem:[#allocation40_spill] sm:$0xff] }
 0x432   : > { %1383 = vmatmul.bf16.vlgmr.msrb.gmra.mxu0 %v1374_v29  ;;  %1396 = vmatmul.bf16.vlgmr.msrb.gmra.mxu1 %v1374_v29 }
 0x433   : > { %1409 = vmatmul.bf16.vlgmr.msrb.gmra.mxu2 %v1374_v29  ;;  %1422 = vmatmul.bf16.vlgmr.msrb.gmra.mxu3 %v1374_v29 }
 0x434   : > { %1514 = vmatpush.bf16.msrb.mxu0 %v5417_v26  ;;  %1527 = vmatpush.bf16.msrb.mxu1 %v5422_v11 }
 0x435   : > { %1540 = vmatpush.bf16.msrb.mxu2 %v5432_v23  ;;  %1553 = vmatpush.bf16.msrb.mxu3 %v5436_v39 }
 0x438   : > { %1515 = vmatpush.bf16.msrb.mxu0 %v5438_v41  ;;  %1528 = vmatpush.bf16.msrb.mxu1 %v5444_v50 }
 0x439   : > { %1541 = vmatpush.bf16.msrb.mxu2 %v5452_v1  ;;  %1554 = vmatpush.bf16.msrb.mxu3 %v5456_v2 }
 0x43c   : > { %1516 = vmatpush.bf16.msrb.mxu0 %v5458_v4  ;;  %1529 = vmatpush.bf16.msrb.mxu1 %v5464_v19 }
 0x43d   : > { %1542 = vmatpush.bf16.msrb.mxu2 %v5472_v13  ;;  %1555 = vmatpush.bf16.msrb.mxu3 %v5476_v14 }
 0x440   : > { %1517 = vmatpush.bf16.msrb.mxu0 %v5478_v15  ;;  %1530 = vmatpush.bf16.msrb.mxu1 %v5483_v46 }
 0x441   : > { %1543 = vmatpush.bf16.msrb.mxu2 %v5488_v51  ;;  %1556 = vmatpush.bf16.msrb.mxu3 %v5492_v54 }
 0x442   : > { %1451 = vmatmul.bf16.vlgmr.msra.gmra.mxu0 %v1374_v29  ;;  %1464 = vmatmul.bf16.vlgmr.msra.gmra.mxu1 %v1374_v29 }
 0x443   : > { %1477 = vmatmul.bf16.vlgmr.msra.gmra.mxu2 %v1374_v29  ;;  %1490 = vmatmul.bf16.vlgmr.msra.gmra.mxu3 %v1374_v29  ;;  %v6776_v29 = vld [vmem:[#allocation41_spill] sm:$0xff] }
 0x444   : > { %1518 = vmatpush.bf16.msrb.mxu0 %v5503_v60  ;;  %1531 = vmatpush.bf16.msrb.mxu1 %v5508_v20 }
 0x445   : > { %1544 = vmatpush.bf16.msrb.mxu2 %v6661_v8  ;;  %1557 = vmatpush.bf16.msrb.mxu3 %v6662_v17 }
 0x448   : > { %1519 = vmatpush.bf16.msrb.mxu0 %v6663_v10  ;;  %1532 = vmatpush.bf16.msrb.mxu1 %v6664_v28 }
 0x449   : > { %1545 = vmatpush.bf16.msrb.mxu2 %v6665_v42  ;;  %1558 = vmatpush.bf16.msrb.mxu3 %v6666_v48 }
 0x44c   : > { %1520 = vmatpush.bf16.msrb.mxu0 %v6667_v58  ;;  %1533 = vmatpush.bf16.msrb.mxu1 %v6668_v59 }
 0x44d   : > { %1546 = vmatpush.bf16.msrb.mxu2 %v5561_v32  ;;  %1559 = vmatpush.bf16.msrb.mxu3 %v5566_v47 }
 0x450   : > { %1521 = vmatpush.bf16.msrb.mxu0 %v5574_v0  ;;  %1534 = vmatpush.bf16.msrb.mxu1 %v5580_v5 }
 0x451   : > { %1547 = vmatpush.bf16.msrb.mxu2 %v5582_v7  ;;  %1560 = vmatpush.bf16.msrb.mxu3 %v5588_v12 }
 0x454   : > { %1582 = vmatpush.bf16.msra.mxu0 %v5256_v16  ;;  %1595 = vmatpush.bf16.msra.mxu1 %v5261_v35 }
 0x455   : > { %1608 = vmatpush.bf16.msra.mxu2 %v5263_v36  ;;  %1621 = vmatpush.bf16.msra.mxu3 %v5269_v40 }
 0x458   : > { %1583 = vmatpush.bf16.msra.mxu0 %v5276_v44  ;;  %1596 = vmatpush.bf16.msra.mxu1 %v5278_v45 }
 0x459   : > { %1609 = vmatpush.bf16.msra.mxu2 %v5284_v49  ;;  %1622 = vmatpush.bf16.msra.mxu3 %v5289_v53 }
 0x45c   : > { %1584 = vmatpush.bf16.msra.mxu0 %v5295_v57  ;;  %1597 = vmatpush.bf16.msra.mxu1 %v5302_v61 }
 0x45d   : > { %1610 = vmatpush.bf16.msra.mxu2 %v6756_v52  ;;  %1623 = vmatpush.bf16.msra.mxu3 %v6757_v25 }
 0x460   : > { %1585 = vmatpush.bf16.msra.mxu0 %v6758_v63  ;;  %1598 = vmatpush.bf16.msra.mxu1 %v6759_v62 }
 0x461   : > { %1611 = vmatpush.bf16.msra.mxu2 %v6760_v21  ;;  %1624 = vmatpush.bf16.msra.mxu3 %v6761_v6 }
 0x464   : > { %1586 = vmatpush.bf16.msra.mxu0 %v6762_v56  ;;  %1599 = vmatpush.bf16.msra.mxu1 %v6763_v27 }
 0x465   : > { %1612 = vmatpush.bf16.msra.mxu2 %v6764_v33  ;;  %1625 = vmatpush.bf16.msra.mxu3 %v6765_v9  ;;  %v6780_v9 = vld [vmem:[#allocation45_spill] sm:$0xff] }
 0x468   : > { %1587 = vmatpush.bf16.msra.mxu0 %v6766_v38  ;;  %1600 = vmatpush.bf16.msra.mxu1 %v6767_v22  ;;  %v6777_v22 = vld [vmem:[#allocation42_spill] sm:$0xff]  ;;  %v6779_v38 = vld [vmem:[#allocation44_spill] sm:$0xff] }
 0x469   : > { %1613 = vmatpush.bf16.msra.mxu2 %v6768_v24  ;;  %1626 = vmatpush.bf16.msra.mxu3 %v6769_v3  ;;  %v6778_v24 = vld [vmem:[#allocation43_spill] sm:$0xff] }
 0x46c   : > { %1588 = vmatpush.bf16.msra.mxu0 %v6770_v30  ;;  %1601 = vmatpush.bf16.msra.mxu1 %v6771_v18 }
 0x46d   : > { %1614 = vmatpush.bf16.msra.mxu2 %v6772_v43  ;;  %1627 = vmatpush.bf16.msra.mxu3 %v6773_v31 }
 0x470   : > { %1589 = vmatpush.bf16.msra.mxu0 %v6774_v37  ;;  %1602 = vmatpush.bf16.msra.mxu1 %v6775_v34  ;;  %v6781_v34 = vld [vmem:[#allocation46_spill] sm:$0xff] }
 0x471   : > { %1615 = vmatpush.bf16.msra.mxu2 %v6776_v29  ;;  %1628 = vmatpush.bf16.msra.mxu3 %v6777_v22 }
 0x4af   : > { %v1384_v3 = vpop.f32.mrf.mxu0  ;;  %v1397_v30 = vpop.f32.mrf.mxu1 }
 0x4b0   : > { %v1385_v18 = vadd.f32 %v1384_v3, %v6778_v24  ;;  %v1398_v43 = vadd.f32 %v1397_v30, %v6779_v38 }
 0x4b2   : > { %3868 = vst [vmem:[%s5710_s22 + $0x80] sm:$0xff] %v1385_v18 }
 0x4b3   : > { %3869 = vst [vmem:[%s5710_s22 + $0x88] sm:$0xff] %v1398_v43 }
 0x4b6   : > { %v1410_v31 = vpop.f32.mrf.mxu2  ;;  %v1423_v37 = vpop.f32.mrf.mxu3 }
 0x4b7   : > { %v1411_v33 = vadd.f32 %v1410_v31, %v6780_v9  ;;  %v1424_v27 = vadd.f32 %v1423_v37, %v6781_v34  ;;  %v1386_v29 = vpop.f32.mrf.mxu0  ;;  %v1399_v56 = vpop.f32.mrf.mxu1 }
 0x4b9   : > { %3870 = vst [vmem:[%s5710_s22 + $0x90] sm:$0xff] %v1411_v33 }
 0x4ba   : > { %3871 = vst [vmem:[%s5710_s22 + $0x98] sm:$0xff] %v1424_v27 }
 0x4be   : > { %v1412_v21 = vpop.f32.mrf.mxu2  ;;  %v1425_v3 = vpop.f32.mrf.mxu3 }
 0x4bf   : > { %v1452_v24 = vpop.f32.mrf.mxu0  ;;  %v1465_v30 = vpop.f32.mrf.mxu1 }
 0x4c1   : > { %v3874_v22 = vld [vmem:[%s5609_s30 + $0xa0] sm:$0xff]  ;;  %v3875_v6 = vld [vmem:[%s5609_s30 + $0xa8] sm:$0xff]  ;;  %v3876_v31 = vld [vmem:[%s5609_s30 + $0xb0] sm:$0xff] }
 0x4c2   : > { %v1453_v18 = vadd.f32 %v3874_v22, %v1452_v24  ;;  %v1466_v43 = vadd.f32 %v3875_v6, %v1465_v30  ;;  %v3877_v9 = vld [vmem:[%s5609_s30 + $0xb8] sm:$0xff] }
 0x4c4   : > { %v1495_v38 = vmul.f32 0.5, %v1453_v18  ;;  %v1499_v62 = vmul.f32 0.5, %v1466_v43 }
 0x4c6   : > { %4707 = vtanh.f32 %v1495_v38  ;;  %v1478_v37 = vpop.f32.mrf.mxu2  ;;  %v1491_v29 = vpop.f32.mrf.mxu3 }
 0x4c7   : > { %4709 = vtanh.f32 %v1499_v62  ;;  %v1479_v34 = vadd.f32 %v3876_v31, %v1478_v37  ;;  %v1492_v56 = vadd.f32 %v3877_v9, %v1491_v29  ;;  %v1454_v33 = vpop.f32.mrf.mxu0  ;;  %v1467_v27 = vpop.f32.mrf.mxu1 }
 0x4c8   : > { %v6796_v33 = vld [vmem:[#allocation35_spill] sm:$0xff]  ;;  %v6797_v27 = vld [vmem:[#allocation36_spill] sm:$0xff] }
 0x4c9   : > { %4711 = vtanh.f32 %v1479_v34  ;;  %v1504_v63 = vmul.f32 0.5, %v1492_v56 }
 0x4cb   : > { %4713 = vtanh.f32 %v1504_v63  ;;  %v6795_v63 = vld [vmem:[#allocation34_spill] sm:$0xff] }
 0x4cc   : > { %v4708_v21 = vpop.eup %4707 }
 0x4cd   : > { %v4710_v3 = vpop.eup %4709  ;;  %v1497_v25 = vmul.f32 0.5, %v4708_v21  ;;  %v6798_v21 = vld [vmem:[#allocation37_spill] sm:$0xff] }
 0x4ce   : > { %v1501_v52 = vmul.f32 0.5, %v4710_v3  ;;  %v1480_v24 = vpop.f32.mrf.mxu2  ;;  %v1493_v38 = vpop.f32.mrf.mxu3  ;;  %v6799_v3 = vld [vmem:[#allocation38_spill] sm:$0xff] }
 0x4cf   : > { %v1498_v6 = vadd.f32 0.5, %v1497_v25  ;;  %v4712_v30 = vpop.eup %4711  ;;  %v6794_v25 = vld [vmem:[#allocation33_spill] sm:$0xff]  ;;  %v6803_v38 = vld [vmem:[#allocation42_spill] sm:$0xff] }
 0x4d0   : > { %v1502_v22 = vadd.f32 0.5, %v1501_v52  ;;  %v6793_v52 = vld [vmem:[#allocation32_spill] sm:$0xff]  ;;  %v6802_v24 = vld [vmem:[#allocation41_spill] sm:$0xff] }
 0x4d1   : > { %v1509_v18 = vmul.f32 %v4712_v30, %v1498_v6  ;;  %v4714_v43 = vpop.eup %4713  ;;  %v6800_v6 = vld [vmem:[#allocation39_spill] sm:$0xff] }
 0x4d2   : > { %v1508_v62 = vmul.f32 %v1502_v22, %v5967_v55  ;;  %v1506_v9 = vmul.f32 0.5, %v4714_v43  ;;  %v6782_v55 = vld [vmem:[#allocation21_spill] sm:$0xff]  ;;  %v6801_v22 = vld [vmem:[#allocation40_spill] sm:$0xff] }
 0x4d4   : > { %v6047_v31 = vadd.f32 %v1509_v18, %v1508_v62  ;;  %v1507_v34 = vadd.f32 0.5, %v1506_v9  ;;  %v6804_v18 = vld [vmem:[#allocation43_spill] sm:$0xff]  ;;  %v6805_v9 = vld [vmem:[#allocation44_spill] sm:$0xff] }
 0x4d6   : > { %4715 = vtanh.f32 %v6047_v31 }
 0x4dc   : > { %v4716_v37 = vpop.eup %4715 }
 0x4dd   : > { %v1512_v29 = vmul.f32 %v4716_v37, %v1507_v34 }
 0x4df   : > { %v1513_v56 = vpack.c.bf16 %v1512_v29, %v1512_v29 }
 0x4e1   : > { %1522 = vmatmul.bf16.vlgmr.msrb.gmra.mxu0 %v1513_v56  ;;  %1535 = vmatmul.bf16.vlgmr.msrb.gmra.mxu1 %v1513_v56 }
 0x4e2   : > { %1548 = vmatmul.bf16.vlgmr.msrb.gmra.mxu2 %v1513_v56  ;;  %1561 = vmatmul.bf16.vlgmr.msrb.gmra.mxu3 %v1513_v56 }
 0x4e3   : > { %1653 = vmatpush.bf16.msrb.mxu0 %v5417_v26  ;;  %1666 = vmatpush.bf16.msrb.mxu1 %v5422_v11 }
 0x4e4   : > { %1679 = vmatpush.bf16.msrb.mxu2 %v5432_v23  ;;  %1692 = vmatpush.bf16.msrb.mxu3 %v5436_v39 }
 0x4e7   : > { %1654 = vmatpush.bf16.msrb.mxu0 %v5438_v41  ;;  %1667 = vmatpush.bf16.msrb.mxu1 %v5444_v50 }
 0x4e8   : > { %1680 = vmatpush.bf16.msrb.mxu2 %v5452_v1  ;;  %1693 = vmatpush.bf16.msrb.mxu3 %v5456_v2 }
 0x4eb   : > { %1655 = vmatpush.bf16.msrb.mxu0 %v5458_v4  ;;  %1668 = vmatpush.bf16.msrb.mxu1 %v5464_v19 }
 0x4ec   : > { %1681 = vmatpush.bf16.msrb.mxu2 %v5472_v13  ;;  %1694 = vmatpush.bf16.msrb.mxu3 %v5476_v14 }
 0x4ef   : > { %1656 = vmatpush.bf16.msrb.mxu0 %v5478_v15  ;;  %1669 = vmatpush.bf16.msrb.mxu1 %v5483_v46 }
 0x4f0   : > { %1682 = vmatpush.bf16.msrb.mxu2 %v5488_v51  ;;  %1695 = vmatpush.bf16.msrb.mxu3 %v5492_v54 }
 0x4f1   : > { %1590 = vmatmul.bf16.vlgmr.msra.gmra.mxu0 %v1513_v56  ;;  %1603 = vmatmul.bf16.vlgmr.msra.gmra.mxu1 %v1513_v56 }
 0x4f2   : > { %1616 = vmatmul.bf16.vlgmr.msra.gmra.mxu2 %v1513_v56  ;;  %1629 = vmatmul.bf16.vlgmr.msra.gmra.mxu3 %v1513_v56  ;;  %v6806_v56 = vld [vmem:[#allocation45_spill] sm:$0xff] }
 0x4f3   : > { %1657 = vmatpush.bf16.msrb.mxu0 %v5503_v60  ;;  %1670 = vmatpush.bf16.msrb.mxu1 %v5508_v20 }
 0x4f4   : > { %1683 = vmatpush.bf16.msrb.mxu2 %v6661_v8  ;;  %1696 = vmatpush.bf16.msrb.mxu3 %v6662_v17 }
 0x4f7   : > { %1658 = vmatpush.bf16.msrb.mxu0 %v6663_v10  ;;  %1671 = vmatpush.bf16.msrb.mxu1 %v6664_v28 }
 0x4f8   : > { %1684 = vmatpush.bf16.msrb.mxu2 %v6665_v42  ;;  %1697 = vmatpush.bf16.msrb.mxu3 %v6666_v48 }
 0x4fb   : > { %1659 = vmatpush.bf16.msrb.mxu0 %v6667_v58  ;;  %1672 = vmatpush.bf16.msrb.mxu1 %v6668_v59 }
 0x4fc   : > { %1685 = vmatpush.bf16.msrb.mxu2 %v5561_v32  ;;  %1698 = vmatpush.bf16.msrb.mxu3 %v5566_v47 }
 0x4ff   : > { %1660 = vmatpush.bf16.msrb.mxu0 %v5574_v0  ;;  %1673 = vmatpush.bf16.msrb.mxu1 %v5580_v5 }
 0x500   : > { %1686 = vmatpush.bf16.msrb.mxu2 %v5582_v7  ;;  %1699 = vmatpush.bf16.msrb.mxu3 %v5588_v12 }
 0x503   : > { %1721 = vmatpush.bf16.msra.mxu0 %v5256_v16  ;;  %1734 = vmatpush.bf16.msra.mxu1 %v5261_v35  ;;  %v6783_v16 = vld [vmem:[#allocation22_spill] sm:$0xff]  ;;  %v6784_v35 = vld [vmem:[#allocation23_spill] sm:$0xff] }
 0x504   : > { %1747 = vmatpush.bf16.msra.mxu2 %v5263_v36  ;;  %1760 = vmatpush.bf16.msra.mxu3 %v5269_v40  ;;  %v6785_v36 = vld [vmem:[#allocation24_spill] sm:$0xff]  ;;  %v6786_v40 = vld [vmem:[#allocation25_spill] sm:$0xff] }
 0x507   : > { %1722 = vmatpush.bf16.msra.mxu0 %v5276_v44  ;;  %1735 = vmatpush.bf16.msra.mxu1 %v5278_v45  ;;  %v6787_v44 = vld [vmem:[#allocation26_spill] sm:$0xff]  ;;  %v6788_v45 = vld [vmem:[#allocation27_spill] sm:$0xff] }
 0x508   : > { %1748 = vmatpush.bf16.msra.mxu2 %v5284_v49  ;;  %1761 = vmatpush.bf16.msra.mxu3 %v5289_v53  ;;  %v6789_v49 = vld [vmem:[#allocation28_spill] sm:$0xff]  ;;  %v6790_v53 = vld [vmem:[#allocation29_spill] sm:$0xff] }
 0x50b   : > { %1723 = vmatpush.bf16.msra.mxu0 %v5295_v57  ;;  %1736 = vmatpush.bf16.msra.mxu1 %v5302_v61  ;;  %v6791_v57 = vld [vmem:[#allocation30_spill] sm:$0xff]  ;;  %v6792_v61 = vld [vmem:[#allocation31_spill] sm:$0xff] }
 0x50c   : > { %1749 = vmatpush.bf16.msra.mxu2 %v6782_v55  ;;  %1762 = vmatpush.bf16.msra.mxu3 %v6783_v16  ;;  %v6807_v16 = vld [vmem:[#allocation46_spill] sm:$0xff] }
 0x50f   : > { %1724 = vmatpush.bf16.msra.mxu0 %v6784_v35  ;;  %1737 = vmatpush.bf16.msra.mxu1 %v6785_v36 }
 0x510   : > { %1750 = vmatpush.bf16.msra.mxu2 %v6786_v40  ;;  %1763 = vmatpush.bf16.msra.mxu3 %v6787_v44 }
 0x513   : > { %1725 = vmatpush.bf16.msra.mxu0 %v6788_v45  ;;  %1738 = vmatpush.bf16.msra.mxu1 %v6789_v49 }
 0x514   : > { %1751 = vmatpush.bf16.msra.mxu2 %v6790_v53  ;;  %1764 = vmatpush.bf16.msra.mxu3 %v6791_v57 }
 0x517   : > { %1726 = vmatpush.bf16.msra.mxu0 %v6792_v61  ;;  %1739 = vmatpush.bf16.msra.mxu1 %v6793_v52 }
 0x518   : > { %1752 = vmatpush.bf16.msra.mxu2 %v6794_v25  ;;  %1765 = vmatpush.bf16.msra.mxu3 %v6795_v63 }
 0x51b   : > { %1727 = vmatpush.bf16.msra.mxu0 %v6796_v33  ;;  %1740 = vmatpush.bf16.msra.mxu1 %v6797_v27 }
 0x51c   : > { %1753 = vmatpush.bf16.msra.mxu2 %v6798_v21  ;;  %1766 = vmatpush.bf16.msra.mxu3 %v6799_v3 }
 0x51f   : > { %1728 = vmatpush.bf16.msra.mxu0 %v6800_v6  ;;  %1741 = vmatpush.bf16.msra.mxu1 %v6801_v22 }
 0x520   : > { %1754 = vmatpush.bf16.msra.mxu2 %v6802_v24  ;;  %1767 = vmatpush.bf16.msra.mxu3 %v6803_v38 }
 0x55e   : > { %v1523_v30 = vpop.f32.mrf.mxu0  ;;  %v1536_v62 = vpop.f32.mrf.mxu1 }
 0x55f   : > { %v1524_v43 = vadd.f32 %v1523_v30, %v6804_v18  ;;  %v1537_v34 = vadd.f32 %v1536_v62, %v6805_v9 }
 0x561   : > { %3880 = vst [vmem:[%s5710_s22 + $0xa0] sm:$0xff] %v1524_v43 }
 0x562   : > { %3881 = vst [vmem:[%s5710_s22 + $0xa8] sm:$0xff] %v1537_v34 }
 0x565   : > { %v1549_v37 = vpop.f32.mrf.mxu2  ;;  %v1562_v29 = vpop.f32.mrf.mxu3 }
 0x566   : > { %v1550_v55 = vadd.f32 %v1549_v37, %v6806_v56  ;;  %v1563_v35 = vadd.f32 %v1562_v29, %v6807_v16  ;;  %v1525_v36 = vpop.f32.mrf.mxu0  ;;  %v1538_v40 = vpop.f32.mrf.mxu1 }
 0x568   : > { %3882 = vst [vmem:[%s5710_s22 + $0xb0] sm:$0xff] %v1550_v55 }
 0x569   : > { %3883 = vst [vmem:[%s5710_s22 + $0xb8] sm:$0xff] %v1563_v35 }
 0x56d   : > { %v1551_v49 = vpop.f32.mrf.mxu2  ;;  %v1564_v53 = vpop.f32.mrf.mxu3 }
 0x56e   : > { %v1591_v57 = vpop.f32.mrf.mxu0  ;;  %v1604_v61 = vpop.f32.mrf.mxu1 }
 0x570   : > { %v3886_v44 = vld [vmem:[%s5609_s30 + $0xc0] sm:$0xff]  ;;  %v3887_v45 = vld [vmem:[%s5609_s30 + $0xc8] sm:$0xff]  ;;  %v3888_v27 = vld [vmem:[%s5609_s30 + $0xd0] sm:$0xff] }
 0x571   : > { %v1592_v52 = vadd.f32 %v3886_v44, %v1591_v57  ;;  %v1605_v25 = vadd.f32 %v3887_v45, %v1604_v61  ;;  %v3889_v21 = vld [vmem:[%s5609_s30 + $0xd8] sm:$0xff] }
 0x573   : > { %v1634_v63 = vmul.f32 0.5, %v1592_v52  ;;  %v1638_v33 = vmul.f32 0.5, %v1605_v25 }
 0x575   : > { %4717 = vtanh.f32 %v1634_v63  ;;  %v1617_v3 = vpop.f32.mrf.mxu2  ;;  %v1630_v6 = vpop.f32.mrf.mxu3 }
 0x576   : > { %4719 = vtanh.f32 %v1638_v33  ;;  %v1618_v22 = vadd.f32 %v3888_v27, %v1617_v3  ;;  %v1631_v24 = vadd.f32 %v3889_v21, %v1630_v6  ;;  %v1593_v38 = vpop.f32.mrf.mxu0  ;;  %v1606_v30 = vpop.f32.mrf.mxu1 }
 0x578   : > { %4721 = vtanh.f32 %v1618_v22  ;;  %v1643_v62 = vmul.f32 0.5, %v1631_v24 }
 0x57a   : > { %4723 = vtanh.f32 %v1643_v62 }
 0x57b   : > { %v4718_v43 = vpop.eup %4717 }
 0x57c   : > { %v4720_v34 = vpop.eup %4719  ;;  %v1636_v37 = vmul.f32 0.5, %v4718_v43 }
 0x57d   : > { %v1640_v29 = vmul.f32 0.5, %v4720_v34  ;;  %v1619_v36 = vpop.f32.mrf.mxu2  ;;  %v1632_v40 = vpop.f32.mrf.mxu3 }
 0x57e   : > { %v1637_v55 = vadd.f32 0.5, %v1636_v37  ;;  %v4722_v44 = vpop.eup %4721 }
 0x57f   : > { %v1641_v35 = vadd.f32 0.5, %v1640_v29 }
 0x580   : > { %v1648_v49 = vmul.f32 %v4722_v44, %v1637_v55  ;;  %v4724_v53 = vpop.eup %4723 }
 0x581   : > { %v1647_v45 = vmul.f32 %v1641_v35, %v6047_v31  ;;  %v1645_v61 = vmul.f32 0.5, %v4724_v53 }
 0x583   : > { %v6127_v57 = vadd.f32 %v1648_v49, %v1647_v45  ;;  %v1646_v52 = vadd.f32 0.5, %v1645_v61 }
 0x585   : > { %4725 = vtanh.f32 %v6127_v57 }
 0x58b   : > { %v4726_v25 = vpop.eup %4725 }
 0x58c   : > { %v1651_v63 = vmul.f32 %v4726_v25, %v1646_v52 }
 0x58e   : > { %v1652_v33 = vpack.c.bf16 %v1651_v63, %v1651_v63 }
 0x590   : > { %1661 = vmatmul.bf16.vlgmr.msrb.gmra.mxu0 %v1652_v33  ;;  %1674 = vmatmul.bf16.vlgmr.msrb.gmra.mxu1 %v1652_v33 }
 0x591   : > { %1687 = vmatmul.bf16.vlgmr.msrb.gmra.mxu2 %v1652_v33  ;;  %1700 = vmatmul.bf16.vlgmr.msrb.gmra.mxu3 %v1652_v33 }
 0x592   : > { %1792 = vmatpush.bf16.msrb.mxu0 %v5417_v26  ;;  %1805 = vmatpush.bf16.msrb.mxu1 %v5422_v11 }
 0x593   : > { %1818 = vmatpush.bf16.msrb.mxu2 %v5432_v23  ;;  %1831 = vmatpush.bf16.msrb.mxu3 %v5436_v39 }
 0x596   : > { %1793 = vmatpush.bf16.msrb.mxu0 %v5438_v41  ;;  %1806 = vmatpush.bf16.msrb.mxu1 %v5444_v50 }
 0x597   : > { %1819 = vmatpush.bf16.msrb.mxu2 %v5452_v1  ;;  %1832 = vmatpush.bf16.msrb.mxu3 %v5456_v2 }
 0x59a   : > { %1794 = vmatpush.bf16.msrb.mxu0 %v5458_v4  ;;  %1807 = vmatpush.bf16.msrb.mxu1 %v5464_v19 }
 0x59b   : > { %1820 = vmatpush.bf16.msrb.mxu2 %v5472_v13  ;;  %1833 = vmatpush.bf16.msrb.mxu3 %v5476_v14 }
 0x59e   : > { %1795 = vmatpush.bf16.msrb.mxu0 %v5478_v15  ;;  %1808 = vmatpush.bf16.msrb.mxu1 %v5483_v46 }
 0x59f   : > { %1821 = vmatpush.bf16.msrb.mxu2 %v5488_v51  ;;  %1834 = vmatpush.bf16.msrb.mxu3 %v5492_v54 }
 0x5a0   : > { %1729 = vmatmul.bf16.vlgmr.msra.gmra.mxu0 %v1652_v33  ;;  %1742 = vmatmul.bf16.vlgmr.msra.gmra.mxu1 %v1652_v33 }
 0x5a1   : > { %1755 = vmatmul.bf16.vlgmr.msra.gmra.mxu2 %v1652_v33  ;;  %1768 = vmatmul.bf16.vlgmr.msra.gmra.mxu3 %v1652_v33  ;;  %v4532_v33 = vld [vmem:[#allocation7 + $0xbe4] sm:$0xf] (%p321_p2) }
 0x5a2   : > { %1796 = vmatpush.bf16.msrb.mxu0 %v5503_v60  ;;  %1809 = vmatpush.bf16.msrb.mxu1 %v5508_v20 }
 0x5a3   : > { %1822 = vmatpush.bf16.msrb.mxu2 %v6661_v8  ;;  %1835 = vmatpush.bf16.msrb.mxu3 %v6662_v17 }
 0x5a6   : > { %1797 = vmatpush.bf16.msrb.mxu0 %v6663_v10  ;;  %1810 = vmatpush.bf16.msrb.mxu1 %v6664_v28 }
 0x5a7   : > { %1823 = vmatpush.bf16.msrb.mxu2 %v6665_v42  ;;  %1836 = vmatpush.bf16.msrb.mxu3 %v6666_v48 }
 0x5aa   : > { %1798 = vmatpush.bf16.msrb.mxu0 %v6667_v58  ;;  %1811 = vmatpush.bf16.msrb.mxu1 %v6668_v59 }
 0x5ab   : > { %1824 = vmatpush.bf16.msrb.mxu2 %v5561_v32  ;;  %1837 = vmatpush.bf16.msrb.mxu3 %v5566_v47 }
 0x5ae   : > { %1799 = vmatpush.bf16.msrb.mxu0 %v5574_v0  ;;  %1812 = vmatpush.bf16.msrb.mxu1 %v5580_v5 }
 0x5af   : > { %1825 = vmatpush.bf16.msrb.mxu2 %v5582_v7  ;;  %1838 = vmatpush.bf16.msrb.mxu3 %v5588_v12 }
 0x60d   : > { %v1662_v26 = vpop.f32.mrf.mxu0  ;;  %v1675_v11 = vpop.f32.mrf.mxu1 }
 0x60e   : > { %v1663_v23 = vadd.f32 %v1662_v26, %v6804_v18  ;;  %v1676_v39 = vadd.f32 %v1675_v11, %v6805_v9  ;;  %v4030_v11 = vld [vmem:[#allocation7 + $0xbe8] sm:$0xf] (%p321_p2) }
 0x610   : > { %3892 = vst [vmem:[%s5710_s22 + $0xc0] sm:$0xff] %v1663_v23 }
 0x611   : > { %3893 = vst [vmem:[%s5710_s22 + $0xc8] sm:$0xff] %v1676_v39 }
 0x614   : > { %v1688_v41 = vpop.f32.mrf.mxu2  ;;  %v1701_v50 = vpop.f32.mrf.mxu3 }
 0x615   : > { %v1689_v1 = vadd.f32 %v1688_v41, %v6806_v56  ;;  %v1702_v2 = vadd.f32 %v1701_v50, %v6807_v16  ;;  %v1664_v4 = vpop.f32.mrf.mxu0  ;;  %v1677_v19 = vpop.f32.mrf.mxu1  ;;  %v4533_v41 = vld [vmem:[#allocation7 + $0xbec] sm:$0xf] (%p321_p2)  ;;  %v4032_v50 = vld [vmem:[#allocation7 + $0xbf8] sm:$0xf0] (%p321_p2) }
 0x616   :  { %v4530_v4 = vld [vmem:[#allocation7 + $0xbcc] sm:$0xf0] (%p321_p2)  ;;  %v4528_v19 = vld [vmem:[#allocation7 + $0xbc4] sm:$0xf] (%p321_p2) }
 0x617   : > { %3894 = vst [vmem:[%s5710_s22 + $0xd0] sm:$0xff] %v1689_v1  ;;  %v4006_v1 = vld [vmem:[#allocation7 + $0xbc0] sm:$0xf] (%p321_p2) }
 0x618   : > { %3895 = vst [vmem:[%s5710_s22 + $0xd8] sm:$0xff] %v1702_v2  ;;  %v6193_v2 = vor.u32 (%p321_p2), %v4533_v41, %v4032_v50 }
 0x61a   :  { %2089 = vmatpush.bf16.msra.mxu3 (%p321_p2), %v6193_v2 }
 0x61c   : > { %v1690_v15 = vpop.f32.mrf.mxu2  ;;  %v1703_v46 = vpop.f32.mrf.mxu3 }
 0x61d   : > { %v1730_v51 = vpop.f32.mrf.mxu0  ;;  %v1743_v54 = vpop.f32.mrf.mxu1  ;;  %v4014_v46 = vld [vmem:[#allocation7 + $0xbc8] sm:$0xf] (%p321_p2) }
 0x61f   : > { %v3898_v13 = vld [vmem:[%s5609_s30 + $0xe0] sm:$0xff]  ;;  %v3899_v14 = vld [vmem:[%s5609_s30 + $0xe8] sm:$0xff]  ;;  %v3900_v32 = vld [vmem:[%s5609_s30 + $0xf0] sm:$0xff] }
 0x620   : > { %v1731_v60 = vadd.f32 %v3898_v13, %v1730_v51  ;;  %v1744_v20 = vadd.f32 %v3899_v14, %v1743_v54  ;;  %v3901_v47 = vld [vmem:[%s5609_s30 + $0xf8] sm:$0xff]  ;;  %v6197_v14 = vor.u32 (%p321_p2), %v4530_v4, %v4006_v1  ;;  %v4529_v54 = vld [vmem:[#allocation7 + $0xbcc] sm:$0xf] (%p321_p2)  ;;  %v4510_v1 = vld [vmem:[#allocation7 + $0xb2c] sm:$0xf0] (%p321_p2) }
 0x621   :  { %v4008_v13 = vld [vmem:[#allocation7 + $0xbd0] sm:$0xf0] (%p321_p2)  ;;  %v4531_v51 = vld [vmem:[#allocation7 + $0xbd4] sm:$0xf0] (%p321_p2)  ;;  %v4508_v4 = vld [vmem:[#allocation7 + $0xb24] sm:$0xf] (%p321_p2) }
 0x622   : > { %v1773_v12 = vmul.f32 0.5, %v1731_v60  ;;  %v1777_v5 = vmul.f32 0.5, %v1744_v20  ;;  %v6199_v15 = vor.u32 (%p321_p2), %v4528_v19, %v4008_v13  ;;  %v6202_v60 = vor.u32 (%p321_p2), %v4531_v51, %v4014_v46  ;;  %v4016_v20 = vld [vmem:[#allocation7 + $0xbd8] sm:$0xf0] (%p321_p2)  ;;  %v3928_v19 = vld [vmem:[#allocation7 + $0xb30] sm:$0xf0] (%p321_p2) }
 0x623   :  { %v3934_v46 = vld [vmem:[#allocation7 + $0xb28] sm:$0xf] (%p321_p2)  ;;  %v4511_v51 = vld [vmem:[#allocation7 + $0xb34] sm:$0xf0] (%p321_p2) }
 0x624   : > { %4727 = vtanh.f32 %v1773_v12  ;;  %v1756_v0 = vpop.f32.mrf.mxu2  ;;  %v1769_v7 = vpop.f32.mrf.mxu3  ;;  %v3990_v12 = vld [vmem:[#allocation7 + $0xba0] sm:$0xf] (%p321_p2) }
 0x625   : > { %4729 = vtanh.f32 %v1777_v5  ;;  %v1757_v8 = vadd.f32 %v3900_v32, %v1756_v0  ;;  %v1770_v17 = vadd.f32 %v3901_v47, %v1769_v7  ;;  %v1732_v10 = vpop.f32.mrf.mxu0  ;;  %v1745_v28 = vpop.f32.mrf.mxu1  ;;  %v4526_v5 = vld [vmem:[#allocation7 + $0xbac] sm:$0xf0] (%p321_p2)  ;;  %v6204_v32 = vor.u32 (%p321_p2), %v4529_v54, %v4016_v20  ;;  %v4524_v47 = vld [vmem:[#allocation7 + $0xba4] sm:$0xf] (%p321_p2)  ;;  %v3992_v0 = vld [vmem:[#allocation7 + $0xbb0] sm:$0xf0] (%p321_p2) }
 0x626   :  { %v3998_v7 = vld [vmem:[#allocation7 + $0xba8] sm:$0xf] (%p321_p2)  ;;  %v4525_v10 = vld [vmem:[#allocation7 + $0xbac] sm:$0xf] (%p321_p2)  ;;  %v4000_v28 = vld [vmem:[#allocation7 + $0xbb8] sm:$0xf0] (%p321_p2) }
 0x627   : > { %4731 = vtanh.f32 %v1757_v8  ;;  %v1782_v42 = vmul.f32 0.5, %v1770_v17  ;;  %v6207_v8 = vor.u32 (%p321_p2), %v4526_v5, %v3990_v12  ;;  %v4527_v17 = vld [vmem:[#allocation7 + $0xbb4] sm:$0xf0] (%p321_p2)  ;;  %2090 = vmatpush.bf16.msra.mxu3 (%p321_p2), %v6204_v32  ;;  %v4509_v54 = vld [vmem:[#allocation7 + $0xb2c] sm:$0xf] (%p321_p2)  ;;  %v6259_v5 = vor.u32 (%p321_p2), %v4508_v4, %v3928_v19 }
 0x628   :  { %v3936_v20 = vld [vmem:[#allocation7 + $0xb38] sm:$0xf0] (%p321_p2) }
 0x629   : > { %4733 = vtanh.f32 %v1782_v42  ;;  %v6211_v42 = vor.u32 (%p321_p2), %v4524_v47, %v3992_v0  ;;  %v6261_v47 = vor.u32 (%p321_p2), %v4511_v51, %v3934_v46  ;;  %v3910_v0 = vld [vmem:[#allocation7 + $0xb00] sm:$0xf] (%p321_p2) }
 0x62a   : > { %v4728_v48 = vpop.eup %4727 }
 0x62b   : > { %v4730_v58 = vpop.eup %4729  ;;  %v1775_v59 = vmul.f32 0.5, %v4728_v48  ;;  %v6213_v48 = vor.u32 (%p321_p2), %v4527_v17, %v3998_v7  ;;  %v4506_v7 = vld [vmem:[#allocation7 + $0xb0c] sm:$0xf0] (%p321_p2)  ;;  %v4504_v17 = vld [vmem:[#allocation7 + $0xb04] sm:$0xf] (%p321_p2) }
 0x62c   : > { %v1779_v31 = vmul.f32 0.5, %v4730_v58  ;;  %v1758_v3 = vpop.f32.mrf.mxu2  ;;  %v1771_v6 = vpop.f32.mrf.mxu3  ;;  %v3974_v58 = vld [vmem:[#allocation7 + $0xb80] sm:$0xf] (%p321_p2) }
 0x62d   : > { %v1776_v27 = vadd.f32 0.5, %v1775_v59  ;;  %v4732_v22 = vpop.eup %4731  ;;  %v4522_v59 = vld [vmem:[#allocation7 + $0xb8c] sm:$0xf0] (%p321_p2)  ;;  %v3982_v3 = vld [vmem:[#allocation7 + $0xb88] sm:$0xf] (%p321_p2) }
 0x62e   : > { %v1780_v21 = vadd.f32 0.5, %v1779_v31  ;;  %v4520_v31 = vld [vmem:[#allocation7 + $0xb84] sm:$0xf] (%p321_p2)  ;;  %v4523_v6 = vld [vmem:[#allocation7 + $0xb94] sm:$0xf0] (%p321_p2) }
 0x62f   : > { %v1787_v38 = vmul.f32 %v4732_v22, %v1776_v27  ;;  %v4734_v30 = vpop.eup %4733  ;;  %v6216_v27 = vor.u32 (%p321_p2), %v4525_v10, %v4000_v28  ;;  %v4521_v22 = vld [vmem:[#allocation7 + $0xb8c] sm:$0xf] (%p321_p2)  ;;  %v6264_v10 = vor.u32 (%p321_p2), %v4509_v54, %v3936_v20  ;;  %v3912_v28 = vld [vmem:[#allocation7 + $0xb10] sm:$0xf0] (%p321_p2) }
 0x630   : > { %v1786_v24 = vmul.f32 %v1780_v21, %v6127_v57  ;;  %v1784_v43 = vmul.f32 0.5, %v4734_v30  ;;  %v3976_v21 = vld [vmem:[#allocation7 + $0xb90] sm:$0xf0] (%p321_p2) }
 0x631   :  { %v6223_v30 = vor.u32 (%p321_p2), %v4520_v31, %v3976_v21  ;;  %2091 = vmatpush.bf16.msra.mxu3 (%p321_p2), %v6216_v27  ;;  %v4505_v31 = vld [vmem:[#allocation7 + $0xb0c] sm:$0xf] (%p321_p2)  ;;  %v3920_v21 = vld [vmem:[#allocation7 + $0xb18] sm:$0xf0] (%p321_p2) }
 0x632   : > { %v1788_v62 = vadd.f32 %v1787_v38, %v1786_v24  ;;  %v1785_v34 = vadd.f32 0.5, %v1784_v43  ;;  %v3984_v24 = vld [vmem:[#allocation7 + $0xb98] sm:$0xf0] (%p321_p2)  ;;  %v6219_v38 = vor.u32 (%p321_p2), %v4522_v59, %v3974_v58  ;;  %v3958_v43 = vld [vmem:[#allocation7 + $0xb60] sm:$0xf] (%p321_p2) }
 0x633   :  { %v3918_v58 = vld [vmem:[#allocation7 + $0xb08] sm:$0xf] (%p321_p2)  ;;  %v4507_v59 = vld [vmem:[#allocation7 + $0xb14] sm:$0xf0] (%p321_p2) }
 0x634   : > { %4735 = vtanh.f32 %v1788_v62  ;;  %v6225_v62 = vor.u32 (%p321_p2), %v4523_v6, %v3982_v3  ;;  %v6267_v3 = vor.u32 (%p321_p2), %v4506_v7, %v3910_v0  ;;  %v6271_v6 = vor.u32 (%p321_p2), %v4504_v17, %v3912_v28 }
 0x63a   : > { %v4736_v37 = vpop.eup %4735 }
 0x63b   : > { %v1790_v29 = vmul.f32 %v4736_v37, %v1785_v34  ;;  %v4518_v34 = vld [vmem:[#allocation7 + $0xb6c] sm:$0xf0] (%p321_p2)  ;;  %v4516_v37 = vld [vmem:[#allocation7 + $0xb64] sm:$0xf] (%p321_p2) }
 0x63d   : > { %v1791_v55 = vpack.c.bf16 %v1790_v29, %v1790_v29  ;;  %v6228_v29 = vor.u32 (%p321_p2), %v4521_v22, %v3984_v24  ;;  %v6273_v22 = vor.u32 (%p321_p2), %v4507_v59, %v3918_v58  ;;  %v6276_v24 = vor.u32 (%p321_p2), %v4505_v31, %v3920_v21 }
 0x63f   : > { %1800 = vmatmul.bf16.vlgmr.msrb.gmra.mxu0 %v1791_v55  ;;  %1813 = vmatmul.bf16.vlgmr.msrb.gmra.mxu1 %v1791_v55 }
 0x640   : > { %1826 = vmatmul.bf16.vlgmr.msrb.gmra.mxu2 %v1791_v55  ;;  %1839 = vmatmul.bf16.vlgmr.msrb.gmra.mxu3 %v1791_v55  ;;  %v3960_v55 = vld [vmem:[#allocation7 + $0xb70] sm:$0xf0] (%p321_p2) }
 0x641   :  { %2092 = vmatpush.bf16.msra.mxu3 (%p321_p2), %v6228_v29 }
 0x6bc   : > { %v1801_v35 = vpop.f32.mrf.mxu0  ;;  %v1814_v36 = vpop.f32.mrf.mxu1 }
 0x6bd   : > { %v1802_v40 = vadd.f32 %v1801_v35, %v6804_v18  ;;  %v1815_v44 = vadd.f32 %v1814_v36, %v6805_v9  ;;  %v4022_v18 = vld [vmem:[#allocation7 + $0xbe0] sm:$0xf] (%p321_p2)  ;;  %v4534_v9 = vld [vmem:[#allocation7 + $0xbec] sm:$0xf0] (%p321_p2)  ;;  %v3966_v35 = vld [vmem:[#allocation7 + $0xb68] sm:$0xf] (%p321_p2) }
 0x6be   :  { %v6186_v26 = vor.u32 (%p321_p2), %v4534_v9, %v4022_v18  ;;  %v4519_v36 = vld [vmem:[#allocation7 + $0xb74] sm:$0xf0] (%p321_p2)  ;;  %v3950_v18 = vld [vmem:[#allocation7 + $0xb48] sm:$0xf] (%p321_p2) }
 0x6bf   : > { %3904 = vst [vmem:[%s5710_s22 + $0xe0] sm:$0xff] %v1802_v40  ;;  %v4517_v40 = vld [vmem:[#allocation7 + $0xb6c] sm:$0xf] (%p321_p2)  ;;  %v4515_v9 = vld [vmem:[#allocation7 + $0xb54] sm:$0xf0] (%p321_p2) }
 0x6c0   : > { %3905 = vst [vmem:[%s5710_s22 + $0xe8] sm:$0xff] %v1815_v44  ;;  %2050 = vmatpush.bf16.msra.mxu0 (%p321_p2), %v6186_v26  ;;  %v3968_v44 = vld [vmem:[#allocation7 + $0xb78] sm:$0xf0] (%p321_p2)  ;;  %v6249_v50 = vor.u32 (%p321_p2), %v4515_v9, %v3950_v18 }
 0x6c3   : > { %v1827_v45 = vpop.f32.mrf.mxu2  ;;  %v1840_v49 = vpop.f32.mrf.mxu3 }
 0x6c4   : > { %v1828_v53 = vadd.f32 %v1827_v45, %v6806_v56  ;;  %v1841_v57 = vadd.f32 %v1840_v49, %v6807_v16  ;;  %v1803_v61 = vpop.f32.mrf.mxu0  ;;  %v1816_v52 = vpop.f32.mrf.mxu1  ;;  %v4024_v56 = vld [vmem:[#allocation7 + $0xbf0] sm:$0xf0] (%p321_p2)  ;;  %v4535_v16 = vld [vmem:[#allocation7 + $0xbf4] sm:$0xf0] (%p321_p2)  ;;  %2051 = vmatpush.bf16.msra.mxu0 (%p321_p2), %v6197_v14  ;;  %v6231_v45 = vor.u32 (%p321_p2), %v4518_v34, %v3958_v43  ;;  %v6235_v49 = vor.u32 (%p321_p2), %v4516_v37, %v3960_v55 }
 0x6c5   :  { %v6188_v23 = vor.u32 (%p321_p2), %v4532_v33, %v4024_v56  ;;  %v6190_v39 = vor.u32 (%p321_p2), %v4535_v16, %v4030_v11  ;;  %v4514_v61 = vld [vmem:[#allocation7 + $0xb4c] sm:$0xf0] (%p321_p2)  ;;  %v4512_v52 = vld [vmem:[#allocation7 + $0xb44] sm:$0xf] (%p321_p2)  ;;  %v4513_v33 = vld [vmem:[#allocation7 + $0xb4c] sm:$0xf] (%p321_p2) }
 0x6c6   : > { %3906 = vst [vmem:[%s5710_s22 + $0xf0] sm:$0xff] %v1828_v53  ;;  %v6237_v53 = vor.u32 (%p321_p2), %v4519_v36, %v3966_v35  ;;  %v3952_v56 = vld [vmem:[#allocation7 + $0xb58] sm:$0xf0] (%p321_p2)  ;;  %v3926_v16 = vld [vmem:[#allocation7 + $0xb20] sm:$0xf] (%p321_p2)  ;;  %v6808_v43 = vmov (%p321_p2), 0  }
 0x6c7   : > { %3907 = vst [vmem:[%s5710_s22 + $0xf8] sm:$0xff] %v1841_v57  ;;  %323 = sbr.rel (!%p321_p2) target bundleno = 180 (0xb4), region = 127  ;;  %2063 = vmatpush.bf16.msra.mxu1 (%p321_p2), %v6188_v23  ;;  %2076 = vmatpush.bf16.msra.mxu2 (%p321_p2), %v6190_v39  ;;  %v3942_v57 = vld [vmem:[#allocation7 + $0xb40] sm:$0xf] (%p321_p2)  ;;  %v6252_v13 = vor.u32 (%p321_p2), %v4513_v33, %v3952_v56  ;;  %v6255_v12 = vor.u32 (%p321_p2), %v4510_v1, %v3926_v16 }
 0x6c8   :  { %2052 = vmatpush.bf16.msra.mxu0 (%p321_p2), %v6207_v8  ;;  %v6243_v11 = vor.u32 (%p321_p2), %v4514_v61, %v3942_v57 }
 0x6cb   : > { %v1829_v25 = vpop.f32.mrf.mxu2  ;;  %v1842_v63 = vpop.f32.mrf.mxu3  ;;  %2064 = vmatpush.bf16.msra.mxu1 (%p321_p2), %v6199_v15  ;;  %2077 = vmatpush.bf16.msra.mxu2 (%p321_p2), %v6202_v60 }
 0x6cc   :  { %2053 = vmatpush.bf16.msra.mxu0 %v6219_v38  ;;  %v6240_v25 = vor.u32 %v4517_v40, %v3968_v44  ;;  %v3944_v63 = vld [vmem:[#allocation7 + $0xb50] sm:$0xf0] }
 0x6cd   :  { %v6247_v41 = vor.u32 %v4512_v52, %v3944_v63 }
 0x6ce   :  { %2093 = vmatpush.bf16.msra.mxu3 %v6240_v25  ;;  %v1886_v34 = vld [vmem:[#allocation2 + $0x100] sm:$0xff]  ;;  %v1887_v37 = vld [vmem:[#allocation2 + $0x108] sm:$0xff]  ;;  %v1888_v61 = vld [vmem:[#allocation2 + $0x110] sm:$0xff] }
 0x6cf   :  { %2065 = vmatpush.bf16.msra.mxu1 %v6211_v42  ;;  %2078 = vmatpush.bf16.msra.mxu2 %v6213_v48  ;;  %v1889_v52 = vld [vmem:[#allocation2 + $0x118] sm:$0xff] }
 0x6d0   :  { %2054 = vmatpush.bf16.msra.mxu0 %v6231_v45 }
 0x6d2   :  { %2094 = vmatpush.bf16.msra.mxu3 %v6252_v13 }
 0x6d3   :  { %2066 = vmatpush.bf16.msra.mxu1 %v6223_v30  ;;  %2079 = vmatpush.bf16.msra.mxu2 %v6225_v62 }
 0x6d4   :  { %2055 = vmatpush.bf16.msra.mxu0 %v6243_v11 }
 0x6d6   :  { %2095 = vmatpush.bf16.msra.mxu3 %v6264_v10 }
 0x6d7   :  { %2067 = vmatpush.bf16.msra.mxu1 %v6235_v49  ;;  %2080 = vmatpush.bf16.msra.mxu2 %v6237_v53 }
 0x6d8   :  { %2056 = vmatpush.bf16.msra.mxu0 %v6255_v12 }
 0x6da   :  { %2096 = vmatpush.bf16.msra.mxu3 %v6276_v24 }
 0x6db   :  { %2068 = vmatpush.bf16.msra.mxu1 %v6247_v41  ;;  %2081 = vmatpush.bf16.msra.mxu2 %v6249_v50 }
 0x6dc   :  { %2057 = vmatpush.bf16.msra.mxu0 %v6267_v3 }
 0x6dd   :  { %2097 = vmatmul.bf16.vlgmr.msra.gmra.mxu3 %v6808_v43 }
 0x6de   :  { %2165 = vmatpush.bf16.msrb.mxu3 %v6193_v2 }
 0x6df   :  { %2069 = vmatpush.bf16.msra.mxu1 %v6259_v5  ;;  %2082 = vmatpush.bf16.msra.mxu2 %v6261_v47 }
 0x6e0   :  { %2126 = vmatpush.bf16.msrb.mxu0 %v6186_v26 }
 0x6e1   :  { %2058 = vmatmul.bf16.vlgmr.msra.gmra.mxu0 %v6808_v43 }
 0x6e2   :  { %2166 = vmatpush.bf16.msrb.mxu3 %v6204_v32 }
 0x6e3   :  { %2070 = vmatpush.bf16.msra.mxu1 %v6271_v6  ;;  %2083 = vmatpush.bf16.msra.mxu2 %v6273_v22 }
 0x6e4   :  { %2127 = vmatpush.bf16.msrb.mxu0 %v6197_v14 }
 0x6e6   :  { %2071 = vmatmul.bf16.vlgmr.msra.gmra.mxu1 %v6808_v43  ;;  %2084 = vmatmul.bf16.vlgmr.msra.gmra.mxu2 %v6808_v43 }
 0x6e7   :  { %2139 = vmatpush.bf16.msrb.mxu1 %v6188_v23  ;;  %2152 = vmatpush.bf16.msrb.mxu2 %v6190_v39 }
 0x6e8   :  { %2128 = vmatpush.bf16.msrb.mxu0 %v6207_v8  ;;  %2167 = vmatpush.bf16.msrb.mxu3 %v6216_v27 }
 0x6eb   :  { %2140 = vmatpush.bf16.msrb.mxu1 %v6199_v15  ;;  %2153 = vmatpush.bf16.msrb.mxu2 %v6202_v60 }
 0x6ec   :  { %2129 = vmatpush.bf16.msrb.mxu0 %v6219_v38  ;;  %2168 = vmatpush.bf16.msrb.mxu3 %v6228_v29 }
 0x6ef   :  { %2141 = vmatpush.bf16.msrb.mxu1 %v6211_v42  ;;  %2154 = vmatpush.bf16.msrb.mxu2 %v6213_v48 }
 0x6f0   :  { %2130 = vmatpush.bf16.msrb.mxu0 %v6231_v45  ;;  %2169 = vmatpush.bf16.msrb.mxu3 %v6240_v25 }
 0x6f3   :  { %2142 = vmatpush.bf16.msrb.mxu1 %v6223_v30  ;;  %2155 = vmatpush.bf16.msrb.mxu2 %v6225_v62 }
 0x6f4   :  { %2131 = vmatpush.bf16.msrb.mxu0 %v6243_v11  ;;  %2170 = vmatpush.bf16.msrb.mxu3 %v6252_v13 }
 0x6f7   :  { %2143 = vmatpush.bf16.msrb.mxu1 %v6235_v49  ;;  %2156 = vmatpush.bf16.msrb.mxu2 %v6237_v53 }
 0x6f8   :  { %2132 = vmatpush.bf16.msrb.mxu0 %v6255_v12  ;;  %2171 = vmatpush.bf16.msrb.mxu3 %v6264_v10 }
 0x6fb   :  { %2144 = vmatpush.bf16.msrb.mxu1 %v6247_v41  ;;  %2157 = vmatpush.bf16.msrb.mxu2 %v6249_v50 }
 0x6fc   :  { %2133 = vmatpush.bf16.msrb.mxu0 %v6267_v3  ;;  %2172 = vmatpush.bf16.msrb.mxu3 %v6276_v24 }
 0x6ff   :  { %2145 = vmatpush.bf16.msrb.mxu1 %v6259_v5  ;;  %2158 = vmatpush.bf16.msrb.mxu2 %v6261_v47 }
 0x700   :  { %2202 = vmatpush.bf16.msra.mxu0 %v6186_v26  ;;  %2241 = vmatpush.bf16.msra.mxu3 %v6193_v2 }
 0x703   :  { %2146 = vmatpush.bf16.msrb.mxu1 %v6271_v6  ;;  %2159 = vmatpush.bf16.msrb.mxu2 %v6273_v22 }
 0x704   :  { %2203 = vmatpush.bf16.msra.mxu0 %v6197_v14  ;;  %2242 = vmatpush.bf16.msra.mxu3 %v6204_v32 }
 0x707   :  { %2215 = vmatpush.bf16.msra.mxu1 %v6188_v23  ;;  %2228 = vmatpush.bf16.msra.mxu2 %v6190_v39 }
 0x708   :  { %2204 = vmatpush.bf16.msra.mxu0 %v6207_v8  ;;  %2243 = vmatpush.bf16.msra.mxu3 %v6216_v27 }
 0x70b   :  { %2216 = vmatpush.bf16.msra.mxu1 %v6199_v15  ;;  %2229 = vmatpush.bf16.msra.mxu2 %v6202_v60 }
 0x70c   :  { %2205 = vmatpush.bf16.msra.mxu0 %v6219_v38  ;;  %2244 = vmatpush.bf16.msra.mxu3 %v6228_v29 }
 0x70f   :  { %2217 = vmatpush.bf16.msra.mxu1 %v6211_v42  ;;  %2230 = vmatpush.bf16.msra.mxu2 %v6213_v48 }
 0x710   :  { %2206 = vmatpush.bf16.msra.mxu0 %v6231_v45  ;;  %2245 = vmatpush.bf16.msra.mxu3 %v6240_v25 }
 0x713   :  { %2218 = vmatpush.bf16.msra.mxu1 %v6223_v30  ;;  %2231 = vmatpush.bf16.msra.mxu2 %v6225_v62 }
 0x714   :  { %2207 = vmatpush.bf16.msra.mxu0 %v6243_v11  ;;  %2246 = vmatpush.bf16.msra.mxu3 %v6252_v13 }
 0x717   :  { %2219 = vmatpush.bf16.msra.mxu1 %v6235_v49  ;;  %2232 = vmatpush.bf16.msra.mxu2 %v6237_v53 }
 0x718   :  { %2208 = vmatpush.bf16.msra.mxu0 %v6255_v12  ;;  %2247 = vmatpush.bf16.msra.mxu3 %v6264_v10 }
 0x71b   :  { %2220 = vmatpush.bf16.msra.mxu1 %v6247_v41  ;;  %2233 = vmatpush.bf16.msra.mxu2 %v6249_v50 }
 0x71c   :  { %2209 = vmatpush.bf16.msra.mxu0 %v6267_v3  ;;  %2248 = vmatpush.bf16.msra.mxu3 %v6276_v24 }
 0x71f   :  { %2221 = vmatpush.bf16.msra.mxu1 %v6259_v5  ;;  %2234 = vmatpush.bf16.msra.mxu2 %v6261_v47 }
 0x723   :  { %2222 = vmatpush.bf16.msra.mxu1 %v6271_v6  ;;  %2235 = vmatpush.bf16.msra.mxu2 %v6273_v22 }
 0x75e   :  { %v2059_v55 = vpop.f32.mrf.mxu0 }
 0x75f   :  { %v2060_v35 = vadd.f32 %v2059_v55, %v1886_v34 }
 0x760   :  { %v2098_v9 = vpop.f32.mrf.mxu3 }
 0x761   :  { %v2102_v44 = vmul.f32 0.5, %v2060_v35  ;;  %v2099_v56 = vadd.f32 %v2098_v9, %v1889_v52  ;;  %v2122_v35 = vld [vmem:[#allocation2 + $0x120] sm:$0xff]  ;;  %v2125_v9 = vld [vmem:[#allocation2 + $0x138] sm:$0xff] }
 0x763   :  { %v2072_v36 = vpop.f32.mrf.mxu1  ;;  %4738 = vtanh.f32 %v2102_v44  ;;  %v2111_v4 = vmul.f32 0.5, %v2099_v56 }
 0x764   :  { %v2073_v40 = vadd.f32 %v2072_v36, %v1887_v37  ;;  %v2123_v36 = vld [vmem:[#allocation2 + $0x128] sm:$0xff] }
 0x766   :  { %v2106_v57 = vmul.f32 0.5, %v2073_v40  ;;  %v2061_v33 = vpop.f32.mrf.mxu0 }
 0x768   :  { %4740 = vtanh.f32 %v2106_v57  ;;  %v2100_v17 = vpop.f32.mrf.mxu3 }
 0x769   :  { %v2085_v63 = vpop.f32.mrf.mxu2  ;;  %v4739_v1 = vpop.eup %4738 }
 0x76a   :  { %v2086_v18 = vadd.f32 %v2085_v63, %v1888_v61  ;;  %v2104_v46 = vmul.f32 0.5, %v4739_v1 }
 0x76b   :  { %v2074_v16 = vpop.f32.mrf.mxu1 }
 0x76c   :  { %4742 = vtanh.f32 %v2086_v18  ;;  %v2105_v54 = vadd.f32 0.5, %v2104_v46  ;;  %v2124_v18 = vld [vmem:[#allocation2 + $0x130] sm:$0xff] }
 0x76d   :  { %4744 = vtanh.f32 %v2111_v4 }
 0x76e   :  { %v4741_v19 = vpop.eup %4740 }
 0x76f   :  { %v2108_v51 = vmul.f32 0.5, %v4741_v19 }
 0x771   :  { %v2109_v20 = vadd.f32 0.5, %v2108_v51  ;;  %v2087_v0 = vpop.f32.mrf.mxu2 }
 0x772   :  { %v4743_v7 = vpop.eup %4742 }
 0x773   :  { %v2115_v28 = vmul.f32 0.0, %v2109_v20  ;;  %v2116_v58 = vmul.f32 %v4743_v7, %v2105_v54  ;;  %v4745_v59 = vpop.eup %4744 }
 0x774   :  { %v2113_v21 = vmul.f32 0.5, %v4745_v59 }
 0x775   :  { %v6350_v31 = vadd.f32 %v2116_v58, %v2115_v28 }
 0x776   :  { %v2114_v43 = vadd.f32 0.5, %v2113_v21 }
 0x777   :  { %4746 = vtanh.f32 %v6350_v31 }
 0x77d   :  { %v4747_v34 = vpop.eup %4746 }
 0x77e   :  { %v2119_v37 = vmul.f32 %v4747_v34, %v2114_v43 }
 0x780   :  { %v2120_v55 = vpack.c.bf16 %v2119_v37, %v2119_v37 }
 0x782   :  { %2134 = vmatmul.bf16.vlgmr.msrb.gmra.mxu0 %v2120_v55  ;;  %2147 = vmatmul.bf16.vlgmr.msrb.gmra.mxu1 %v2120_v55 }
 0x783   :  { %2160 = vmatmul.bf16.vlgmr.msrb.gmra.mxu2 %v2120_v55  ;;  %2173 = vmatmul.bf16.vlgmr.msrb.gmra.mxu3 %v2120_v55 }
 0x784   :  { %2278 = vmatpush.bf16.msrb.mxu0 %v6186_v26  ;;  %2291 = vmatpush.bf16.msrb.mxu1 %v6188_v23 }
 0x785   :  { %2304 = vmatpush.bf16.msrb.mxu2 %v6190_v39  ;;  %2317 = vmatpush.bf16.msrb.mxu3 %v6193_v2 }
 0x788   :  { %2279 = vmatpush.bf16.msrb.mxu0 %v6197_v14  ;;  %2292 = vmatpush.bf16.msrb.mxu1 %v6199_v15 }
 0x789   :  { %2305 = vmatpush.bf16.msrb.mxu2 %v6202_v60  ;;  %2318 = vmatpush.bf16.msrb.mxu3 %v6204_v32 }
 0x78c   :  { %2280 = vmatpush.bf16.msrb.mxu0 %v6207_v8  ;;  %2293 = vmatpush.bf16.msrb.mxu1 %v6211_v42 }
 0x78d   :  { %2306 = vmatpush.bf16.msrb.mxu2 %v6213_v48  ;;  %2319 = vmatpush.bf16.msrb.mxu3 %v6216_v27 }
 0x790   :  { %2281 = vmatpush.bf16.msrb.mxu0 %v6219_v38  ;;  %2294 = vmatpush.bf16.msrb.mxu1 %v6223_v30 }
 0x791   :  { %2307 = vmatpush.bf16.msrb.mxu2 %v6225_v62  ;;  %2320 = vmatpush.bf16.msrb.mxu3 %v6228_v29 }
 0x794   :  { %2282 = vmatpush.bf16.msrb.mxu0 %v6231_v45  ;;  %2295 = vmatpush.bf16.msrb.mxu1 %v6235_v49 }
 0x795   :  { %2308 = vmatpush.bf16.msrb.mxu2 %v6237_v53  ;;  %2321 = vmatpush.bf16.msrb.mxu3 %v6240_v25 }
 0x798   :  { %2283 = vmatpush.bf16.msrb.mxu0 %v6243_v11  ;;  %2296 = vmatpush.bf16.msrb.mxu1 %v6247_v41 }
 0x799   :  { %2309 = vmatpush.bf16.msrb.mxu2 %v6249_v50  ;;  %2322 = vmatpush.bf16.msrb.mxu3 %v6252_v13 }
 0x79c   :  { %2284 = vmatpush.bf16.msrb.mxu0 %v6255_v12  ;;  %2297 = vmatpush.bf16.msrb.mxu1 %v6259_v5 }
 0x79d   :  { %2310 = vmatpush.bf16.msrb.mxu2 %v6261_v47  ;;  %2323 = vmatpush.bf16.msrb.mxu3 %v6264_v10 }
 0x7a0   :  { %2285 = vmatpush.bf16.msrb.mxu0 %v6267_v3  ;;  %2298 = vmatpush.bf16.msrb.mxu1 %v6271_v6 }
 0x7a1   :  { %2311 = vmatpush.bf16.msrb.mxu2 %v6273_v22  ;;  %2324 = vmatpush.bf16.msrb.mxu3 %v6276_v24 }
 0x7ff   :  { %v2135_v40 = vpop.f32.mrf.mxu0  ;;  %v2148_v44 = vpop.f32.mrf.mxu1 }
 0x800   :  { %v2136_v57 = vadd.f32 %v2135_v40, %v2122_v35  ;;  %v2149_v61 = vadd.f32 %v2148_v44, %v2123_v36 }
 0x802   :  { %v2178_v52 = vmul.f32 0.5, %v2136_v57  ;;  %v2182_v63 = vmul.f32 0.5, %v2149_v61  ;;  %v2199_v57 = vld [vmem:[#allocation2 + $0x148] sm:$0xff] }
 0x804   :  { %4748 = vtanh.f32 %v2178_v52 }
 0x805   :  { %4750 = vtanh.f32 %v2182_v63 }
 0x806   :  { %v2161_v33 = vpop.f32.mrf.mxu2  ;;  %v2174_v56 = vpop.f32.mrf.mxu3 }
 0x807   :  { %v2162_v16 = vadd.f32 %v2161_v33, %v2124_v18  ;;  %v2175_v1 = vadd.f32 %v2174_v56, %v2125_v9  ;;  %v2137_v4 = vpop.f32.mrf.mxu0  ;;  %v2150_v19 = vpop.f32.mrf.mxu1  ;;  %v2200_v56 = vld [vmem:[#allocation2 + $0x150] sm:$0xff] }
 0x809   :  { %4752 = vtanh.f32 %v2162_v16  ;;  %v2187_v46 = vmul.f32 0.5, %v2175_v1  ;;  %v2201_v16 = vld [vmem:[#allocation2 + $0x158] sm:$0xff] }
 0x80a   :  { %v4749_v51 = vpop.eup %4748 }
 0x80b   :  { %v4751_v54 = vpop.eup %4750  ;;  %v2180_v20 = vmul.f32 0.5, %v4749_v51  ;;  %4754 = vtanh.f32 %v2187_v46 }
 0x80c   :  { %v2184_v0 = vmul.f32 0.5, %v4751_v54 }
 0x80d   :  { %v2181_v7 = vadd.f32 0.5, %v2180_v20 }
 0x80e   :  { %v2185_v17 = vadd.f32 0.5, %v2184_v0  ;;  %v2163_v28 = vpop.f32.mrf.mxu2  ;;  %v2176_v58 = vpop.f32.mrf.mxu3 }
 0x80f   :  { %v4753_v59 = vpop.eup %4752 }
 0x810   :  { %v2191_v21 = vmul.f32 %v2185_v17, %v6350_v31  ;;  %v2192_v43 = vmul.f32 %v4753_v59, %v2181_v7  ;;  %v2198_v31 = vld [vmem:[#allocation2 + $0x140] sm:$0xff] }
 0x811   :  { %v4755_v34 = vpop.eup %4754 }
 0x812   :  { %v6386_v37 = vadd.f32 %v2192_v43, %v2191_v21  ;;  %v2189_v55 = vmul.f32 0.5, %v4755_v34 }
 0x814   :  { %4756 = vtanh.f32 %v6386_v37  ;;  %v2190_v35 = vadd.f32 0.5, %v2189_v55 }
 0x81a   :  { %v4757_v36 = vpop.eup %4756 }
 0x81b   :  { %v2195_v40 = vmul.f32 %v4757_v36, %v2190_v35 }
 0x81d   :  { %v2196_v44 = vpack.c.bf16 %v2195_v40, %v2195_v40 }
 0x81f   :  { %2210 = vmatmul.bf16.vlgmr.msra.gmra.mxu0 %v2196_v44  ;;  %2223 = vmatmul.bf16.vlgmr.msra.gmra.mxu1 %v2196_v44 }
 0x820   :  { %2236 = vmatmul.bf16.vlgmr.msra.gmra.mxu2 %v2196_v44  ;;  %2249 = vmatmul.bf16.vlgmr.msra.gmra.mxu3 %v2196_v44 }
 0x821   :  { %2354 = vmatpush.bf16.msra.mxu0 %v6186_v26  ;;  %2367 = vmatpush.bf16.msra.mxu1 %v6188_v23 }
 0x822   :  { %2380 = vmatpush.bf16.msra.mxu2 %v6190_v39  ;;  %2393 = vmatpush.bf16.msra.mxu3 %v6193_v2 }
 0x825   :  { %2355 = vmatpush.bf16.msra.mxu0 %v6197_v14  ;;  %2368 = vmatpush.bf16.msra.mxu1 %v6199_v15 }
 0x826   :  { %2381 = vmatpush.bf16.msra.mxu2 %v6202_v60  ;;  %2394 = vmatpush.bf16.msra.mxu3 %v6204_v32 }
 0x829   :  { %2356 = vmatpush.bf16.msra.mxu0 %v6207_v8  ;;  %2369 = vmatpush.bf16.msra.mxu1 %v6211_v42 }
 0x82a   :  { %2382 = vmatpush.bf16.msra.mxu2 %v6213_v48  ;;  %2395 = vmatpush.bf16.msra.mxu3 %v6216_v27 }
 0x82d   :  { %2357 = vmatpush.bf16.msra.mxu0 %v6219_v38  ;;  %2370 = vmatpush.bf16.msra.mxu1 %v6223_v30 }
 0x82e   :  { %2383 = vmatpush.bf16.msra.mxu2 %v6225_v62  ;;  %2396 = vmatpush.bf16.msra.mxu3 %v6228_v29 }
 0x831   :  { %2358 = vmatpush.bf16.msra.mxu0 %v6231_v45  ;;  %2371 = vmatpush.bf16.msra.mxu1 %v6235_v49 }
 0x832   :  { %2384 = vmatpush.bf16.msra.mxu2 %v6237_v53  ;;  %2397 = vmatpush.bf16.msra.mxu3 %v6240_v25 }
 0x835   :  { %2359 = vmatpush.bf16.msra.mxu0 %v6243_v11  ;;  %2372 = vmatpush.bf16.msra.mxu1 %v6247_v41 }
 0x836   :  { %2385 = vmatpush.bf16.msra.mxu2 %v6249_v50  ;;  %2398 = vmatpush.bf16.msra.mxu3 %v6252_v13 }
 0x839   :  { %2360 = vmatpush.bf16.msra.mxu0 %v6255_v12  ;;  %2373 = vmatpush.bf16.msra.mxu1 %v6259_v5 }
 0x83a   :  { %2386 = vmatpush.bf16.msra.mxu2 %v6261_v47  ;;  %2399 = vmatpush.bf16.msra.mxu3 %v6264_v10 }
 0x83d   :  { %2361 = vmatpush.bf16.msra.mxu0 %v6267_v3  ;;  %2374 = vmatpush.bf16.msra.mxu1 %v6271_v6 }
 0x83e   :  { %2387 = vmatpush.bf16.msra.mxu2 %v6273_v22  ;;  %2400 = vmatpush.bf16.msra.mxu3 %v6276_v24 }
 0x89c   :  { %v2211_v61 = vpop.f32.mrf.mxu0  ;;  %v2224_v52 = vpop.f32.mrf.mxu1 }
 0x89d   :  { %v2212_v63 = vadd.f32 %v2211_v61, %v2198_v31  ;;  %v2225_v18 = vadd.f32 %v2224_v52, %v2199_v57 }
 0x89f   :  { %v2254_v9 = vmul.f32 0.5, %v2212_v63  ;;  %v2258_v33 = vmul.f32 0.5, %v2225_v18  ;;  %v2275_v63 = vld [vmem:[#allocation2 + $0x168] sm:$0xff] }
 0x8a1   :  { %4758 = vtanh.f32 %v2254_v9 }
 0x8a2   :  { %4760 = vtanh.f32 %v2258_v33 }
 0x8a3   :  { %v2237_v1 = vpop.f32.mrf.mxu2  ;;  %v2250_v4 = vpop.f32.mrf.mxu3 }
 0x8a4   :  { %v2238_v19 = vadd.f32 %v2237_v1, %v2200_v56  ;;  %v2251_v46 = vadd.f32 %v2250_v4, %v2201_v16  ;;  %v2213_v51 = vpop.f32.mrf.mxu0  ;;  %v2226_v54 = vpop.f32.mrf.mxu1  ;;  %v2276_v4 = vld [vmem:[#allocation2 + $0x170] sm:$0xff] }
 0x8a6   :  { %4762 = vtanh.f32 %v2238_v19  ;;  %v2263_v20 = vmul.f32 0.5, %v2251_v46  ;;  %v2277_v19 = vld [vmem:[#allocation2 + $0x178] sm:$0xff] }
 0x8a7   :  { %v4759_v0 = vpop.eup %4758 }
 0x8a8   :  { %v4761_v7 = vpop.eup %4760  ;;  %v2256_v17 = vmul.f32 0.5, %v4759_v0  ;;  %4764 = vtanh.f32 %v2263_v20 }
 0x8a9   :  { %v2260_v28 = vmul.f32 0.5, %v4761_v7 }
 0x8aa   :  { %v2257_v58 = vadd.f32 0.5, %v2256_v17 }
 0x8ab   :  { %v2261_v59 = vadd.f32 0.5, %v2260_v28  ;;  %v2239_v21 = vpop.f32.mrf.mxu2  ;;  %v2252_v43 = vpop.f32.mrf.mxu3 }
 0x8ac   :  { %v4763_v34 = vpop.eup %4762 }
 0x8ad   :  { %v2267_v55 = vmul.f32 %v2261_v59, %v6386_v37  ;;  %v2268_v35 = vmul.f32 %v4763_v34, %v2257_v58  ;;  %v2274_v37 = vld [vmem:[#allocation2 + $0x160] sm:$0xff] }
 0x8ae   :  { %v4765_v36 = vpop.eup %4764 }
 0x8af   :  { %v6422_v40 = vadd.f32 %v2268_v35, %v2267_v55  ;;  %v2265_v44 = vmul.f32 0.5, %v4765_v36 }
 0x8b1   :  { %4766 = vtanh.f32 %v6422_v40  ;;  %v2266_v31 = vadd.f32 0.5, %v2265_v44 }
 0x8b7   :  { %v4767_v57 = vpop.eup %4766 }
 0x8b8   :  { %v2271_v61 = vmul.f32 %v4767_v57, %v2266_v31 }
 0x8ba   :  { %v2272_v52 = vpack.c.bf16 %v2271_v61, %v2271_v61 }
 0x8bc   :  { %2286 = vmatmul.bf16.vlgmr.msrb.gmra.mxu0 %v2272_v52  ;;  %2299 = vmatmul.bf16.vlgmr.msrb.gmra.mxu1 %v2272_v52 }
 0x8bd   :  { %2312 = vmatmul.bf16.vlgmr.msrb.gmra.mxu2 %v2272_v52  ;;  %2325 = vmatmul.bf16.vlgmr.msrb.gmra.mxu3 %v2272_v52 }
 0x8be   :  { %2430 = vmatpush.bf16.msrb.mxu0 %v6186_v26  ;;  %2443 = vmatpush.bf16.msrb.mxu1 %v6188_v23 }
 0x8bf   :  { %2456 = vmatpush.bf16.msrb.mxu2 %v6190_v39  ;;  %2469 = vmatpush.bf16.msrb.mxu3 %v6193_v2 }
 0x8c2   :  { %2431 = vmatpush.bf16.msrb.mxu0 %v6197_v14  ;;  %2444 = vmatpush.bf16.msrb.mxu1 %v6199_v15 }
 0x8c3   :  { %2457 = vmatpush.bf16.msrb.mxu2 %v6202_v60  ;;  %2470 = vmatpush.bf16.msrb.mxu3 %v6204_v32 }
 0x8c6   :  { %2432 = vmatpush.bf16.msrb.mxu0 %v6207_v8  ;;  %2445 = vmatpush.bf16.msrb.mxu1 %v6211_v42 }
 0x8c7   :  { %2458 = vmatpush.bf16.msrb.mxu2 %v6213_v48  ;;  %2471 = vmatpush.bf16.msrb.mxu3 %v6216_v27 }
 0x8ca   :  { %2433 = vmatpush.bf16.msrb.mxu0 %v6219_v38  ;;  %2446 = vmatpush.bf16.msrb.mxu1 %v6223_v30 }
 0x8cb   :  { %2459 = vmatpush.bf16.msrb.mxu2 %v6225_v62  ;;  %2472 = vmatpush.bf16.msrb.mxu3 %v6228_v29 }
 0x8ce   :  { %2434 = vmatpush.bf16.msrb.mxu0 %v6231_v45  ;;  %2447 = vmatpush.bf16.msrb.mxu1 %v6235_v49 }
 0x8cf   :  { %2460 = vmatpush.bf16.msrb.mxu2 %v6237_v53  ;;  %2473 = vmatpush.bf16.msrb.mxu3 %v6240_v25 }
 0x8d2   :  { %2435 = vmatpush.bf16.msrb.mxu0 %v6243_v11  ;;  %2448 = vmatpush.bf16.msrb.mxu1 %v6247_v41 }
 0x8d3   :  { %2461 = vmatpush.bf16.msrb.mxu2 %v6249_v50  ;;  %2474 = vmatpush.bf16.msrb.mxu3 %v6252_v13 }
 0x8d6   :  { %2436 = vmatpush.bf16.msrb.mxu0 %v6255_v12  ;;  %2449 = vmatpush.bf16.msrb.mxu1 %v6259_v5 }
 0x8d7   :  { %2462 = vmatpush.bf16.msrb.mxu2 %v6261_v47  ;;  %2475 = vmatpush.bf16.msrb.mxu3 %v6264_v10 }
 0x8da   :  { %2437 = vmatpush.bf16.msrb.mxu0 %v6267_v3  ;;  %2450 = vmatpush.bf16.msrb.mxu1 %v6271_v6 }
 0x8db   :  { %2463 = vmatpush.bf16.msrb.mxu2 %v6273_v22  ;;  %2476 = vmatpush.bf16.msrb.mxu3 %v6276_v24 }
 0x939   :  { %v2287_v18 = vpop.f32.mrf.mxu0  ;;  %v2300_v9 = vpop.f32.mrf.mxu1 }
 0x93a   :  { %v2288_v33 = vadd.f32 %v2287_v18, %v2274_v37  ;;  %v2301_v56 = vadd.f32 %v2300_v9, %v2275_v63 }
 0x93c   :  { %v2330_v16 = vmul.f32 0.5, %v2288_v33  ;;  %v2334_v1 = vmul.f32 0.5, %v2301_v56  ;;  %v2351_v33 = vld [vmem:[#allocation2 + $0x188] sm:$0xff] }
 0x93e   :  { %4768 = vtanh.f32 %v2330_v16 }
 0x93f   :  { %4770 = vtanh.f32 %v2334_v1 }
 0x940   :  { %v2313_v46 = vpop.f32.mrf.mxu2  ;;  %v2326_v51 = vpop.f32.mrf.mxu3 }
 0x941   :  { %v2314_v54 = vadd.f32 %v2313_v46, %v2276_v4  ;;  %v2327_v20 = vadd.f32 %v2326_v51, %v2277_v19  ;;  %v2289_v0 = vpop.f32.mrf.mxu0  ;;  %v2302_v7 = vpop.f32.mrf.mxu1  ;;  %v2352_v51 = vld [vmem:[#allocation2 + $0x190] sm:$0xff] }
 0x943   :  { %4772 = vtanh.f32 %v2314_v54  ;;  %v2339_v17 = vmul.f32 0.5, %v2327_v20  ;;  %v2353_v54 = vld [vmem:[#allocation2 + $0x198] sm:$0xff] }
 0x944   :  { %v4769_v28 = vpop.eup %4768 }
 0x945   :  { %v4771_v58 = vpop.eup %4770  ;;  %v2332_v59 = vmul.f32 0.5, %v4769_v28  ;;  %4774 = vtanh.f32 %v2339_v17 }
 0x946   :  { %v2336_v21 = vmul.f32 0.5, %v4771_v58 }
 0x947   :  { %v2333_v43 = vadd.f32 0.5, %v2332_v59 }
 0x948   :  { %v2337_v34 = vadd.f32 0.5, %v2336_v21  ;;  %v2315_v55 = vpop.f32.mrf.mxu2  ;;  %v2328_v35 = vpop.f32.mrf.mxu3 }
 0x949   :  { %v4773_v36 = vpop.eup %4772 }
 0x94a   :  { %v2343_v44 = vmul.f32 %v2337_v34, %v6422_v40  ;;  %v2344_v31 = vmul.f32 %v4773_v36, %v2333_v43  ;;  %v2350_v40 = vld [vmem:[#allocation2 + $0x180] sm:$0xff] }
 0x94b   :  { %v4775_v57 = vpop.eup %4774 }
 0x94c   :  { %v6458_v61 = vadd.f32 %v2344_v31, %v2343_v44  ;;  %v2341_v52 = vmul.f32 0.5, %v4775_v57 }
 0x94e   :  { %4776 = vtanh.f32 %v6458_v61  ;;  %v2342_v37 = vadd.f32 0.5, %v2341_v52 }
 0x954   :  { %v4777_v63 = vpop.eup %4776 }
 0x955   :  { %v2347_v18 = vmul.f32 %v4777_v63, %v2342_v37 }
 0x957   :  { %v2348_v9 = vpack.c.bf16 %v2347_v18, %v2347_v18 }
 0x959   :  { %2362 = vmatmul.bf16.vlgmr.msra.gmra.mxu0 %v2348_v9  ;;  %2375 = vmatmul.bf16.vlgmr.msra.gmra.mxu1 %v2348_v9 }
 0x95a   :  { %2388 = vmatmul.bf16.vlgmr.msra.gmra.mxu2 %v2348_v9  ;;  %2401 = vmatmul.bf16.vlgmr.msra.gmra.mxu3 %v2348_v9 }
 0x95b   :  { %2506 = vmatpush.bf16.msra.mxu0 %v6186_v26  ;;  %2519 = vmatpush.bf16.msra.mxu1 %v6188_v23 }
 0x95c   :  { %2532 = vmatpush.bf16.msra.mxu2 %v6190_v39  ;;  %2545 = vmatpush.bf16.msra.mxu3 %v6193_v2 }
 0x95f   :  { %2507 = vmatpush.bf16.msra.mxu0 %v6197_v14  ;;  %2520 = vmatpush.bf16.msra.mxu1 %v6199_v15 }
 0x960   :  { %2533 = vmatpush.bf16.msra.mxu2 %v6202_v60  ;;  %2546 = vmatpush.bf16.msra.mxu3 %v6204_v32 }
 0x963   :  { %2508 = vmatpush.bf16.msra.mxu0 %v6207_v8  ;;  %2521 = vmatpush.bf16.msra.mxu1 %v6211_v42 }
 0x964   :  { %2534 = vmatpush.bf16.msra.mxu2 %v6213_v48  ;;  %2547 = vmatpush.bf16.msra.mxu3 %v6216_v27 }
 0x967   :  { %2509 = vmatpush.bf16.msra.mxu0 %v6219_v38  ;;  %2522 = vmatpush.bf16.msra.mxu1 %v6223_v30 }
 0x968   :  { %2535 = vmatpush.bf16.msra.mxu2 %v6225_v62  ;;  %2548 = vmatpush.bf16.msra.mxu3 %v6228_v29 }
 0x96b   :  { %2510 = vmatpush.bf16.msra.mxu0 %v6231_v45  ;;  %2523 = vmatpush.bf16.msra.mxu1 %v6235_v49 }
 0x96c   :  { %2536 = vmatpush.bf16.msra.mxu2 %v6237_v53  ;;  %2549 = vmatpush.bf16.msra.mxu3 %v6240_v25 }
 0x96f   :  { %2511 = vmatpush.bf16.msra.mxu0 %v6243_v11  ;;  %2524 = vmatpush.bf16.msra.mxu1 %v6247_v41 }
 0x970   :  { %2537 = vmatpush.bf16.msra.mxu2 %v6249_v50  ;;  %2550 = vmatpush.bf16.msra.mxu3 %v6252_v13 }
 0x973   :  { %2512 = vmatpush.bf16.msra.mxu0 %v6255_v12  ;;  %2525 = vmatpush.bf16.msra.mxu1 %v6259_v5 }
 0x974   :  { %2538 = vmatpush.bf16.msra.mxu2 %v6261_v47  ;;  %2551 = vmatpush.bf16.msra.mxu3 %v6264_v10 }
 0x977   :  { %2513 = vmatpush.bf16.msra.mxu0 %v6267_v3  ;;  %2526 = vmatpush.bf16.msra.mxu1 %v6271_v6 }
 0x978   :  { %2539 = vmatpush.bf16.msra.mxu2 %v6273_v22  ;;  %2552 = vmatpush.bf16.msra.mxu3 %v6276_v24 }
 0x9d6   :  { %v2363_v56 = vpop.f32.mrf.mxu0  ;;  %v2376_v16 = vpop.f32.mrf.mxu1 }
 0x9d7   :  { %v2364_v1 = vadd.f32 %v2363_v56, %v2350_v40  ;;  %v2377_v4 = vadd.f32 %v2376_v16, %v2351_v33 }
 0x9d9   :  { %v2406_v19 = vmul.f32 0.5, %v2364_v1  ;;  %v2410_v46 = vmul.f32 0.5, %v2377_v4 }
 0x9db   :  { %4778 = vtanh.f32 %v2406_v19  ;;  %v2502_v19 = vld [vmem:[#allocation2 + $0x1c0] sm:$0xff] }
 0x9dc   :  { %4780 = vtanh.f32 %v2410_v46  ;;  %v2503_v46 = vld [vmem:[#allocation2 + $0x1c8] sm:$0xff] }
 0x9dd   :  { %v2389_v20 = vpop.f32.mrf.mxu2  ;;  %v2402_v0 = vpop.f32.mrf.mxu3 }
 0x9de   :  { %v2390_v7 = vadd.f32 %v2389_v20, %v2352_v51  ;;  %v2403_v17 = vadd.f32 %v2402_v0, %v2353_v54  ;;  %v2365_v28 = vpop.f32.mrf.mxu0  ;;  %v2378_v58 = vpop.f32.mrf.mxu1 }
 0x9df   :  { %v4592_v28 = vld [vmem:[#allocation10 + $0x1c4] sm:$0xf] }
 0x9e0   :  { %4782 = vtanh.f32 %v2390_v7  ;;  %v2415_v59 = vmul.f32 0.5, %v2403_v17  ;;  %v4596_v7 = vld [vmem:[#allocation10 + $0x1e4] sm:$0xf]  ;;  %v4280_v17 = vld [vmem:[#allocation10 + $0x1f0] sm:$0xf0] }
 0x9e1   :  { %v4779_v21 = vpop.eup %4778  ;;  %v4283_v58 = vor.u32 %v4596_v7, %v4280_v17 }
 0x9e2   :  { %v4781_v43 = vpop.eup %4780  ;;  %v2408_v34 = vmul.f32 0.5, %v4779_v21  ;;  %4784 = vtanh.f32 %v2415_v59  ;;  %v4264_v59 = vld [vmem:[#allocation10 + $0x1d0] sm:$0xf0]  ;;  %v4150_v21 = vld [vmem:[#allocation10 + $0xe0] sm:$0xf] }
 0x9e3   :  { %v2412_v55 = vmul.f32 0.5, %v4781_v43  ;;  %v4566_v43 = vld [vmem:[#allocation10 + $0xec] sm:$0xf0] }
 0x9e4   :  { %v2409_v35 = vadd.f32 0.5, %v2408_v34 }
 0x9e5   :  { %v2413_v36 = vadd.f32 0.5, %v2412_v55  ;;  %v2391_v44 = vpop.f32.mrf.mxu2  ;;  %v2404_v31 = vpop.f32.mrf.mxu3 }
 0x9e6   :  { %v4783_v57 = vpop.eup %4782  ;;  %v4151_v44 = vor.u32 %v4566_v43, %v4150_v21  ;;  %v4278_v31 = vld [vmem:[#allocation10 + $0x1e0] sm:$0xf] }
 0x9e7   :  { %v2419_v52 = vmul.f32 %v2413_v36, %v6458_v61  ;;  %v2420_v37 = vmul.f32 %v4783_v57, %v2409_v35  ;;  %v2504_v35 = vld [vmem:[#allocation2 + $0x1d0] sm:$0xff]  ;;  %v2505_v36 = vld [vmem:[#allocation2 + $0x1d8] sm:$0xff]  ;;  %v4598_v57 = vld [vmem:[#allocation10 + $0x1ec] sm:$0xf0] }
 0x9e8   :  { %v4785_v63 = vpop.eup %4784 }
 0x9e9   :  { %v6494_v18 = vadd.f32 %v2420_v37, %v2419_v52  ;;  %v2417_v9 = vmul.f32 0.5, %v4785_v63  ;;  %v4267_v52 = vor.u32 %v4592_v28, %v4264_v59  ;;  %v4279_v37 = vor.u32 %v4598_v57, %v4278_v31  ;;  %v4564_v63 = vld [vmem:[#allocation10 + $0xe4] sm:$0xf] }
 0x9eb   :  { %4786 = vtanh.f32 %v6494_v18  ;;  %v2418_v40 = vadd.f32 0.5, %v2417_v9  ;;  %v4588_v9 = vld [vmem:[#allocation10 + $0x1a4] sm:$0xf] }
 0x9f1   :  { %v4787_v33 = vpop.eup %4786 }
 0x9f2   :  { %v2423_v56 = vmul.f32 %v4787_v33, %v2418_v40  ;;  %v4248_v33 = vld [vmem:[#allocation10 + $0x1b0] sm:$0xf0] }
 0x9f4   :  { %v2424_v16 = vpack.c.bf16 %v2423_v56, %v2423_v56  ;;  %v4134_v56 = vld [vmem:[#allocation10 + $0xc0] sm:$0xf] }
 0x9f6   :  { %2438 = vmatmul.bf16.vlgmr.msrb.gmra.mxu0 %v2424_v16  ;;  %2451 = vmatmul.bf16.vlgmr.msrb.gmra.mxu1 %v2424_v16 }
 0x9f7   :  { %2464 = vmatmul.bf16.vlgmr.msrb.gmra.mxu2 %v2424_v16  ;;  %2477 = vmatmul.bf16.vlgmr.msrb.gmra.mxu3 %v2424_v16  ;;  %v4562_v16 = vld [vmem:[#allocation10 + $0xcc] sm:$0xf0] }
 0x9f8   :  { %2582 = vmatpush.bf16.msrb.mxu0 %v6186_v26  ;;  %2595 = vmatpush.bf16.msrb.mxu1 %v6188_v23  ;;  %v2426_v26 = vld [vmem:[#allocation2 + $0x1a0] sm:$0xff]  ;;  %v2427_v23 = vld [vmem:[#allocation2 + $0x1a8] sm:$0xff] }
 0x9f9   :  { %2608 = vmatpush.bf16.msrb.mxu2 %v6190_v39  ;;  %2621 = vmatpush.bf16.msrb.mxu3 %v6193_v2 }
 0x9fc   :  { %2583 = vmatpush.bf16.msrb.mxu0 %v6197_v14  ;;  %2596 = vmatpush.bf16.msrb.mxu1 %v6199_v15 }
 0x9fd   :  { %2609 = vmatpush.bf16.msrb.mxu2 %v6202_v60  ;;  %2622 = vmatpush.bf16.msrb.mxu3 %v6204_v32 }
 0xa00   :  { %2584 = vmatpush.bf16.msrb.mxu0 %v6207_v8  ;;  %2597 = vmatpush.bf16.msrb.mxu1 %v6211_v42  ;;  %v2428_v8 = vld [vmem:[#allocation2 + $0x1b0] sm:$0xff]  ;;  %v2429_v42 = vld [vmem:[#allocation2 + $0x1b8] sm:$0xff] }
 0xa01   :  { %2610 = vmatpush.bf16.msrb.mxu2 %v6213_v48  ;;  %2623 = vmatpush.bf16.msrb.mxu3 %v6216_v27 }
 0xa04   :  { %2585 = vmatpush.bf16.msrb.mxu0 %v6219_v38  ;;  %2598 = vmatpush.bf16.msrb.mxu1 %v6223_v30 }
 0xa05   :  { %2611 = vmatpush.bf16.msrb.mxu2 %v6225_v62  ;;  %2624 = vmatpush.bf16.msrb.mxu3 %v6228_v29 }
 0xa08   :  { %2586 = vmatpush.bf16.msrb.mxu0 %v6231_v45  ;;  %2599 = vmatpush.bf16.msrb.mxu1 %v6235_v49 }
 0xa09   :  { %2612 = vmatpush.bf16.msrb.mxu2 %v6237_v53  ;;  %2625 = vmatpush.bf16.msrb.mxu3 %v6240_v25 }
 0xa0c   :  { %2587 = vmatpush.bf16.msrb.mxu0 %v6243_v11  ;;  %2600 = vmatpush.bf16.msrb.mxu1 %v6247_v41 }
 0xa0d   :  { %2613 = vmatpush.bf16.msrb.mxu2 %v6249_v50  ;;  %2626 = vmatpush.bf16.msrb.mxu3 %v6252_v13 }
 0xa10   :  { %2588 = vmatpush.bf16.msrb.mxu0 %v6255_v12  ;;  %2601 = vmatpush.bf16.msrb.mxu1 %v6259_v5 }
 0xa11   :  { %2614 = vmatpush.bf16.msrb.mxu2 %v6261_v47  ;;  %2627 = vmatpush.bf16.msrb.mxu3 %v6264_v10 }
 0xa14   :  { %2589 = vmatpush.bf16.msrb.mxu0 %v6267_v3  ;;  %2602 = vmatpush.bf16.msrb.mxu1 %v6271_v6 }
 0xa15   :  { %2615 = vmatpush.bf16.msrb.mxu2 %v6273_v22  ;;  %2628 = vmatpush.bf16.msrb.mxu3 %v6276_v24 }
 0xa73   :  { %v2439_v39 = vpop.f32.mrf.mxu0  ;;  %v2452_v2 = vpop.f32.mrf.mxu1 }
 0xa74   :  { %v2440_v14 = vadd.f32 %v2439_v39, %v2426_v26  ;;  %v2453_v15 = vadd.f32 %v2452_v2, %v2427_v23  ;;  %v4135_v26 = vor.u32 %v4562_v16, %v4134_v56  ;;  %v4262_v23 = vld [vmem:[#allocation10 + $0x1c0] sm:$0xf]  ;;  %v4594_v39 = vld [vmem:[#allocation10 + $0x1cc] sm:$0xf0]  ;;  %v4560_v2 = vld [vmem:[#allocation10 + $0xc4] sm:$0xf] }
 0xa75   :  { %v4214_v16 = vld [vmem:[#allocation10 + $0x160] sm:$0xf] }
 0xa76   :  { %v2482_v60 = vmul.f32 0.5, %v2440_v14  ;;  %v2486_v32 = vmul.f32 0.5, %v2453_v15 }
 0xa78   :  { %4788 = vtanh.f32 %v2482_v60  ;;  %v4263_v60 = vor.u32 %v4594_v39, %v4262_v23  ;;  %v4548_v23 = vld [vmem:[#allocation10 + $0x64] sm:$0xf] }
 0xa79   :  { %4790 = vtanh.f32 %v2486_v32  ;;  %v4136_v32 = vld [vmem:[#allocation10 + $0xd0] sm:$0xf0] }
 0xa7a   :  { %v2465_v48 = vpop.f32.mrf.mxu2  ;;  %v2478_v27 = vpop.f32.mrf.mxu3 }
 0xa7b   :  { %v2466_v38 = vadd.f32 %v2465_v48, %v2428_v8  ;;  %v2479_v30 = vadd.f32 %v2478_v27, %v2429_v42  ;;  %v2441_v62 = vpop.f32.mrf.mxu0  ;;  %v2454_v29 = vpop.f32.mrf.mxu1  ;;  %v4584_v8 = vld [vmem:[#allocation10 + $0x184] sm:$0xf]  ;;  %v4232_v42 = vld [vmem:[#allocation10 + $0x190] sm:$0xf0] }
 0xa7c   :  { %v4251_v62 = vor.u32 %v4588_v9, %v4248_v33  ;;  %v4139_v29 = vor.u32 %v4560_v2, %v4136_v32  ;;  %v4550_v33 = vld [vmem:[#allocation10 + $0x6c] sm:$0xf0]  ;;  %v4088_v2 = vld [vmem:[#allocation10 + $0x70] sm:$0xf0] }
 0xa7d   :  { %4792 = vtanh.f32 %v2466_v38  ;;  %v2491_v45 = vmul.f32 0.5, %v2479_v30 }
 0xa7e   :  { %v4789_v49 = vpop.eup %4788 }
 0xa7f   :  { %v4791_v53 = vpop.eup %4790  ;;  %v2484_v25 = vmul.f32 0.5, %v4789_v49  ;;  %4794 = vtanh.f32 %v2491_v45  ;;  %v4118_v45 = vld [vmem:[#allocation10 + $0xa0] sm:$0xf]  ;;  %v4558_v49 = vld [vmem:[#allocation10 + $0xac] sm:$0xf0] }
 0xa80   :  { %v2488_v11 = vmul.f32 0.5, %v4791_v53  ;;  %v4246_v53 = vld [vmem:[#allocation10 + $0x1a0] sm:$0xf] }
 0xa81   :  { %v2485_v41 = vadd.f32 0.5, %v2484_v25  ;;  %v4119_v25 = vor.u32 %v4558_v49, %v4118_v45  ;;  %v4568_v49 = vld [vmem:[#allocation10 + $0x104] sm:$0xf] }
 0xa82   :  { %v2489_v50 = vadd.f32 0.5, %v2488_v11  ;;  %v2467_v13 = vpop.f32.mrf.mxu2  ;;  %v2480_v12 = vpop.f32.mrf.mxu3  ;;  %v4590_v11 = vld [vmem:[#allocation10 + $0x1ac] sm:$0xf0] }
 0xa83   :  { %v4793_v5 = vpop.eup %4792  ;;  %v4247_v12 = vor.u32 %v4590_v11, %v4246_v53  ;;  %v4168_v53 = vld [vmem:[#allocation10 + $0x110] sm:$0xf0]  ;;  %v4288_v11 = vld [vmem:[#allocation10 + $0x1f8] sm:$0xf0] }
 0xa84   :  { %v2495_v47 = vmul.f32 %v2489_v50, %v6494_v18  ;;  %v2496_v10 = vmul.f32 %v4793_v5, %v2485_v41  ;;  %v4152_v18 = vld [vmem:[#allocation10 + $0xf0] sm:$0xf0]  ;;  %v4556_v41 = vld [vmem:[#allocation10 + $0xa4] sm:$0xf] }
 0xa85   :  { %v4795_v3 = vpop.eup %4794  ;;  %v4155_v40 = vor.u32 %v4564_v63, %v4152_v18  ;;  %v4120_v50 = vld [vmem:[#allocation10 + $0xb0] sm:$0xf0] }
 0xa86   :  { %v6530_v6 = vadd.f32 %v2496_v10, %v2495_v47  ;;  %v2493_v22 = vmul.f32 0.5, %v4795_v3  ;;  %v4123_v47 = vor.u32 %v4556_v41, %v4120_v50  ;;  %v4580_v10 = vld [vmem:[#allocation10 + $0x164] sm:$0xf]  ;;  %v4102_v3 = vld [vmem:[#allocation10 + $0x80] sm:$0xf]  ;;  %v4171_v41 = vor.u32 %v4568_v49, %v4168_v53 }
 0xa87   :  { %v4200_v18 = vld [vmem:[#allocation10 + $0x150] sm:$0xf0]  ;;  %v4110_v53 = vld [vmem:[#allocation10 + $0x88] sm:$0xf] }
 0xa88   :  { %4796 = vtanh.f32 %v6530_v6  ;;  %v2494_v24 = vadd.f32 0.5, %v2493_v22  ;;  %v4554_v22 = vld [vmem:[#allocation10 + $0x8c] sm:$0xf0] }
 0xa8e   :  { %v4797_v61 = vpop.eup %4796 }
 0xa8f   :  { %v2499_v1 = vmul.f32 %v4797_v61, %v2494_v24  ;;  %v4230_v24 = vld [vmem:[#allocation10 + $0x180] sm:$0xf] }
 0xa91   :  { %v2500_v4 = vpack.c.bf16 %v2499_v1, %v2499_v1 }
 0xa93   :  { %2514 = vmatmul.bf16.vlgmr.msra.gmra.mxu0 %v2500_v4  ;;  %2527 = vmatmul.bf16.vlgmr.msra.gmra.mxu1 %v2500_v4 }
 0xa94   :  { %2540 = vmatmul.bf16.vlgmr.msra.gmra.mxu2 %v2500_v4  ;;  %2553 = vmatmul.bf16.vlgmr.msra.gmra.mxu3 %v2500_v4  ;;  %v4235_v4 = vor.u32 %v4584_v8, %v4232_v42  ;;  %v4070_v8 = vld [vmem:[#allocation10 + $0x40] sm:$0xf]  ;;  %v4546_v42 = vld [vmem:[#allocation10 + $0x4c] sm:$0xf0] }
 0xa95   :  { %3087 = vmatpush.bf16.msra.mxu3 %v4283_v58  ;;  %3048 = vmatpush.bf16.msra.mxu0 %v4151_v44 }
 0xa96   :  { %3061 = vmatpush.bf16.msra.mxu1 %v4279_v37  ;;  %3074 = vmatpush.bf16.msra.mxu2 %v4155_v40  ;;  %v4086_v40 = vld [vmem:[#allocation10 + $0x60] sm:$0xf] }
 0xa97   :  { %v4087_v56 = vor.u32 %v4550_v33, %v4086_v40  ;;  %v4595_v33 = vld [vmem:[#allocation10 + $0x1d4] sm:$0xf0] }
 0xa99   :  { %3088 = vmatpush.bf16.msra.mxu3 %v4267_v52  ;;  %3049 = vmatpush.bf16.msra.mxu0 %v4135_v26  ;;  %v4582_v26 = vld [vmem:[#allocation10 + $0x16c] sm:$0xf0] }
 0xa9a   :  { %3062 = vmatpush.bf16.msra.mxu1 %v4263_v60  ;;  %3075 = vmatpush.bf16.msra.mxu2 %v4139_v29  ;;  %v4215_v39 = vor.u32 %v4582_v26, %v4214_v16  ;;  %v4091_v60 = vor.u32 %v4548_v23, %v4088_v2  ;;  %v4144_v16 = vld [vmem:[#allocation10 + $0xd8] sm:$0xf0] }
 0xa9b   :  { %v4240_v2 = vld [vmem:[#allocation10 + $0x198] sm:$0xf0] }
 0xa9d   :  { %3089 = vmatpush.bf16.msra.mxu3 %v4251_v62  ;;  %3050 = vmatpush.bf16.msra.mxu0 %v4119_v25  ;;  %v4072_v62 = vld [vmem:[#allocation10 + $0x50] sm:$0xf0]  ;;  %v4597_v25 = vld [vmem:[#allocation10 + $0x1ec] sm:$0xf] }
 0xa9e   :  { %3063 = vmatpush.bf16.msra.mxu1 %v4247_v12  ;;  %3076 = vmatpush.bf16.msra.mxu2 %v4123_v47  ;;  %v4291_v50 = vor.u32 %v4597_v25, %v4288_v11  ;;  %v4542_v12 = vld [vmem:[#allocation10 + $0x2c] sm:$0xf0]  ;;  %v4555_v25 = vld [vmem:[#allocation10 + $0x94] sm:$0xf0]  ;;  %v4238_v11 = vld [vmem:[#allocation10 + $0x188] sm:$0xf] }
 0xaa1   :  { %3090 = vmatpush.bf16.msra.mxu3 %v4235_v4  ;;  %v4272_v4 = vld [vmem:[#allocation10 + $0x1d8] sm:$0xf0] }
 0xb10   :  { %v2515_v51 = vpop.f32.mrf.mxu0  ;;  %v2528_v54 = vpop.f32.mrf.mxu1 }
 0xb11   :  { %v2516_v20 = vadd.f32 %v2515_v51, %v2502_v19  ;;  %v2529_v0 = vadd.f32 %v2528_v54, %v2503_v46  ;;  %v4586_v19 = vld [vmem:[#allocation10 + $0x18c] sm:$0xf0]  ;;  %v4552_v46 = vld [vmem:[#allocation10 + $0x84] sm:$0xf]  ;;  %v4216_v54 = vld [vmem:[#allocation10 + $0x170] sm:$0xf0] }
 0xb12   :  { %v4231_v17 = vor.u32 %v4586_v19, %v4230_v24 }
 0xb13   :  { %v2558_v34 = vmul.f32 0.5, %v2516_v20  ;;  %v2562_v55 = vmul.f32 0.5, %v2529_v0  ;;  %v4103_v20 = vor.u32 %v4554_v22, %v4102_v3  ;;  %v4104_v0 = vld [vmem:[#allocation10 + $0x90] sm:$0xf0]  ;;  %v4540_v3 = vld [vmem:[#allocation10 + $0x24] sm:$0xf] }
 0xb14   :  { %v4107_v21 = vor.u32 %v4552_v46, %v4104_v0  ;;  %3064 = vmatpush.bf16.msra.mxu1 %v4231_v17  ;;  %v4056_v22 = vld [vmem:[#allocation10 + $0x30] sm:$0xf0]  ;;  %v4038_v46 = vld [vmem:[#allocation10] sm:$0xf]  ;;  %v4570_v0 = vld [vmem:[#allocation10 + $0x10c] sm:$0xf0] }
 0xb15   :  { %4798 = vtanh.f32 %v2558_v34  ;;  %v4219_v34 = vor.u32 %v4580_v10, %v4216_v54  ;;  %3051 = vmatpush.bf16.msra.mxu0 %v4103_v20  ;;  %v4574_v10 = vld [vmem:[#allocation10 + $0x12c] sm:$0xf0]  ;;  %v4166_v54 = vld [vmem:[#allocation10 + $0x100] sm:$0xf]  ;;  %v4040_v17 = vld [vmem:[#allocation10 + $0x10] sm:$0xf0] }
 0xb16   :  { %4800 = vtanh.f32 %v2562_v55  ;;  %3077 = vmatpush.bf16.msra.mxu2 %v4107_v21  ;;  %v4567_v21 = vld [vmem:[#allocation10 + $0xf4] sm:$0xf0] }
 0xb17   :  { %v2541_v14 = vpop.f32.mrf.mxu2  ;;  %v2554_v15 = vpop.f32.mrf.mxu3  ;;  %3091 = vmatpush.bf16.msra.mxu3 %v4219_v34 }
 0xb18   :  { %v2542_v48 = vadd.f32 %v2541_v14, %v2504_v35  ;;  %v2555_v27 = vadd.f32 %v2554_v15, %v2505_v36  ;;  %v2517_v38 = vpop.f32.mrf.mxu0  ;;  %v2530_v30 = vpop.f32.mrf.mxu1  ;;  %v4572_v14 = vld [vmem:[#allocation10 + $0x124] sm:$0xf]  ;;  %v4184_v15 = vld [vmem:[#allocation10 + $0x130] sm:$0xf0]  ;;  %3065 = vmatpush.bf16.msra.mxu1 %v4215_v39  ;;  %v4585_v39 = vld [vmem:[#allocation10 + $0x18c] sm:$0xf] }
 0xb19   :  { %3052 = vmatpush.bf16.msra.mxu0 %v4087_v56  ;;  %v4187_v32 = vor.u32 %v4572_v14, %v4184_v15  ;;  %v4578_v38 = vld [vmem:[#allocation10 + $0x14c] sm:$0xf0]  ;;  %v4544_v30 = vld [vmem:[#allocation10 + $0x44] sm:$0xf]  ;;  %v4561_v56 = vld [vmem:[#allocation10 + $0xcc] sm:$0xf]  ;;  %v4243_v14 = vor.u32 %v4585_v39, %v4240_v2 }
 0xb1a   :  { %4802 = vtanh.f32 %v2542_v48  ;;  %v2567_v13 = vmul.f32 0.5, %v2555_v27  ;;  %v4198_v48 = vld [vmem:[#allocation10 + $0x140] sm:$0xf]  ;;  %3078 = vmatpush.bf16.msra.mxu2 %v4091_v60  ;;  %v4071_v27 = vor.u32 %v4546_v42, %v4070_v8  ;;  %v4075_v45 = vor.u32 %v4544_v30, %v4072_v62  ;;  %v4126_v15 = vld [vmem:[#allocation10 + $0xa8] sm:$0xf] }
 0xb1b   :  { %v4799_v5 = vpop.eup %4798  ;;  %v4199_v29 = vor.u32 %v4578_v38, %v4198_v48  ;;  %v4147_v23 = vor.u32 %v4561_v56, %v4144_v16  ;;  %v4559_v60 = vld [vmem:[#allocation10 + $0xb4] sm:$0xf0]  ;;  %v4557_v48 = vld [vmem:[#allocation10 + $0xac] sm:$0xf]  ;;  %v4176_v56 = vld [vmem:[#allocation10 + $0x118] sm:$0xf0] }
 0xb1c   :  { %v4801_v61 = vpop.eup %4800  ;;  %v2560_v1 = vmul.f32 0.5, %v4799_v5  ;;  %4804 = vtanh.f32 %v2567_v13  ;;  %v4054_v13 = vld [vmem:[#allocation10 + $0x20] sm:$0xf]  ;;  %v4127_v8 = vor.u32 %v4559_v60, %v4126_v15  ;;  %v4591_v42 = vld [vmem:[#allocation10 + $0x1b4] sm:$0xf0] }
 0xb1d   :  { %v2564_v51 = vmul.f32 0.5, %v4801_v61  ;;  %3053 = vmatpush.bf16.msra.mxu0 %v4071_v27  ;;  %3066 = vmatpush.bf16.msra.mxu1 %v4199_v29  ;;  %v4182_v5 = vld [vmem:[#allocation10 + $0x120] sm:$0xf]  ;;  %v4055_v47 = vor.u32 %v4542_v12, %v4054_v13  ;;  %v4059_v61 = vor.u32 %v4540_v3, %v4056_v22  ;;  %v4128_v27 = vld [vmem:[#allocation10 + $0xb8] sm:$0xf0]  ;;  %v2578_v22 = vld [vmem:[#allocation2 + $0x1e0] sm:$0xff] }
 0xb1e   :  { %v2561_v7 = vadd.f32 0.5, %v2560_v1  ;;  %3079 = vmatpush.bf16.msra.mxu2 %v4075_v45  ;;  %v4183_v24 = vor.u32 %v4574_v10, %v4182_v5  ;;  %v4593_v1 = vld [vmem:[#allocation10 + $0x1cc] sm:$0xf]  ;;  %v4131_v30 = vor.u32 %v4557_v48, %v4128_v27  ;;  %v4224_v29 = vld [vmem:[#allocation10 + $0x178] sm:$0xf0] }
 0xb1f   :  { %v2565_v28 = vadd.f32 0.5, %v2564_v51  ;;  %v2543_v58 = vpop.f32.mrf.mxu2  ;;  %v2556_v59 = vpop.f32.mrf.mxu3  ;;  %v4275_v19 = vor.u32 %v4593_v1, %v4272_v4  ;;  %v4538_v51 = vld [vmem:[#allocation10 + $0xc] sm:$0xf0]  ;;  %v4581_v62 = vld [vmem:[#allocation10 + $0x16c] sm:$0xf] }
 0xb20   :  { %v4803_v43 = vpop.eup %4802  ;;  %v4039_v20 = vor.u32 %v4538_v51, %v4038_v46  ;;  %v4158_v59 = vld [vmem:[#allocation10 + $0xe8] sm:$0xf]  ;;  %v6540_v45 = vld [vmem:[%s6555_s5] sm:$0xf]  ;;  %v4227_v49 = vor.u32 %v4581_v62, %v4224_v29  ;;  %v4112_v12 = vld [vmem:[#allocation10 + $0x98] sm:$0xf0] }
 0xb21   :  { %v2571_v55 = vmul.f32 %v2565_v28, %v6530_v6  ;;  %v2572_v35 = vmul.f32 %v4803_v43, %v2561_v7  ;;  %v4576_v6 = vld [vmem:[#allocation10 + $0x144] sm:$0xf]  ;;  %3054 = vmatpush.bf16.msra.mxu0 %v4055_v47  ;;  %3067 = vmatpush.bf16.msra.mxu1 %v4183_v24  ;;  %v4167_v28 = vor.u32 %v4570_v0, %v4166_v54  ;;  %v4286_v43 = vld [vmem:[#allocation10 + $0x1e8] sm:$0xf]  ;;  %v4553_v13 = vld [vmem:[#allocation10 + $0x8c] sm:$0xf] }
 0xb22   :  { %v4805_v36 = vpop.eup %4804  ;;  %v4203_v9 = vor.u32 %v4576_v6, %v4200_v18  ;;  %3080 = vmatpush.bf16.msra.mxu2 %v4059_v61  ;;  %v4536_v7 = vld [vmem:[#allocation10 + $0x4] sm:$0xf]  ;;  %v4159_v34 = vor.u32 %v4567_v21, %v4158_v59  ;;  %v4142_v6 = vld [vmem:[#allocation10 + $0xc8] sm:$0xf]  ;;  %v4563_v18 = vld [vmem:[#allocation10 + $0xd4] sm:$0xf0]  ;;  %v4115_v47 = vor.u32 %v4553_v13, %v4112_v12 }
 0xb23   :  { %v6534_v44 = vadd.f32 %v2572_v35, %v2571_v55  ;;  %v2569_v31 = vmul.f32 0.5, %v4805_v36  ;;  %v4043_v58 = vor.u32 %v4536_v7, %v4040_v17  ;;  %v4599_v55 = vld [vmem:[#allocation10 + $0x1f4] sm:$0xf0]  ;;  %v4565_v35 = vld [vmem:[#allocation10 + $0xec] sm:$0xf]  ;;  %v4143_v40 = vor.u32 %v4563_v18, %v4142_v6 }
 0xb24   :  { %3092 = vmatpush.bf16.msra.mxu3 %v4203_v9  ;;  %v4160_v36 = vld [vmem:[#allocation10 + $0xf8] sm:$0xf0]  ;;  %v4270_v9 = vld [vmem:[#allocation10 + $0x1c8] sm:$0xf]  ;;  %v4577_v10 = vld [vmem:[#allocation10 + $0x14c] sm:$0xf] }
 0xb25   :  { %4806 = vtanh.f32 %v6534_v44  ;;  %v2570_v57 = vadd.f32 0.5, %v2569_v31  ;;  %3055 = vmatpush.bf16.msra.mxu0 %v4039_v20  ;;  %3068 = vmatpush.bf16.msra.mxu1 %v4167_v28  ;;  %v4287_v31 = vor.u32 %v4599_v55, %v4286_v43  ;;  %v4271_v26 = vor.u32 %v4595_v33, %v4270_v9  ;;  %v4208_v3 = vld [vmem:[#allocation10 + $0x158] sm:$0xf0]  ;;  %v2579_v24 = vld [vmem:[#allocation2 + $0x1e8] sm:$0xff]  ;;  %v4094_v1 = vld [vmem:[#allocation10 + $0x68] sm:$0xf] }
 0xb26   :  { %3081 = vmatpush.bf16.msra.mxu2 %v4043_v58  ;;  %v4211_v61 = vor.u32 %v4577_v10, %v4208_v3  ;;  %v4551_v4 = vld [vmem:[#allocation10 + $0x74] sm:$0xf0]  ;;  %v4549_v54 = vld [vmem:[#allocation10 + $0x6c] sm:$0xf]  ;;  %v4096_v20 = vld [vmem:[#allocation10 + $0x78] sm:$0xf0] }
 0xb27   :  { %v4095_v46 = vor.u32 %v4551_v4, %v4094_v1  ;;  %v4583_v51 = vld [vmem:[#allocation10 + $0x174] sm:$0xf0]  ;;  %v4099_v28 = vor.u32 %v4549_v54, %v4096_v20  ;;  %v4573_v58 = vld [vmem:[#allocation10 + $0x12c] sm:$0xf]  ;;  %v4192_v59 = vld [vmem:[#allocation10 + $0x138] sm:$0xf0] }
 0xb28   :  { %3093 = vmatpush.bf16.msra.mxu3 %v4187_v32  ;;  %v4254_v32 = vld [vmem:[#allocation10 + $0x1a8] sm:$0xf]  ;;  %v4195_v55 = vor.u32 %v4573_v58, %v4192_v59  ;;  %v2580_v9 = vld [vmem:[#allocation2 + $0x1f0] sm:$0xff]  ;;  %v4575_v2 = vld [vmem:[#allocation10 + $0x134] sm:$0xf0] }
 0xb29   :  { %v4255_v38 = vor.u32 %v4591_v42, %v4254_v32  ;;  %v4078_v21 = vld [vmem:[#allocation10 + $0x48] sm:$0xf]  ;;  %v4541_v15 = vld [vmem:[#allocation10 + $0x2c] sm:$0xf]  ;;  %v4064_v60 = vld [vmem:[#allocation10 + $0x38] sm:$0xf0] }
 0xb2a   :  { %v4062_v16 = vld [vmem:[#allocation10 + $0x28] sm:$0xf]  ;;  %v4067_v27 = vor.u32 %v4541_v15, %v4064_v60  ;;  %v4613_v58 = vld [vmem:[#allocation13 + $0x68] sm:$0xff]  ;;  %v4619_v60 = vld [vmem:[#allocation13 + $0x98] sm:$0xff] }
 0xb2b   :  { %v4807_v52 = vpop.eup %4806  ;;  %v4190_v39 = vld [vmem:[#allocation10 + $0x128] sm:$0xf] }
 0xb2c   :  { %v2575_v37 = vmul.f32 %v4807_v52, %v2570_v57  ;;  %3094 = vmatpush.bf16.msra.mxu3 %v4171_v41  ;;  %v4163_v57 = vor.u32 %v4565_v35, %v4160_v36  ;;  %v4589_v52 = vld [vmem:[#allocation10 + $0x1ac] sm:$0xf]  ;;  %v4111_v41 = vor.u32 %v4555_v25, %v4110_v53  ;;  %v4547_v35 = vld [vmem:[#allocation10 + $0x54] sm:$0xf0]  ;;  %v4206_v36 = vld [vmem:[#allocation10 + $0x148] sm:$0xf]  ;;  %v4191_v48 = vor.u32 %v4575_v2, %v4190_v39 }
 0xb2d   :  { %v4174_v62 = vld [vmem:[#allocation10 + $0x108] sm:$0xf]  ;;  %v4609_v39 = vld [vmem:[#allocation13 + $0x48] sm:$0xff] }
 0xb2e   :  { %v2576_v63 = vpack.c.bf16 %v2575_v37, %v2575_v37  ;;  %v4256_v37 = vld [vmem:[#allocation10 + $0x1b8] sm:$0xf0]  ;;  %v4629_v2 = vld [vmem:[#allocation13 + $0xe8] sm:$0xff] }
 0xb30   :  { %2590 = vmatmul.bf16.vlgmr.msrb.gmra.mxu0 %v2576_v63  ;;  %2603 = vmatmul.bf16.vlgmr.msrb.gmra.mxu1 %v2576_v63 }
 0xb31   :  { %2616 = vmatmul.bf16.vlgmr.msrb.gmra.mxu2 %v2576_v63  ;;  %2629 = vmatmul.bf16.vlgmr.msrb.gmra.mxu3 %v2576_v63  ;;  %v4259_v63 = vor.u32 %v4589_v52, %v4256_v37  ;;  %v4545_v52 = vld [vmem:[#allocation10 + $0x4c] sm:$0xf]  ;;  %v4080_v37 = vld [vmem:[#allocation10 + $0x58] sm:$0xf0] }
 0xb32   :  { %3139 = vmatpush.bf16.msrb.mxu3 %v4291_v50  ;;  %3100 = vmatpush.bf16.msrb.mxu0 %v4159_v34  ;;  %v4587_v50 = vld [vmem:[#allocation10 + $0x194] sm:$0xf0]  ;;  %v4083_v33 = vor.u32 %v4545_v52, %v4080_v37  ;;  %v4603_v52 = vld [vmem:[#allocation13 + $0x18] sm:$0xff] }
 0xb33   :  { %3113 = vmatpush.bf16.msrb.mxu1 %v4287_v31  ;;  %3126 = vmatpush.bf16.msrb.mxu2 %v4163_v57  ;;  %v4239_v5 = vor.u32 %v4587_v50, %v4238_v11  ;;  %v4579_v31 = vld [vmem:[#allocation10 + $0x154] sm:$0xf0]  ;;  %v4079_v57 = vor.u32 %v4547_v35, %v4078_v21  ;;  %v4048_v50 = vld [vmem:[#allocation10 + $0x18] sm:$0xf0] }
 0xb34   :  { %v4571_v11 = vld [vmem:[#allocation10 + $0x114] sm:$0xf0]  ;;  %v4623_v35 = vld [vmem:[#allocation13 + $0xb8] sm:$0xff] }
 0xb35   :  { %v4602_v37 = vld [vmem:[#allocation13 + $0x10] sm:$0xff] }
 0xb36   :  { %3140 = vmatpush.bf16.msrb.mxu3 %v4275_v19  ;;  %3101 = vmatpush.bf16.msrb.mxu0 %v4143_v40  ;;  %v4222_v19 = vld [vmem:[#allocation10 + $0x168] sm:$0xf]  ;;  %v4207_v40 = vor.u32 %v4579_v31, %v4206_v36  ;;  %v4605_v31 = vld [vmem:[#allocation13 + $0x28] sm:$0xff] }
 0xb37   :  { %3114 = vmatpush.bf16.msrb.mxu1 %v4271_v26  ;;  %3127 = vmatpush.bf16.msrb.mxu2 %v4147_v23  ;;  %v4223_v17 = vor.u32 %v4583_v51, %v4222_v19  ;;  %v4543_v23 = vld [vmem:[#allocation10 + $0x34] sm:$0xf0]  ;;  %v4615_v51 = vld [vmem:[#allocation13 + $0x78] sm:$0xff] }
 0xb38   :  { %v4063_v32 = vor.u32 %v4543_v23, %v4062_v16  ;;  %v4630_v16 = vld [vmem:[#allocation13 + $0xf0] sm:$0xff]  ;;  %v4620_v23 = vld [vmem:[#allocation13 + $0xa0] sm:$0xff] }
 0xb3a   :  { %3141 = vmatpush.bf16.msrb.mxu3 %v4259_v63  ;;  %3102 = vmatpush.bf16.msrb.mxu0 %v4127_v8  ;;  %v4569_v63 = vld [vmem:[#allocation10 + $0x10c] sm:$0xf] }
 0xb3b   :  { %3115 = vmatpush.bf16.msrb.mxu1 %v4255_v38  ;;  %3128 = vmatpush.bf16.msrb.mxu2 %v4131_v30  ;;  %v4179_v26 = vor.u32 %v4569_v63, %v4176_v56  ;;  %v4046_v38 = vld [vmem:[#allocation10 + $0x8] sm:$0xf]  ;;  %v4539_v30 = vld [vmem:[#allocation10 + $0x14] sm:$0xf0]  ;;  %v4611_v63 = vld [vmem:[#allocation13 + $0x58] sm:$0xff] }
 0xb3c   :  { %v4047_v12 = vor.u32 %v4539_v30, %v4046_v38  ;;  %v4610_v56 = vld [vmem:[#allocation13 + $0x50] sm:$0xff] }
 0xb3e   :  { %3142 = vmatpush.bf16.msrb.mxu3 %v4243_v14  ;;  %3103 = vmatpush.bf16.msrb.mxu0 %v4111_v41  ;;  %v2581_v14 = vld [vmem:[#allocation2 + $0x1f8] sm:$0xff]  ;;  %v4537_v41 = vld [vmem:[#allocation10 + $0xc] sm:$0xf] }
 0xb3f   :  { %3116 = vmatpush.bf16.msrb.mxu1 %v4239_v5  ;;  %3129 = vmatpush.bf16.msrb.mxu2 %v4115_v47  ;;  %v4175_v47 = vor.u32 %v4571_v11, %v4174_v62  ;;  %v4051_v10 = vor.u32 %v4537_v41, %v4048_v50  ;;  %v4626_v62 = vld [vmem:[#allocation13 + $0xd0] sm:$0xff]  ;;  %v4624_v41 = vld [vmem:[#allocation13 + $0xc0] sm:$0xff] }
 0xb40   :  { %3069 = vmatmul.bf16.vlgmr.msra.gmra.mxu1 %v6540_v45 }
 0xb41   :  { %3095 = vmatmul.bf16.vlgmr.msra.gmra.mxu3 %v6540_v45 }
 0xb42   :  { %3143 = vmatpush.bf16.msrb.mxu3 %v4227_v49  ;;  %3104 = vmatpush.bf16.msrb.mxu0 %v4095_v46 }
 0xb43   :  { %3117 = vmatpush.bf16.msrb.mxu1 %v4223_v17  ;;  %3130 = vmatpush.bf16.msrb.mxu2 %v4099_v28  ;;  %v4614_v17 = vld [vmem:[#allocation13 + $0x70] sm:$0xff] }
 0xb46   :  { %3144 = vmatpush.bf16.msrb.mxu3 %v4211_v61  ;;  %3105 = vmatpush.bf16.msrb.mxu0 %v4079_v57  ;;  %v4604_v57 = vld [vmem:[#allocation13 + $0x20] sm:$0xff] }
 0xb47   :  { %3118 = vmatpush.bf16.msrb.mxu1 %v4207_v40  ;;  %3131 = vmatpush.bf16.msrb.mxu2 %v4083_v33  ;;  %v4601_v40 = vld [vmem:[#allocation13 + $0x8] sm:$0xff] }
 0xb48   :  { %v4621_v33 = vld [vmem:[#allocation13 + $0xa8] sm:$0xff] }
 0xb4a   :  { %3145 = vmatpush.bf16.msrb.mxu3 %v4195_v55  ;;  %3106 = vmatpush.bf16.msrb.mxu0 %v4063_v32  ;;  %v4607_v55 = vld [vmem:[#allocation13 + $0x38] sm:$0xff]  ;;  %v4608_v32 = vld [vmem:[#allocation13 + $0x40] sm:$0xff] }
 0xb4b   :  { %3119 = vmatpush.bf16.msrb.mxu1 %v4191_v48  ;;  %3132 = vmatpush.bf16.msrb.mxu2 %v4067_v27  ;;  %v4627_v48 = vld [vmem:[#allocation13 + $0xd8] sm:$0xff]  ;;  %v4617_v27 = vld [vmem:[#allocation13 + $0x88] sm:$0xff] }
 0xb4e   :  { %3146 = vmatpush.bf16.msrb.mxu3 %v4179_v26  ;;  %3107 = vmatpush.bf16.msrb.mxu0 %v4047_v12  ;;  %v4600_v26 = vld [vmem:[#allocation13] sm:$0xff] }
 0xb4f   :  { %3120 = vmatpush.bf16.msrb.mxu1 %v4175_v47  ;;  %3133 = vmatpush.bf16.msrb.mxu2 %v4051_v10 }
 0xb51   :  { %3147 = vmatmul.bf16.vlgmr.msrb.gmra.mxu3 %v6540_v45 }
 0xb52   :  { %3121 = vmatmul.bf16.vlgmr.msrb.gmra.mxu1 %v6540_v45  ;;  %v4622_v45 = vld [vmem:[#allocation13 + $0xb0] sm:$0xff] }
 0xb53   :  { %3433 = vmatpush.bf16.msra.mxu1 %v4615_v51 }
 0xb57   :  { %3434 = vmatpush.bf16.msra.mxu1 %v4614_v17 }
 0xb5b   :  { %3435 = vmatpush.bf16.msra.mxu1 %v4613_v58 }
 0xbad   :  { %v2591_v0 = vpop.f32.mrf.mxu0  ;;  %v2604_v7 = vpop.f32.mrf.mxu1 }
 0xbae   :  { %v2592_v43 = vadd.f32 %v2591_v0, %v2578_v22  ;;  %v2605_v34 = vadd.f32 %v2604_v7, %v2579_v24 }
 0xbb0   :  { %v2634_v6 = vmul.f32 0.5, %v2592_v43  ;;  %v2638_v18 = vmul.f32 0.5, %v2605_v34  ;;  %v4612_v43 = vld [vmem:[#allocation13 + $0x60] sm:$0xff] }
 0xbb1   :  { %3436 = vmatpush.bf16.msra.mxu1 %v4612_v43 }
 0xbb2   :  { %4808 = vtanh.f32 %v2634_v6  ;;  %v4631_v6 = vld [vmem:[#allocation13 + $0xf8] sm:$0xff] }
 0xbb3   :  { %4810 = vtanh.f32 %v2638_v18  ;;  %3459 = vmatpush.bf16.msra.mxu3 %v4631_v6 }
 0xbb4   :  { %v2617_v8 = vpop.f32.mrf.mxu2  ;;  %v2630_v42 = vpop.f32.mrf.mxu3 }
 0xbb5   :  { %v2618_v29 = vadd.f32 %v2617_v8, %v2580_v9  ;;  %v2631_v49 = vadd.f32 %v2630_v42, %v2581_v14  ;;  %v2593_v53 = vpop.f32.mrf.mxu0  ;;  %v2606_v25 = vpop.f32.mrf.mxu1  ;;  %3437 = vmatpush.bf16.msra.mxu1 %v4611_v63  ;;  %v4628_v8 = vld [vmem:[#allocation13 + $0xe0] sm:$0xff]  ;;  %v4618_v42 = vld [vmem:[#allocation13 + $0x90] sm:$0xff] }
 0xbb6   :  { %v2718_v53 = vld [vmem:[#allocation11] sm:$0xf] }
 0xbb7   :  { %4812 = vtanh.f32 %v2618_v29  ;;  %v2643_v13 = vmul.f32 0.5, %v2631_v49  ;;  %3460 = vmatpush.bf16.msra.mxu3 %v4630_v16  ;;  %v4616_v29 = vld [vmem:[#allocation13 + $0x80] sm:$0xff]  ;;  %v4625_v49 = vld [vmem:[#allocation13 + $0xc8] sm:$0xff]  ;;  %v2720_v50 = vperm.slane %v2718_v53, 0  ;;  %v2721_v47 = vperm.slane %v2718_v53, 1 }
 0xbb8   :  { %v4809_v5 = vpop.eup %4808 }
 0xbb9   :  { %v4811_v3 = vpop.eup %4810  ;;  %v2636_v22 = vmul.f32 0.5, %v4809_v5  ;;  %4814 = vtanh.f32 %v2643_v13  ;;  %3438 = vmatpush.bf16.msra.mxu1 %v4610_v56 }
 0xbba   :  { %v2640_v24 = vmul.f32 0.5, %v4811_v3 }
 0xbbb   :  { %v2637_v61 = vadd.f32 0.5, %v2636_v22  ;;  %3461 = vmatpush.bf16.msra.mxu3 %v4629_v2 }
 0xbbc   :  { %v2641_v1 = vadd.f32 0.5, %v2640_v24  ;;  %v2619_v4 = vpop.f32.mrf.mxu2  ;;  %v2632_v19 = vpop.f32.mrf.mxu3 }
 0xbbd   :  { %v4813_v46 = vpop.eup %4812  ;;  %v3070_v18 = vpop.f32.mrf.mxu1  ;;  %3439 = vmatpush.bf16.msra.mxu1 %v4609_v39 }
 0xbbe   :  { %v2647_v54 = vmul.f32 %v2641_v1, %v6534_v44  ;;  %v2648_v20 = vmul.f32 %v4813_v46, %v2637_v61  ;;  %v4606_v44 = vld [vmem:[#allocation13 + $0x30] sm:$0xff]  ;;  %v2722_v46 = vperm.slane %v2718_v53, 2 }
 0xbbf   :  { %v4815_v0 = vpop.eup %4814  ;;  %3462 = vmatpush.bf16.msra.mxu3 %v4628_v8 }
 0xbc0   :  { %v2649_v7 = vadd.f32 %v2648_v20, %v2647_v54  ;;  %v2645_v28 = vmul.f32 0.5, %v4815_v0 }
 0xbc1   :  { %3440 = vmatpush.bf16.msra.mxu1 %v4608_v32 }
 0xbc2   :  { %4816 = vtanh.f32 %v2649_v7  ;;  %v2646_v59 = vadd.f32 0.5, %v2645_v28  ;;  %v2723_v7 = vperm.slane %v2718_v53, 3 }
 0xbc3   :  { %3463 = vmatpush.bf16.msra.mxu3 %v4627_v48 }
 0xbc4   :  { %v3096_v9 = vpop.f32.mrf.mxu3 }
 0xbc5   :  { %v3072_v14 = vpop.f32.mrf.mxu1 }
 0xbc7   :  { %3464 = vmatpush.bf16.msra.mxu3 %v4626_v62 }
 0xbc8   :  { %v4817_v21 = vpop.eup %4816 }
 0xbc9   :  { %v2651_v34 = vmul.f32 %v4817_v21, %v2646_v59 }
 0xbcb   :  { %v2652_v36 = vpack.c.bf16 %v2651_v34, %v2651_v34  ;;  %3465 = vmatpush.bf16.msra.mxu3 %v4625_v49 }
 0xbcc   :  { %v3098_v15 = vpop.f32.mrf.mxu3 }
 0xbcd   :  { %3056 = vmatmul.bf16.vlgmr.msra.gmra.mxu0 %v2652_v36  ;;  %3082 = vmatmul.bf16.vlgmr.msra.gmra.mxu2 %v2652_v36 }
 0xbce   :  { %3420 = vmatpush.bf16.msra.mxu0 %v4607_v55  ;;  %3446 = vmatpush.bf16.msra.mxu2 %v4623_v35 }
 0xbcf   :  { %v3122_v38 = vpop.f32.mrf.mxu1  ;;  %3466 = vmatpush.bf16.msra.mxu3 %v4624_v41 }
 0xbd2   :  { %3421 = vmatpush.bf16.msra.mxu0 %v4606_v44  ;;  %3447 = vmatpush.bf16.msra.mxu2 %v4622_v45 }
 0xbd4   :  { %v3148_v30 = vpop.f32.mrf.mxu3 }
 0xbd6   :  { %3422 = vmatpush.bf16.msra.mxu0 %v4605_v31  ;;  %3448 = vmatpush.bf16.msra.mxu2 %v4621_v33 }
 0xbd7   :  { %v3124_v25 = vpop.f32.mrf.mxu1 }
 0xbda   :  { %3423 = vmatpush.bf16.msra.mxu0 %v4604_v57  ;;  %3449 = vmatpush.bf16.msra.mxu2 %v4620_v23  ;;  %v4737_v57 = vld [vmem:[#allocation14] ss:$0 sm:$0xff] }
 0xbdc   :  { %v3150_v11 = vpop.f32.mrf.mxu3 }
 0xbdd   :  { %3108 = vmatmul.bf16.vlgmr.msrb.gmra.mxu0 %v2652_v36  ;;  %3134 = vmatmul.bf16.vlgmr.msrb.gmra.mxu2 %v2652_v36 }
 0xbde   :  { %3424 = vmatpush.bf16.msra.mxu0 %v4603_v52  ;;  %3450 = vmatpush.bf16.msra.mxu2 %v4619_v60 }
 0xbe2   :  { %3425 = vmatpush.bf16.msra.mxu0 %v4602_v37  ;;  %3451 = vmatpush.bf16.msra.mxu2 %v4618_v42 }
 0xbe6   :  { %3426 = vmatpush.bf16.msra.mxu0 %v4601_v40  ;;  %3452 = vmatpush.bf16.msra.mxu2 %v4617_v27 }
 0xbea   :  { %3427 = vmatpush.bf16.msra.mxu0 %v4600_v26  ;;  %3453 = vmatpush.bf16.msra.mxu2 %v4616_v29 }
 0xc4a   :  { %v3057_v13 = vpop.f32.mrf.mxu0 }
 0xc4b   :  { %v3058_v12 = vadd.f32 %v3057_v13, %v2720_v50 }
 0xc4d   :  { %v3071_v5 = vadd.f32 %v3070_v18, %v3058_v12 }
 0xc4f   :  { %v3152_v10 = vmax.f32 %v3071_v5, 0.0 }
 0xc50   :  { %v3083_v3 = vpop.f32.mrf.mxu2 }
 0xc51   :  { %v3156_v22 = vpack.c.bf16 %v3152_v10, %v3152_v10  ;;  %v3084_v24 = vadd.f32 %v3083_v3, %v2721_v47 }
 0xc52   :  { %v3059_v61 = vpop.f32.mrf.mxu0 }
 0xc53   :  { %v3097_v1 = vadd.f32 %v3096_v9, %v3084_v24  ;;  %3428 = vmatmul.bf16.vlgmr.msra.gmra.mxu0 %v3156_v22 }
 0xc55   :  { %v3153_v4 = vmax.f32 %v3097_v1, 0.0 }
 0xc57   :  { %v3157_v19 = vpack.c.bf16 %v3153_v4, %v3153_v4 }
 0xc58   :  { %v3085_v51 = vpop.f32.mrf.mxu2 }
 0xc59   :  { %3441 = vmatmul.bf16.vlgmr.msra.gmra.mxu1 %v3157_v19 }
 0xc5a   :  { %v3109_v54 = vpop.f32.mrf.mxu0 }
 0xc5b   :  { %v3110_v20 = vadd.f32 %v3109_v54, %v2722_v46 }
 0xc5d   :  { %v3123_v0 = vadd.f32 %v3122_v38, %v3110_v20 }
 0xc5f   :  { %v3154_v17 = vmax.f32 %v3123_v0, 0.0 }
 0xc60   :  { %v3135_v28 = vpop.f32.mrf.mxu2 }
 0xc61   :  { %v3158_v58 = vpack.c.bf16 %v3154_v17, %v3154_v17  ;;  %v3136_v59 = vadd.f32 %v3135_v28, %v2723_v7 }
 0xc62   :  { %v3111_v21 = vpop.f32.mrf.mxu0 }
 0xc63   :  { %v3149_v43 = vadd.f32 %v3148_v30, %v3136_v59  ;;  %3454 = vmatmul.bf16.vlgmr.msra.gmra.mxu2 %v3158_v58 }
 0xc65   :  { %v3155_v34 = vmax.f32 %v3149_v43, 0.0 }
 0xc67   :  { %v3159_v55 = vpack.c.bf16 %v3155_v34, %v3155_v34 }
 0xc68   :  { %v3137_v35 = vpop.f32.mrf.mxu2 }
 0xc69   :  { %3467 = vmatmul.bf16.vlgmr.msra.gmra.mxu3 %v3159_v55 }
 0xcd0   :  { %v3429_v36 = vpop.f32.mrf.mxu0 }
 0xcd1   :  { %v3430_v37 = vadd.f32 %v4737_v57, %v3429_v36 }
 0xcd6   :  { %v3442_v44 = vpop.f32.mrf.mxu1 }
 0xcd7   :  { %v3443_v63 = vadd.f32 %v3442_v44, %v3430_v37 }
 0xcd8   :  { %v3431_v45 = vpop.f32.mrf.mxu0 }
 0xcde   :  { %v3444_v31 = vpop.f32.mrf.mxu1 }
 0xce6   :  { %v3455_v52 = vpop.f32.mrf.mxu2 }
 0xce7   :  { %v3456_v6 = vadd.f32 %v3455_v52, %v3443_v63 }
 0xcec   :  { %v3468_v18 = vpop.f32.mrf.mxu3 }
 0xced   :  { %v3469_v9 = vadd.f32 %v3468_v18, %v3456_v6 }
 0xcee   :  { %v3457_v40 = vpop.f32.mrf.mxu2 }
 0xcef   :  { %3472 = vst [vmem:[%s6560_s10] sm:$0xff] %v3469_v9 }
 0xcf4   :  { %v3470_v33 = vpop.f32.mrf.mxu3 }
 0xcf5   :  { %3477 = vsyncpa [#allocation4], 1 }
 0xcf6   :  { %3478 = vsyncpa [#allocation6], 1 }
 0xcf7   :  { %3479 = vsyncpa [#allocation9], 1 }
 0xcf8   :  { %3480 = vsyncpa [#allocation12], 1 }
 0xcf9   :  { %3481 = vsyncpa [#allocation15], 1 }

</bundles_post_ra>
